<compile_context>
chip_gen: v5e
topology: v5e:2x2
jax: 0.10.0
libtpu: 0.0.40
codegen_flags: <defaults>
</compile_context>

<pallas_src>
import functools

import jax
import jax.numpy as jnp
from jax.experimental import pallas as pl
from jax.experimental.pallas import tpu as pltpu

_VMEM_LIMIT_BYTES = 32 * 1024 * 1024
_BLOCK_M = 512          # cap on rows per grid step (VMEM safety at large M)
_BN_EPS = 1e-3


def _round_up(x, m):
    return ((x + m - 1) // m) * m


def _tile_m(m, max_bm=_BLOCK_M):
    """Pick an M block: >=2 grid steps when possible (v7x megacore), 16-row
    aligned (bf16 sublane packing), capped for VMEM safety at large M."""
    bm = _round_up(max((m + 1) // 2, 16), 16)
    bm = min(bm, max_bm)
    return bm, _round_up(m, bm)


# ----------------------------- Pallas kernels ------------------------------

def _conv_kernel(x_ref, w_ref, b_ref, o_ref):
    """(bm, K) @ (K, Cout) on the MXU (f32 accum); BN-folded bias + ReLU."""
    acc = jnp.dot(x_ref[...], w_ref[...], preferred_element_type=jnp.float32)
    o_ref[...] = jnp.maximum(acc + b_ref[...], 0.0).astype(o_ref.dtype)


def _stage4_kernel(slab_ref, wb2_ref, bb2_ref, w1p_ref, w1c_ref, b1_ref,
                   o_ref, *, c_in):
    """branch1 maxpool + branch2 conv + fused branch3/4 1x1 conv, all in VMEM.

    slab columns are tap-major (9 taps of the 3x3/s2 window), so one block
    feeds both the conv matmul and the pool (running max over lane groups).
    The 160-channel cat(pool, conv) never hits HBM: the fused 1x1 matmul is
    split into a pool-input part (w1p) and a conv-input part (w1c).
    """
    slab = slab_ref[...]                                       # (bm, 9*c_in) bf16
    conv = jnp.dot(slab, wb2_ref[...], preferred_element_type=jnp.float32)
    conv = jnp.maximum(conv + bb2_ref[...], 0.0)               # (bm, 96) f32
    pool = slab[:, 0:c_in]
    for t in range(1, 9):
        pool = jnp.maximum(pool, slab[:, t * c_in:(t + 1) * c_in])
    y = jnp.dot(pool, w1p_ref[...], preferred_element_type=jnp.float32)
    y = y + jnp.dot(conv.astype(jnp.bfloat16), w1c_ref[...],
                    preferred_element_type=jnp.float32)
    o_ref[...] = jnp.maximum(y + b1_ref[...], 0.0).astype(o_ref.dtype)


def _stage5_kernel(slab_ref, w34_ref, b34_ref, w6_ref, b6_ref, o_ref,
                   *, s, oh, c_mid, c6):
    """Fused branch3/4 3x3 (block-diagonal) conv + branch5 maxpool + branch6
    conv for one batch element; the 192-channel activation stays in VMEM."""
    slab = slab_ref[0]                                         # (rows_pad, 9*128)
    act = jnp.dot(slab, w34_ref[...], preferred_element_type=jnp.float32)
    act = jnp.maximum(act + b34_ref[...], 0.0)                 # (rows_pad, c_mid)
    act_bf = act.astype(jnp.bfloat16)
    for oy in range(oh):
        for ox in range(oh):
            y0, x0 = 2 * oy, 2 * ox
            # branch5: 2x2 / stride-2 max pool on the resident activation.
            r00, r01 = y0 * s + x0, y0 * s + x0 + 1
            r10, r11 = (y0 + 1) * s + x0, (y0 + 1) * s + x0 + 1
            pool = jnp.maximum(
                jnp.maximum(act[r00:r00 + 1, :], act[r01:r01 + 1, :]),
                jnp.maximum(act[r10:r10 + 1, :], act[r11:r11 + 1, :]))
            # branch6: 3x3 / stride-2 conv via per-tap MXU accumulation.
            acc = b6_ref[...]
            for i in range(3):
                for j in range(3):
                    r = (y0 + i) * s + (x0 + j)
                    t = i * 3 + j
                    acc = acc + jnp.dot(
                        act_bf[r:r + 1, :],
                        w6_ref[t * c_mid:(t + 1) * c_mid, :],
                        preferred_element_type=jnp.float32)
            conv6 = jnp.maximum(acc, 0.0)
            idx = oy * oh + ox
            o_ref[0, idx:idx + 1, 0:c_mid] = pool.astype(o_ref.dtype)
            o_ref[0, idx:idx + 1, c_mid:c_mid + c6] = conv6.astype(o_ref.dtype)


# ------------------------------ wrappers ------------------------------------

def _fold_bn(w_oihw, gamma, beta, eps=_BN_EPS):
    """Fold eval-mode BatchNorm (running_mean=0, running_var=1) into the conv.

    Returns a (KH*KW*Cin, Cout) bf16 weight matrix with the BN scale folded in
    and a (1, Cout) f32 bias (so the kernel epilogue is only bias + ReLU).
    """
    # TODO(synk): training-mode batch statistics (a fresh nn.BatchNorm2d in
    # .train()) or pretrained running stats are not representable here; the
    # eval-mode default-stats form is used, so outputs diverge in those cases.
    cout, cin, kh, kw = w_oihw.shape
    scale = gamma / jnp.sqrt(1.0 + eps)
    w_mat = jnp.transpose(w_oihw, (2, 3, 1, 0)).reshape(kh * kw * cin, cout)
    w_mat = (w_mat * scale[None, :]).astype(jnp.bfloat16)
    bias = beta.reshape(1, cout).astype(jnp.float32)
    return w_mat, bias


def _im2col(x_nhwc, kh, kw, stride, oh, ow):
    """(M, KH*KW*Cin) tap slab, column order (kh, kw, cin)."""
    n, _, _, c = x_nhwc.shape
    m = n * oh * ow
    cols = [x_nhwc[:, i:i + stride * (oh - 1) + 1:stride,
                   j:j + stride * (ow - 1) + 1:stride, :].reshape(m, c)
            for i in range(kh) for j in range(kw)]
    return cols[0] if len(cols) == 1 else jnp.concatenate(cols, axis=-1)


def conv_bn_relu(x_nhwc, w_oihw, gamma, beta, *, stride=1, padding=0):
    """BasicConv2d: Conv2d(no bias) -> BatchNorm2d(eval, eps=1e-3) -> ReLU.

    bf16 activations out (every consumer re-casts to bf16 anyway); f32 MXU
    accumulation in-kernel.
    """
    # TODO(synk): at production sizes move the im2col gather in-kernel (tap
    # grid axis / manual DMA) to avoid the ~9x HBM read inflation; at this
    # toy size the slab is tiny and wrapper-side XLA gather is fine.
    n, h, w, cin = x_nhwc.shape
    cout, _, kh, kw = w_oihw.shape
    if padding:
        x_nhwc = jnp.pad(
            x_nhwc, ((0, 0), (padding, padding), (padding, padding), (0, 0)))
        h, w = h + 2 * padding, w + 2 * padding
    oh = (h - kh) // stride + 1
    ow = (w - kw) // stride + 1
    m = n * oh * ow
    k = kh * kw * cin

    slab = _im2col(x_nhwc, kh, kw, stride, oh, ow).astype(jnp.bfloat16)
    w_mat, bias = _fold_bn(w_oihw, gamma, beta)

    bm, m_pad = _tile_m(m)
    if m_pad != m:
        slab = jnp.pad(slab, ((0, m_pad - m), (0, 0)))

    out = pl.pallas_call(
        _conv_kernel,
        out_shape=jax.ShapeDtypeStruct((m_pad, cout), jnp.bfloat16),
        grid_spec=pltpu.PrefetchScalarGridSpec(
            num_scalar_prefetch=0,
            grid=(m_pad // bm,),
            in_specs=[
                pl.BlockSpec((bm, k), lambda i: (i, 0)),
                pl.BlockSpec((k, cout), lambda i: (0, 0)),
                pl.BlockSpec((1, cout), lambda i: (0, 0)),
            ],
            out_specs=pl.BlockSpec((bm, cout), lambda i: (i, 0)),
        ),
        compiler_params=pltpu.CompilerParams(
            dimension_semantics=("parallel",),
            vmem_limit_bytes=_VMEM_LIMIT_BYTES),
    )(slab, w_mat, bias)
    return out[:m].reshape(n, oh, ow, cout)


def stage4_pool_conv_1x1(x_nhwc, params):
    """branch1 maxpool(3,s2) + branch2 conv(3,s2) + fused branch3/4 1x1 conv."""
    n, h, w, c_in = x_nhwc.shape
    oh = (h - 3) // 2 + 1
    ow = (w - 3) // 2 + 1
    m = n * oh * ow

    slab = _im2col(x_nhwc, 3, 3, 2, oh, ow)            # (m, 9*c_in) bf16

    wb2, bb2 = _fold_bn(*params["branch2"])            # (9*c_in, 96)
    c_b2 = wb2.shape[1]

    # Fused branch3_0 + branch4_0 1x1 (same input, outputs concatenated).
    w3a, g3a, b3a = params["branch3_0"]
    w4a, g4a, b4a = params["branch4_0"]
    w1 = jnp.concatenate([w3a, w4a], axis=0)           # (128, 160, 1, 1)
    g1 = jnp.concatenate([g3a, g4a])
    b1 = jnp.concatenate([b3a, b4a])
    w1_mat, b1_bias = _fold_bn(w1, g1, b1)             # (160, 128)
    w1_pool = w1_mat[:c_in, :]                         # maxpool-input channels
    w1_conv = w1_mat[c_in:, :]                         # branch2-conv channels
    cout = w1_mat.shape[1]

    bm, m_pad = _tile_m(m)
    if m_pad != m:
        slab = jnp.pad(slab, ((0, m_pad - m), (0, 0)))
    k = slab.shape[1]

    out = pl.pallas_call(
        functools.partial(_stage4_kernel, c_in=c_in),
        out_shape=jax.ShapeDtypeStruct((m_pad, cout), jnp.bfloat16),
        grid_spec=pltpu.PrefetchScalarGridSpec(
            num_scalar_prefetch=0,
            grid=(m_pad // bm,),
            in_specs=[
                pl.BlockSpec((bm, k), lambda i: (i, 0)),
                pl.BlockSpec((k, c_b2), lambda i: (0, 0)),
                pl.BlockSpec((1, c_b2), lambda i: (0, 0)),
                pl.BlockSpec((c_in, cout), lambda i: (0, 0)),
                pl.BlockSpec((c_b2, cout), lambda i: (0, 0)),
                pl.BlockSpec((1, cout), lambda i: (0, 0)),
            ],
            out_specs=pl.BlockSpec((bm, cout), lambda i: (i, 0)),
        ),
        compiler_params=pltpu.CompilerParams(
            dimension_semantics=("parallel",),
            vmem_limit_bytes=_VMEM_LIMIT_BYTES),
    )(slab, wb2, bb2, w1_pool, w1_conv, b1_bias)
    return out[:m].reshape(n, oh, ow, cout)


def stage5_blockdiag3x3_pool_conv(x_nhwc, params):
    """Fused branch3_1/branch4_1 3x3 (block-diag) + branch5 pool + branch6 conv."""
    n, h, w, c_in = x_nhwc.shape
    s = h - 2                       # spatial of the 3x3 stride-1 valid conv
    rows = s * s

    cols = [x_nhwc[:, i:i + s, j:j + s, :].reshape(n, rows, c_in)
            for i in range(3) for j in range(3)]
    slab = jnp.concatenate(cols, axis=-1)              # (n, rows, 9*c_in) bf16
    rows_pad = _round_up(max(rows, 16), 16)
    if rows_pad != rows:
        slab = jnp.pad(slab, ((0, 0), (0, rows_pad - rows), (0, 0)))
    k = slab.shape[-1]

    # Block-diagonal 3x3: out[:96] <- in[:64] (branch3), out[96:] <- in[64:].
    w3b, g3b, b3b = params["branch3_1"]
    w4b, g4b, b4b = params["branch4_1"]
    z = jnp.zeros_like(w3b)
    w34 = jnp.concatenate([jnp.concatenate([w3b, z], axis=1),
                           jnp.concatenate([z, w4b], axis=1)], axis=0)
    g34 = jnp.concatenate([g3b, g4b])
    b34 = jnp.concatenate([b3b, b4b])
    w34_mat, b34_bias = _fold_bn(w34, g34, b34)        # (9*c_in, 192)
    c_mid = w34_mat.shape[1]

    w6_mat, b6_bias = _fold_bn(*params["branch6"])     # (9*c_mid, 192)
    c6 = w6_mat.shape[1]

    oh = (s - 3) // 2 + 1                              # == s // 2 for odd s
    rows_out = oh * oh

    out = pl.pallas_call(
        functools.partial(_stage5_kernel, s=s, oh=oh, c_mid=c_mid, c6=c6),
        out_shape=jax.ShapeDtypeStruct((n, rows_out, c_mid + c6), jnp.float32),
        grid_spec=pltpu.PrefetchScalarGridSpec(
            num_scalar_prefetch=0,
            grid=(n,),
            in_specs=[
                pl.BlockSpec((1, rows_pad, k), lambda b: (b, 0, 0)),
                pl.BlockSpec((k, c_mid), lambda b: (0, 0)),
                pl.BlockSpec((1, c_mid), lambda b: (0, 0)),
                pl.BlockSpec((9 * c_mid, c6), lambda b: (0, 0)),
                pl.BlockSpec((1, c6), lambda b: (0, 0)),
            ],
            out_specs=pl.BlockSpec((1, rows_out, c_mid + c6),
                                   lambda b: (b, 0, 0)),
        ),
        compiler_params=pltpu.CompilerParams(
            dimension_semantics=("parallel",),
            vmem_limit_bytes=_VMEM_LIMIT_BYTES),
    )(slab, w34_mat, b34_bias, w6_mat, b6_bias)
    return out.reshape(n, oh, oh, c_mid + c6)


# --------------------------- parameter creation ------------------------------

def make_params(key, in_channels):
    """Deterministic init matching the module __init__ shapes.

    conv weights ~ randn (Kn2row2d); BN gamma=1, beta=0 (nn.BatchNorm2d
    defaults). Kn2row2d's bias parameter is never applied in the reference
    forward, so it is omitted.
    """
    def bcr(k, cin, cout, ksz):
        w = jax.random.normal(k, (cout, cin, ksz, ksz), jnp.float32)
        return (w, jnp.ones((cout,), jnp.float32),
                jnp.zeros((cout,), jnp.float32))

    names_shapes = [
        ("conv1", (in_channels, 32, 3)),
        ("conv2", (32, 32, 3)),
        ("conv3", (32, 64, 3)),
        ("branch2", (64, 96, 3)),
        ("branch3_0", (160, 64, 1)),
        ("branch3_1", (64, 96, 3)),
        ("branch4_0", (160, 64, 1)),
        ("branch4_1", (64, 96, 3)),
        ("branch6", (192, 192, 3)),
    ]
    keys = jax.random.split(key, len(names_shapes))
    return {name: bcr(k, *shp) for k, (name, shp) in zip(keys, names_shapes)}


# ------------------------------ forward pass ---------------------------------

@jax.jit
def inception_stem(x_nchw, params):
    x = jnp.transpose(x_nchw, (0, 2, 3, 1)).astype(jnp.float32)   # NCHW->NHWC

    def bcr(name, x, **kw):
        w, g, b = params[name]
        return conv_bn_relu(x, w, g, b, **kw)

    x = bcr("conv1", x, stride=2)                     # 3x3 s2          -> 32
    x = bcr("conv2", x)                               # 3x3             -> 32
    x = bcr("conv3", x, padding=1)                    # 3x3 p1          -> 64
    x = stage4_pool_conv_1x1(x, params)               # pool|conv|1x1   -> 128
    out = stage5_blockdiag3x3_pool_conv(x, params)    # 3x3|pool|conv   -> 384
    return jnp.transpose(out, (0, 3, 1, 2))           # NHWC -> NCHW


# ---------------------------------- main -------------------------------------

if __name__ == "__main__":
    key = jax.random.PRNGKey(0)
    k_x, k_p = jax.random.split(key)

    # spatial=27 (analogue of 299 in the real stem) so the unpadded 3x3
    # branch3/4 convs leave an odd spatial size and the pool/conv branch
    # pairs stay concatenable.
    batch, in_channels, spatial = 2, 4, 27
    x = jax.random.normal(k_x, (batch, in_channels, spatial, spatial),
                          jnp.float32)
    params = make_params(k_p, in_channels)

    out = inception_stem(x, params)
    out = jax.block_until_ready(out)

    assert out.shape == (batch, 384, 1, 1), out.shape
    assert bool(jnp.all(jnp.isfinite(out)))
    print("KERNEL_OK")
</pallas_src>

<mosaic_0001>
module attributes {stable_mosaic.version = 11 : i64} {
  func.func @_conv_kernel(%arg0: i32, %arg1: memref<176x36xbf16, #tpu.memory_space<vmem>>, %arg2: memref<36x32xbf16, #tpu.memory_space<vmem>>, %arg3: memref<1x32xf32, #tpu.memory_space<vmem>>, %arg4: memref<176x32xbf16, #tpu.memory_space<vmem>>) attributes {dimension_semantics = [#tpu.dimension_semantics<parallel>], iteration_bounds = array<i64: 2>, scalar_prefetch = 0 : i64, scratch_operands = 0 : i64, tpu.core_type = #tpu.core_type<tc>, window_params = [{transform_indices = @transform_0, window_bounds = array<i64: 176, 36>}, {pipeline_mode = #tpu.pipeline_mode<synchronous>, transform_indices = @transform_1, window_bounds = array<i64: 36, 32>}, {pipeline_mode = #tpu.pipeline_mode<synchronous>, transform_indices = @transform_2, window_bounds = array<i64: 1, 32>}, {transform_indices = @transform_3, window_bounds = array<i64: 176, 32>}]} {
    %c0 = arith.constant 0 : index
    %c0_0 = arith.constant 0 : index
    %0 = vector.load %arg1[%c0, %c0_0] : memref<176x36xbf16, #tpu.memory_space<vmem>>, vector<176x36xbf16>
    %c0_1 = arith.constant 0 : index
    %c0_2 = arith.constant 0 : index
    %1 = vector.load %arg2[%c0_1, %c0_2] : memref<36x32xbf16, #tpu.memory_space<vmem>>, vector<36x32xbf16>
    %cst = arith.constant dense<0.000000e+00> : vector<176x32xf32>
    %2 = tpu.matmul %0, %1, %cst {dimension_numbers = #tpu.dot_dimension_numbers<[1], [0], [0], [1], [0, 0, 1, 1], [], []>} : vector<176x36xbf16>, vector<36x32xbf16>, vector<176x32xf32> -> vector<176x32xf32>
    %c0_3 = arith.constant 0 : index
    %c0_4 = arith.constant 0 : index
    %3 = vector.load %arg3[%c0_3, %c0_4] : memref<1x32xf32, #tpu.memory_space<vmem>>, vector<1x32xf32>
    %4 = vector.broadcast %3 : vector<1x32xf32> to vector<176x32xf32>
    %5 = arith.addf %2, %4 : vector<176x32xf32>
    %cst_5 = arith.constant 0.000000e+00 : f32
    %6 = vector.broadcast %cst_5 : f32 to vector<176x32xf32>
    %7 = arith.maximumf %5, %6 : vector<176x32xf32>
    %8 = arith.truncf %7 : vector<176x32xf32> to vector<176x32xbf16>
    %c0_6 = arith.constant 0 : index
    %c0_7 = arith.constant 0 : index
    %9 = vector.load %arg4[%c0_6, %c0_7] : memref<176x32xbf16, #tpu.memory_space<vmem>>, vector<176x32xbf16>
    tpu.vector_store %arg4[%c0_6, %c0_7], %8 {strides = array<i32>} : memref<176x32xbf16, #tpu.memory_space<vmem>>, vector<176x32xbf16>,
    return
  }
  func.func @transform_0(%arg0: i32) -> (i32, i32) {
    %c0_i32 = arith.constant 0 : i32
    %c0_i32_0 = arith.constant 0 : i32
    return %arg0, %c0_i32 : i32, i32
  }
  func.func @transform_1(%arg0: i32) -> (i32, i32) {
    %c0_i32 = arith.constant 0 : i32
    %c0_i32_0 = arith.constant 0 : i32
    %c0_i32_1 = arith.constant 0 : i32
    return %c0_i32, %c0_i32_0 : i32, i32
  }
  func.func @transform_2(%arg0: i32) -> (i32, i32) {
    %c0_i32 = arith.constant 0 : i32
    %c0_i32_0 = arith.constant 0 : i32
    %c0_i32_1 = arith.constant 0 : i32
    return %c0_i32, %c0_i32_0 : i32, i32
  }
  func.func @transform_3(%arg0: i32) -> (i32, i32) {
    %c0_i32 = arith.constant 0 : i32
    %c0_i32_0 = arith.constant 0 : i32
    return %arg0, %c0_i32 : i32, i32
  }
}

module attributes {stable_mosaic.version = 11 : i64} {
  func.func @_conv_kernel(%arg0: i32, %arg1: memref<128x288xbf16, #tpu.memory_space<vmem>>, %arg2: memref<288x32xbf16, #tpu.memory_space<vmem>>, %arg3: memref<1x32xf32, #tpu.memory_space<vmem>>, %arg4: memref<128x32xbf16, #tpu.memory_space<vmem>>) attributes {dimension_semantics = [#tpu.dimension_semantics<parallel>], iteration_bounds = array<i64: 2>, scalar_prefetch = 0 : i64, scratch_operands = 0 : i64, tpu.core_type = #tpu.core_type<tc>, window_params = [{transform_indices = @transform_0, window_bounds = array<i64: 128, 288>}, {pipeline_mode = #tpu.pipeline_mode<synchronous>, transform_indices = @transform_1, window_bounds = array<i64: 288, 32>}, {pipeline_mode = #tpu.pipeline_mode<synchronous>, transform_indices = @transform_2, window_bounds = array<i64: 1, 32>}, {transform_indices = @transform_3, window_bounds = array<i64: 128, 32>}]} {
    %c0 = arith.constant 0 : index
    %c0_0 = arith.constant 0 : index
    %0 = vector.load %arg1[%c0, %c0_0] : memref<128x288xbf16, #tpu.memory_space<vmem>>, vector<128x288xbf16>
    %c0_1 = arith.constant 0 : index
    %c0_2 = arith.constant 0 : index
    %1 = vector.load %arg2[%c0_1, %c0_2] : memref<288x32xbf16, #tpu.memory_space<vmem>>, vector<288x32xbf16>
    %cst = arith.constant dense<0.000000e+00> : vector<128x32xf32>
    %2 = tpu.matmul %0, %1, %cst {dimension_numbers = #tpu.dot_dimension_numbers<[1], [0], [0], [1], [0, 0, 1, 1], [], []>} : vector<128x288xbf16>, vector<288x32xbf16>, vector<128x32xf32> -> vector<128x32xf32>
    %c0_3 = arith.constant 0 : index
    %c0_4 = arith.constant 0 : index
    %3 = vector.load %arg3[%c0_3, %c0_4] : memref<1x32xf32, #tpu.memory_space<vmem>>, vector<1x32xf32>
    %4 = vector.broadcast %3 : vector<1x32xf32> to vector<128x32xf32>
    %5 = arith.addf %2, %4 : vector<128x32xf32>
    %cst_5 = arith.constant 0.000000e+00 : f32
    %6 = vector.broadcast %cst_5 : f32 to vector<128x32xf32>
    %7 = arith.maximumf %5, %6 : vector<128x32xf32>
    %8 = arith.truncf %7 : vector<128x32xf32> to vector<128x32xbf16>
    %c0_6 = arith.constant 0 : index
    %c0_7 = arith.constant 0 : index
    %9 = vector.load %arg4[%c0_6, %c0_7] : memref<128x32xbf16, #tpu.memory_space<vmem>>, vector<128x32xbf16>
    tpu.vector_store %arg4[%c0_6, %c0_7], %8 {strides = array<i32>} : memref<128x32xbf16, #tpu.memory_space<vmem>>, vector<128x32xbf16>,
    return
  }
  func.func @transform_0(%arg0: i32) -> (i32, i32) {
    %c0_i32 = arith.constant 0 : i32
    %c0_i32_0 = arith.constant 0 : i32
    return %arg0, %c0_i32 : i32, i32
  }
  func.func @transform_1(%arg0: i32) -> (i32, i32) {
    %c0_i32 = arith.constant 0 : i32
    %c0_i32_0 = arith.constant 0 : i32
    %c0_i32_1 = arith.constant 0 : i32
    return %c0_i32, %c0_i32_0 : i32, i32
  }
  func.func @transform_2(%arg0: i32) -> (i32, i32) {
    %c0_i32 = arith.constant 0 : i32
    %c0_i32_0 = arith.constant 0 : i32
    %c0_i32_1 = arith.constant 0 : i32
    return %c0_i32, %c0_i32_0 : i32, i32
  }
  func.func @transform_3(%arg0: i32) -> (i32, i32) {
    %c0_i32 = arith.constant 0 : i32
    %c0_i32_0 = arith.constant 0 : i32
    return %arg0, %c0_i32 : i32, i32
  }
}

module attributes {stable_mosaic.version = 11 : i64} {
  func.func @_conv_kernel(%arg0: i32, %arg1: memref<128x288xbf16, #tpu.memory_space<vmem>>, %arg2: memref<288x64xbf16, #tpu.memory_space<vmem>>, %arg3: memref<1x64xf32, #tpu.memory_space<vmem>>, %arg4: memref<128x64xbf16, #tpu.memory_space<vmem>>) attributes {dimension_semantics = [#tpu.dimension_semantics<parallel>], iteration_bounds = array<i64: 2>, scalar_prefetch = 0 : i64, scratch_operands = 0 : i64, tpu.core_type = #tpu.core_type<tc>, window_params = [{transform_indices = @transform_0, window_bounds = array<i64: 128, 288>}, {pipeline_mode = #tpu.pipeline_mode<synchronous>, transform_indices = @transform_1, window_bounds = array<i64: 288, 64>}, {pipeline_mode = #tpu.pipeline_mode<synchronous>, transform_indices = @transform_2, window_bounds = array<i64: 1, 64>}, {transform_indices = @transform_3, window_bounds = array<i64: 128, 64>}]} {
    %c0 = arith.constant 0 : index
    %c0_0 = arith.constant 0 : index
    %0 = vector.load %arg1[%c0, %c0_0] : memref<128x288xbf16, #tpu.memory_space<vmem>>, vector<128x288xbf16>
    %c0_1 = arith.constant 0 : index
    %c0_2 = arith.constant 0 : index
    %1 = vector.load %arg2[%c0_1, %c0_2] : memref<288x64xbf16, #tpu.memory_space<vmem>>, vector<288x64xbf16>
    %cst = arith.constant dense<0.000000e+00> : vector<128x64xf32>
    %2 = tpu.matmul %0, %1, %cst {dimension_numbers = #tpu.dot_dimension_numbers<[1], [0], [0], [1], [0, 0, 1, 1], [], []>} : vector<128x288xbf16>, vector<288x64xbf16>, vector<128x64xf32> -> vector<128x64xf32>
    %c0_3 = arith.constant 0 : index
    %c0_4 = arith.constant 0 : index
    %3 = vector.load %arg3[%c0_3, %c0_4] : memref<1x64xf32, #tpu.memory_space<vmem>>, vector<1x64xf32>
    %4 = vector.broadcast %3 : vector<1x64xf32> to vector<128x64xf32>
    %5 = arith.addf %2, %4 : vector<128x64xf32>
    %cst_5 = arith.constant 0.000000e+00 : f32
    %6 = vector.broadcast %cst_5 : f32 to vector<128x64xf32>
    %7 = arith.maximumf %5, %6 : vector<128x64xf32>
    %8 = arith.truncf %7 : vector<128x64xf32> to vector<128x64xbf16>
    %c0_6 = arith.constant 0 : index
    %c0_7 = arith.constant 0 : index
    %9 = vector.load %arg4[%c0_6, %c0_7] : memref<128x64xbf16, #tpu.memory_space<vmem>>, vector<128x64xbf16>
    tpu.vector_store %arg4[%c0_6, %c0_7], %8 {strides = array<i32>} : memref<128x64xbf16, #tpu.memory_space<vmem>>, vector<128x64xbf16>,
    return
  }
  func.func @transform_0(%arg0: i32) -> (i32, i32) {
    %c0_i32 = arith.constant 0 : i32
    %c0_i32_0 = arith.constant 0 : i32
    return %arg0, %c0_i32 : i32, i32
  }
  func.func @transform_1(%arg0: i32) -> (i32, i32) {
    %c0_i32 = arith.constant 0 : i32
    %c0_i32_0 = arith.constant 0 : i32
    %c0_i32_1 = arith.constant 0 : i32
    return %c0_i32, %c0_i32_0 : i32, i32
  }
  func.func @transform_2(%arg0: i32) -> (i32, i32) {
    %c0_i32 = arith.constant 0 : i32
    %c0_i32_0 = arith.constant 0 : i32
    %c0_i32_1 = arith.constant 0 : i32
    return %c0_i32, %c0_i32_0 : i32, i32
  }
  func.func @transform_3(%arg0: i32) -> (i32, i32) {
    %c0_i32 = arith.constant 0 : i32
    %c0_i32_0 = arith.constant 0 : i32
    return %arg0, %c0_i32 : i32, i32
  }
}

module attributes {stable_mosaic.version = 11 : i64} {
  func.func @_stage4_kernel(%arg0: i32, %arg1: memref<32x576xbf16, #tpu.memory_space<vmem>>, %arg2: memref<576x96xbf16, #tpu.memory_space<vmem>>, %arg3: memref<1x96xf32, #tpu.memory_space<vmem>>, %arg4: memref<64x128xbf16, #tpu.memory_space<vmem>>, %arg5: memref<96x128xbf16, #tpu.memory_space<vmem>>, %arg6: memref<1x128xf32, #tpu.memory_space<vmem>>, %arg7: memref<32x128xbf16, #tpu.memory_space<vmem>>) attributes {dimension_semantics = [#tpu.dimension_semantics<parallel>], iteration_bounds = array<i64: 2>, scalar_prefetch = 0 : i64, scratch_operands = 0 : i64, tpu.core_type = #tpu.core_type<tc>, window_params = [{transform_indices = @transform_0, window_bounds = array<i64: 32, 576>}, {pipeline_mode = #tpu.pipeline_mode<synchronous>, transform_indices = @transform_1, window_bounds = array<i64: 576, 96>}, {pipeline_mode = #tpu.pipeline_mode<synchronous>, transform_indices = @transform_2, window_bounds = array<i64: 1, 96>}, {pipeline_mode = #tpu.pipeline_mode<synchronous>, transform_indices = @transform_3, window_bounds = array<i64: 64, 128>}, {pipeline_mode = #tpu.pipeline_mode<synchronous>, transform_indices = @transform_4, window_bounds = array<i64: 96, 128>}, {pipeline_mode = #tpu.pipeline_mode<synchronous>, transform_indices = @transform_5, window_bounds = array<i64: 1, 128>}, {transform_indices = @transform_6, window_bounds = array<i64: 32, 128>}]} {
    %c0 = arith.constant 0 : index
    %c0_0 = arith.constant 0 : index
    %0 = vector.load %arg1[%c0, %c0_0] : memref<32x576xbf16, #tpu.memory_space<vmem>>, vector<32x576xbf16>
    %c0_1 = arith.constant 0 : index
    %c0_2 = arith.constant 0 : index
    %1 = vector.load %arg2[%c0_1, %c0_2] : memref<576x96xbf16, #tpu.memory_space<vmem>>, vector<576x96xbf16>
    %cst = arith.constant dense<0.000000e+00> : vector<32x96xf32>
    %2 = tpu.matmul %0, %1, %cst {dimension_numbers = #tpu.dot_dimension_numbers<[1], [0], [0], [1], [0, 0, 1, 1], [], []>} : vector<32x576xbf16>, vector<576x96xbf16>, vector<32x96xf32> -> vector<32x96xf32>
    %c0_3 = arith.constant 0 : index
    %c0_4 = arith.constant 0 : index
    %3 = vector.load %arg3[%c0_3, %c0_4] : memref<1x96xf32, #tpu.memory_space<vmem>>, vector<1x96xf32>
    %4 = vector.broadcast %3 : vector<1x96xf32> to vector<32x96xf32>
    %5 = arith.addf %2, %4 : vector<32x96xf32>
    %cst_5 = arith.constant 0.000000e+00 : f32
    %6 = vector.broadcast %cst_5 : f32 to vector<32x96xf32>
    %7 = arith.maximumf %5, %6 : vector<32x96xf32>
    %8 = vector.extract_strided_slice %0 {offsets = [0, 0], sizes = [32, 64], strides = [1, 1]} : vector<32x576xbf16> to vector<32x64xbf16>
    %9 = vector.extract_strided_slice %0 {offsets = [0, 64], sizes = [32, 64], strides = [1, 1]} : vector<32x576xbf16> to vector<32x64xbf16>
    %10 = arith.maximumf %8, %9 : vector<32x64xbf16>
    %11 = vector.extract_strided_slice %0 {offsets = [0, 128], sizes = [32, 64], strides = [1, 1]} : vector<32x576xbf16> to vector<32x64xbf16>
    %12 = arith.maximumf %10, %11 : vector<32x64xbf16>
    %13 = vector.extract_strided_slice %0 {offsets = [0, 192], sizes = [32, 64], strides = [1, 1]} : vector<32x576xbf16> to vector<32x64xbf16>
    %14 = arith.maximumf %12, %13 : vector<32x64xbf16>
    %15 = vector.extract_strided_slice %0 {offsets = [0, 256], sizes = [32, 64], strides = [1, 1]} : vector<32x576xbf16> to vector<32x64xbf16>
    %16 = arith.maximumf %14, %15 : vector<32x64xbf16>
    %17 = vector.extract_strided_slice %0 {offsets = [0, 320], sizes = [32, 64], strides = [1, 1]} : vector<32x576xbf16> to vector<32x64xbf16>
    %18 = arith.maximumf %16, %17 : vector<32x64xbf16>
    %19 = vector.extract_strided_slice %0 {offsets = [0, 384], sizes = [32, 64], strides = [1, 1]} : vector<32x576xbf16> to vector<32x64xbf16>
    %20 = arith.maximumf %18, %19 : vector<32x64xbf16>
    %21 = vector.extract_strided_slice %0 {offsets = [0, 448], sizes = [32, 64], strides = [1, 1]} : vector<32x576xbf16> to vector<32x64xbf16>
    %22 = arith.maximumf %20, %21 : vector<32x64xbf16>
    %23 = vector.extract_strided_slice %0 {offsets = [0, 512], sizes = [32, 64], strides = [1, 1]} : vector<32x576xbf16> to vector<32x64xbf16>
    %24 = arith.maximumf %22, %23 : vector<32x64xbf16>
    %c0_6 = arith.constant 0 : index
    %c0_7 = arith.constant 0 : index
    %25 = vector.load %arg4[%c0_6, %c0_7] : memref<64x128xbf16, #tpu.memory_space<vmem>>, vector<64x128xbf16>
    %cst_8 = arith.constant dense<0.000000e+00> : vector<32x128xf32>
    %26 = tpu.matmul %24, %25, %cst_8 {dimension_numbers = #tpu.dot_dimension_numbers<[1], [0], [0], [1], [0, 0, 1, 1], [], []>} : vector<32x64xbf16>, vector<64x128xbf16>, vector<32x128xf32> -> vector<32x128xf32>
    %27 = arith.truncf %7 : vector<32x96xf32> to vector<32x96xbf16>
    %c0_9 = arith.constant 0 : index
    %c0_10 = arith.constant 0 : index
    %28 = vector.load %arg5[%c0_9, %c0_10] : memref<96x128xbf16, #tpu.memory_space<vmem>>, vector<96x128xbf16>
    %cst_11 = arith.constant dense<0.000000e+00> : vector<32x128xf32>
    %29 = tpu.matmul %27, %28, %cst_11 {dimension_numbers = #tpu.dot_dimension_numbers<[1], [0], [0], [1], [0, 0, 1, 1], [], []>} : vector<32x96xbf16>, vector<96x128xbf16>, vector<32x128xf32> -> vector<32x128xf32>
    %30 = arith.addf %26, %29 : vector<32x128xf32>
    %c0_12 = arith.constant 0 : index
    %c0_13 = arith.constant 0 : index
    %31 = vector.load %arg6[%c0_12, %c0_13] : memref<1x128xf32, #tpu.memory_space<vmem>>, vector<1x128xf32>
    %32 = vector.broadcast %31 : vector<1x128xf32> to vector<32x128xf32>
    %33 = arith.addf %30, %32 : vector<32x128xf32>
    %cst_14 = arith.constant 0.000000e+00 : f32
    %34 = vector.broadcast %cst_14 : f32 to vector<32x128xf32>
    %35 = arith.maximumf %33, %34 : vector<32x128xf32>
    %36 = arith.truncf %35 : vector<32x128xf32> to vector<32x128xbf16>
    %c0_15 = arith.constant 0 : index
    %c0_16 = arith.constant 0 : index
    %37 = vector.load %arg7[%c0_15, %c0_16] : memref<32x128xbf16, #tpu.memory_space<vmem>>, vector<32x128xbf16>
    tpu.vector_store %arg7[%c0_15, %c0_16], %36 {strides = array<i32>} : memref<32x128xbf16, #tpu.memory_space<vmem>>, vector<32x128xbf16>,
    return
  }
  func.func @transform_0(%arg0: i32) -> (i32, i32) {
    %c0_i32 = arith.constant 0 : i32
    %c0_i32_0 = arith.constant 0 : i32
    return %arg0, %c0_i32 : i32, i32
  }
  func.func @transform_1(%arg0: i32) -> (i32, i32) {
    %c0_i32 = arith.constant 0 : i32
    %c0_i32_0 = arith.constant 0 : i32
    %c0_i32_1 = arith.constant 0 : i32
    return %c0_i32, %c0_i32_0 : i32, i32
  }
  func.func @transform_2(%arg0: i32) -> (i32, i32) {
    %c0_i32 = arith.constant 0 : i32
    %c0_i32_0 = arith.constant 0 : i32
    %c0_i32_1 = arith.constant 0 : i32
    return %c0_i32, %c0_i32_0 : i32, i32
  }
  func.func @transform_3(%arg0: i32) -> (i32, i32) {
    %c0_i32 = arith.constant 0 : i32
    %c0_i32_0 = arith.constant 0 : i32
    %c0_i32_1 = arith.constant 0 : i32
    return %c0_i32, %c0_i32_0 : i32, i32
  }
  func.func @transform_4(%arg0: i32) -> (i32, i32) {
    %c0_i32 = arith.constant 0 : i32
    %c0_i32_0 = arith.constant 0 : i32
    %c0_i32_1 = arith.constant 0 : i32
    return %c0_i32, %c0_i32_0 : i32, i32
  }
  func.func @transform_5(%arg0: i32) -> (i32, i32) {
    %c0_i32 = arith.constant 0 : i32
    %c0_i32_0 = arith.constant 0 : i32
    %c0_i32_1 = arith.constant 0 : i32
    return %c0_i32, %c0_i32_0 : i32, i32
  }
  func.func @transform_6(%arg0: i32) -> (i32, i32) {
    %c0_i32 = arith.constant 0 : i32
    %c0_i32_0 = arith.constant 0 : i32
    return %arg0, %c0_i32 : i32, i32
  }
}

module attributes {stable_mosaic.version = 11 : i64} {
  func.func @_stage5_kernel(%arg0: i32, %arg1: memref<1x16x1152xbf16, #tpu.memory_space<vmem>>, %arg2: memref<1152x192xbf16, #tpu.memory_space<vmem>>, %arg3: memref<1x192xf32, #tpu.memory_space<vmem>>, %arg4: memref<1728x192xbf16, #tpu.memory_space<vmem>>, %arg5: memref<1x192xf32, #tpu.memory_space<vmem>>, %arg6: memref<1x1x384xf32, #tpu.memory_space<vmem>>) attributes {dimension_semantics = [#tpu.dimension_semantics<parallel>], iteration_bounds = array<i64: 2>, scalar_prefetch = 0 : i64, scratch_operands = 0 : i64, tpu.core_type = #tpu.core_type<tc>, window_params = [{transform_indices = @transform_0, window_bounds = array<i64: 1, 16, 1152>}, {pipeline_mode = #tpu.pipeline_mode<synchronous>, transform_indices = @transform_1, window_bounds = array<i64: 1152, 192>}, {pipeline_mode = #tpu.pipeline_mode<synchronous>, transform_indices = @transform_2, window_bounds = array<i64: 1, 192>}, {pipeline_mode = #tpu.pipeline_mode<synchronous>, transform_indices = @transform_3, window_bounds = array<i64: 1728, 192>}, {pipeline_mode = #tpu.pipeline_mode<synchronous>, transform_indices = @transform_4, window_bounds = array<i64: 1, 192>}, {transform_indices = @transform_5, window_bounds = array<i64: 1, 1, 384>}]} {
    %c0 = arith.constant 0 : index
    %c0_0 = arith.constant 0 : index
    %c0_1 = arith.constant 0 : index
    %0 = vector.load %arg1[%c0, %c0_0, %c0_1] : memref<1x16x1152xbf16, #tpu.memory_space<vmem>>, vector<1x16x1152xbf16>
    %1 = vector.shape_cast %0 : vector<1x16x1152xbf16> to vector<16x1152xbf16>
    %c0_2 = arith.constant 0 : index
    %c0_3 = arith.constant 0 : index
    %2 = vector.load %arg2[%c0_2, %c0_3] : memref<1152x192xbf16, #tpu.memory_space<vmem>>, vector<1152x192xbf16>
    %cst = arith.constant dense<0.000000e+00> : vector<16x192xf32>
    %3 = tpu.matmul %1, %2, %cst {dimension_numbers = #tpu.dot_dimension_numbers<[1], [0], [0], [1], [0, 0, 1, 1], [], []>} : vector<16x1152xbf16>, vector<1152x192xbf16>, vector<16x192xf32> -> vector<16x192xf32>
    %c0_4 = arith.constant 0 : index
    %c0_5 = arith.constant 0 : index
    %4 = vector.load %arg3[%c0_4, %c0_5] : memref<1x192xf32, #tpu.memory_space<vmem>>, vector<1x192xf32>
    %5 = vector.broadcast %4 : vector<1x192xf32> to vector<16x192xf32>
    %6 = arith.addf %3, %5 : vector<16x192xf32>
    %cst_6 = arith.constant 0.000000e+00 : f32
    %7 = vector.broadcast %cst_6 : f32 to vector<16x192xf32>
    %8 = arith.maximumf %6, %7 : vector<16x192xf32>
    %9 = arith.truncf %8 : vector<16x192xf32> to vector<16x192xbf16>
    %10 = vector.extract_strided_slice %8 {offsets = [0, 0], sizes = [1, 192], strides = [1, 1]} : vector<16x192xf32> to vector<1x192xf32>
    %11 = vector.extract_strided_slice %8 {offsets = [1, 0], sizes = [1, 192], strides = [1, 1]} : vector<16x192xf32> to vector<1x192xf32>
    %12 = arith.maximumf %10, %11 : vector<1x192xf32>
    %13 = vector.extract_strided_slice %8 {offsets = [3, 0], sizes = [1, 192], strides = [1, 1]} : vector<16x192xf32> to vector<1x192xf32>
    %14 = vector.extract_strided_slice %8 {offsets = [4, 0], sizes = [1, 192], strides = [1, 1]} : vector<16x192xf32> to vector<1x192xf32>
    %15 = arith.maximumf %13, %14 : vector<1x192xf32>
    %16 = arith.maximumf %12, %15 : vector<1x192xf32>
    %c0_7 = arith.constant 0 : index
    %c0_8 = arith.constant 0 : index
    %17 = vector.load %arg5[%c0_7, %c0_8] : memref<1x192xf32, #tpu.memory_space<vmem>>, vector<1x192xf32>
    %18 = vector.extract_strided_slice %9 {offsets = [0, 0], sizes = [1, 192], strides = [1, 1]} : vector<16x192xbf16> to vector<1x192xbf16>
    %c0_9 = arith.constant 0 : index
    %c0_10 = arith.constant 0 : index
    %19 = vector.load %arg4[%c0_9, %c0_10] : memref<1728x192xbf16, #tpu.memory_space<vmem>>, vector<192x192xbf16>
    %cst_11 = arith.constant dense<0.000000e+00> : vector<1x192xf32>
    %20 = tpu.matmul %18, %19, %cst_11 {dimension_numbers = #tpu.dot_dimension_numbers<[1], [0], [0], [1], [0, 0, 1, 1], [], []>} : vector<1x192xbf16>, vector<192x192xbf16>, vector<1x192xf32> -> vector<1x192xf32>
    %21 = arith.addf %17, %20 : vector<1x192xf32>
    %22 = vector.extract_strided_slice %9 {offsets = [1, 0], sizes = [1, 192], strides = [1, 1]} : vector<16x192xbf16> to vector<1x192xbf16>
    %c192 = arith.constant 192 : index
    %c0_12 = arith.constant 0 : index
    %23 = vector.load %arg4[%c192, %c0_12] : memref<1728x192xbf16, #tpu.memory_space<vmem>>, vector<192x192xbf16>
    %cst_13 = arith.constant dense<0.000000e+00> : vector<1x192xf32>
    %24 = tpu.matmul %22, %23, %cst_13 {dimension_numbers = #tpu.dot_dimension_numbers<[1], [0], [0], [1], [0, 0, 1, 1], [], []>} : vector<1x192xbf16>, vector<192x192xbf16>, vector<1x192xf32> -> vector<1x192xf32>
    %25 = arith.addf %21, %24 : vector<1x192xf32>
    %26 = vector.extract_strided_slice %9 {offsets = [2, 0], sizes = [1, 192], strides = [1, 1]} : vector<16x192xbf16> to vector<1x192xbf16>
    %c384 = arith.constant 384 : index
    %c0_14 = arith.constant 0 : index
    %27 = vector.load %arg4[%c384, %c0_14] : memref<1728x192xbf16, #tpu.memory_space<vmem>>, vector<192x192xbf16>
    %cst_15 = arith.constant dense<0.000000e+00> : vector<1x192xf32>
    %28 = tpu.matmul %26, %27, %cst_15 {dimension_numbers = #tpu.dot_dimension_numbers<[1], [0], [0], [1], [0, 0, 1, 1], [], []>} : vector<1x192xbf16>, vector<192x192xbf16>, vector<1x192xf32> -> vector<1x192xf32>
    %29 = arith.addf %25, %28 : vector<1x192xf32>
    %30 = vector.extract_strided_slice %9 {offsets = [3, 0], sizes = [1, 192], strides = [1, 1]} : vector<16x192xbf16> to vector<1x192xbf16>
    %c576 = arith.constant 576 : index
    %c0_16 = arith.constant 0 : index
    %31 = vector.load %arg4[%c576, %c0_16] : memref<1728x192xbf16, #tpu.memory_space<vmem>>, vector<192x192xbf16>
    %cst_17 = arith.constant dense<0.000000e+00> : vector<1x192xf32>
    %32 = tpu.matmul %30, %31, %cst_17 {dimension_numbers = #tpu.dot_dimension_numbers<[1], [0], [0], [1], [0, 0, 1, 1], [], []>} : vector<1x192xbf16>, vector<192x192xbf16>, vector<1x192xf32> -> vector<1x192xf32>
    %33 = arith.addf %29, %32 : vector<1x192xf32>
    %34 = vector.extract_strided_slice %9 {offsets = [4, 0], sizes = [1, 192], strides = [1, 1]} : vector<16x192xbf16> to vector<1x192xbf16>
    %c768 = arith.constant 768 : index
    %c0_18 = arith.constant 0 : index
    %35 = vector.load %arg4[%c768, %c0_18] : memref<1728x192xbf16, #tpu.memory_space<vmem>>, vector<192x192xbf16>
    %cst_19 = arith.constant dense<0.000000e+00> : vector<1x192xf32>
    %36 = tpu.matmul %34, %35, %cst_19 {dimension_numbers = #tpu.dot_dimension_numbers<[1], [0], [0], [1], [0, 0, 1, 1], [], []>} : vector<1x192xbf16>, vector<192x192xbf16>, vector<1x192xf32> -> vector<1x192xf32>
    %37 = arith.addf %33, %36 : vector<1x192xf32>
    %38 = vector.extract_strided_slice %9 {offsets = [5, 0], sizes = [1, 192], strides = [1, 1]} : vector<16x192xbf16> to vector<1x192xbf16>
    %c960 = arith.constant 960 : index
    %c0_20 = arith.constant 0 : index
    %39 = vector.load %arg4[%c960, %c0_20] : memref<1728x192xbf16, #tpu.memory_space<vmem>>, vector<192x192xbf16>
    %cst_21 = arith.constant dense<0.000000e+00> : vector<1x192xf32>
    %40 = tpu.matmul %38, %39, %cst_21 {dimension_numbers = #tpu.dot_dimension_numbers<[1], [0], [0], [1], [0, 0, 1, 1], [], []>} : vector<1x192xbf16>, vector<192x192xbf16>, vector<1x192xf32> -> vector<1x192xf32>
    %41 = arith.addf %37, %40 : vector<1x192xf32>
    %42 = vector.extract_strided_slice %9 {offsets = [6, 0], sizes = [1, 192], strides = [1, 1]} : vector<16x192xbf16> to vector<1x192xbf16>
    %c1152 = arith.constant 1152 : index
    %c0_22 = arith.constant 0 : index
    %43 = vector.load %arg4[%c1152, %c0_22] : memref<1728x192xbf16, #tpu.memory_space<vmem>>, vector<192x192xbf16>
    %cst_23 = arith.constant dense<0.000000e+00> : vector<1x192xf32>
    %44 = tpu.matmul %42, %43, %cst_23 {dimension_numbers = #tpu.dot_dimension_numbers<[1], [0], [0], [1], [0, 0, 1, 1], [], []>} : vector<1x192xbf16>, vector<192x192xbf16>, vector<1x192xf32> -> vector<1x192xf32>
    %45 = arith.addf %41, %44 : vector<1x192xf32>
    %46 = vector.extract_strided_slice %9 {offsets = [7, 0], sizes = [1, 192], strides = [1, 1]} : vector<16x192xbf16> to vector<1x192xbf16>
    %c1344 = arith.constant 1344 : index
    %c0_24 = arith.constant 0 : index
    %47 = vector.load %arg4[%c1344, %c0_24] : memref<1728x192xbf16, #tpu.memory_space<vmem>>, vector<192x192xbf16>
    %cst_25 = arith.constant dense<0.000000e+00> : vector<1x192xf32>
    %48 = tpu.matmul %46, %47, %cst_25 {dimension_numbers = #tpu.dot_dimension_numbers<[1], [0], [0], [1], [0, 0, 1, 1], [], []>} : vector<1x192xbf16>, vector<192x192xbf16>, vector<1x192xf32> -> vector<1x192xf32>
    %49 = arith.addf %45, %48 : vector<1x192xf32>
    %50 = vector.extract_strided_slice %9 {offsets = [8, 0], sizes = [1, 192], strides = [1, 1]} : vector<16x192xbf16> to vector<1x192xbf16>
    %c1536 = arith.constant 1536 : index
    %c0_26 = arith.constant 0 : index
    %51 = vector.load %arg4[%c1536, %c0_26] : memref<1728x192xbf16, #tpu.memory_space<vmem>>, vector<192x192xbf16>
    %cst_27 = arith.constant dense<0.000000e+00> : vector<1x192xf32>
    %52 = tpu.matmul %50, %51, %cst_27 {dimension_numbers = #tpu.dot_dimension_numbers<[1], [0], [0], [1], [0, 0, 1, 1], [], []>} : vector<1x192xbf16>, vector<192x192xbf16>, vector<1x192xf32> -> vector<1x192xf32>
    %53 = arith.addf %49, %52 : vector<1x192xf32>
    %cst_28 = arith.constant 0.000000e+00 : f32
    %54 = vector.broadcast %cst_28 : f32 to vector<1x192xf32>
    %55 = arith.maximumf %53, %54 : vector<1x192xf32>
    %c0_29 = arith.constant 0 : index
    %c0_30 = arith.constant 0 : index
    %c0_31 = arith.constant 0 : index
    %56 = vector.load %arg6[%c0_29, %c0_30, %c0_31] : memref<1x1x384xf32, #tpu.memory_space<vmem>>, vector<1x1x192xf32>
    %57 = vector.shape_cast %56 : vector<1x1x192xf32> to vector<1x192xf32>
    %58 = vector.shape_cast %16 : vector<1x192xf32> to vector<1x1x192xf32>
    tpu.vector_store %arg6[%c0_29, %c0_30, %c0_31], %58 {strides = array<i32>} : memref<1x1x384xf32, #tpu.memory_space<vmem>>, vector<1x1x192xf32>,
    %c0_32 = arith.constant 0 : index
    %c0_33 = arith.constant 0 : index
    %c192_34 = arith.constant 192 : index
    %59 = vector.load %arg6[%c0_32, %c0_33, %c192_34] : memref<1x1x384xf32, #tpu.memory_space<vmem>>, vector<1x1x192xf32>
    %60 = vector.shape_cast %59 : vector<1x1x192xf32> to vector<1x192xf32>
    %61 = vector.shape_cast %55 : vector<1x192xf32> to vector<1x1x192xf32>
    tpu.vector_store %arg6[%c0_32, %c0_33, %c192_34], %61 {strides = array<i32>} : memref<1x1x384xf32, #tpu.memory_space<vmem>>, vector<1x1x192xf32>,
    return
  }
  func.func @transform_0(%arg0: i32) -> (i32, i32, i32) {
    %c0_i32 = arith.constant 0 : i32
    %c0_i32_0 = arith.constant 0 : i32
    %c0_i32_1 = arith.constant 0 : i32
    return %arg0, %c0_i32, %c0_i32_0 : i32, i32, i32
  }
  func.func @transform_1(%arg0: i32) -> (i32, i32) {
    %c0_i32 = arith.constant 0 : i32
    %c0_i32_0 = arith.constant 0 : i32
    %c0_i32_1 = arith.constant 0 : i32
    return %c0_i32, %c0_i32_0 : i32, i32
  }
  func.func @transform_2(%arg0: i32) -> (i32, i32) {
    %c0_i32 = arith.constant 0 : i32
    %c0_i32_0 = arith.constant 0 : i32
    %c0_i32_1 = arith.constant 0 : i32
    return %c0_i32, %c0_i32_0 : i32, i32
  }
  func.func @transform_3(%arg0: i32) -> (i32, i32) {
    %c0_i32 = arith.constant 0 : i32
    %c0_i32_0 = arith.constant 0 : i32
    %c0_i32_1 = arith.constant 0 : i32
    return %c0_i32, %c0_i32_0 : i32, i32
  }
  func.func @transform_4(%arg0: i32) -> (i32, i32) {
    %c0_i32 = arith.constant 0 : i32
    %c0_i32_0 = arith.constant 0 : i32
    %c0_i32_1 = arith.constant 0 : i32
    return %c0_i32, %c0_i32_0 : i32, i32
  }
  func.func @transform_5(%arg0: i32) -> (i32, i32, i32) {
    %c0_i32 = arith.constant 0 : i32
    %c0_i32_0 = arith.constant 0 : i32
    %c0_i32_1 = arith.constant 0 : i32
    return %arg0, %c0_i32, %c0_i32_0 : i32, i32, i32
  }
}

</mosaic_0001>

<bundles_post_ra>
// kernel: inception_stem.5
= control target key start
LH: loop header
LB: loop body
LE: loop exit
PB: predicated region body
PF: predicated region fallthrough
CT: control target
= control target key end

     0   :  { %s632_s12 = smov 0   ;;  %s749_s0 = inlined_call_operand.vmem [shape: bf16[352,36], index: 0, kind: input, shape index: {}]   ;;  %s750_s1 = inlined_call_operand.vmem [shape: bf16[36,32], index: 1, kind: input, shape index: {}]   ;;  %s751_s2 = inlined_call_operand.vmem [shape: f32[1,32], index: 2, kind: input, shape index: {}]   ;;  %s752_s3 = inlined_call_operand.vmem [shape: bf16[352,32], index: 3, kind: output, shape index: {}]  }
   0x1 LB: > { %s501_s13 = sadd.s32 4294967295, %s610_s12   ;;  %p505_p0 = scmp.ge.s32.totalorder %s610_s12, 1  ;;  %s610_s12 = sphi %s632_s12, %s13_s12  }
   0x2   : > { %p138_p1 = scmp.lt.s32.totalorder %s610_s12, 3 }
   0x4   : > { %p139_p2 = pnand %p505_p0, %p138_p1 }
   0x5   : > { %s162_s16 = smul.u32 (!%p139_p2), 22, %s501_s13 }
   0x6   : > { %142 = sbr.rel (%p139_p2) target bundleno = 208 (0xd0), region = 32 }
   0x7   : > { %p163_p3 = scmp.lt.s32.totalorder (!%p139_p2), %s162_s16, 43 }
   0xb   : > { %v201_v0 = vld [vmem:[%s750_s1 + $0x10] sm:$0x3]  ;;  %vm310_vm0 = vcmask 1041408   ;;  %s754_s16 = smov (!%p163_p3, %s162_s16), 43  ;;  %v585_v4 = vld [vmem:[%s750_s1 + $0x8] sm:$0xff]  ;;  %v584_v5 = vld [vmem:[%s750_s1] sm:$0xff] }
   0xc   : > { %v270_v1 = vunpack.c.l.b16 %v201_v0  ;;  %s506_s19 = sshll.u32 %s754_s16, 2  ;;  %vm276_vm1 = vcmask 293888   ;;  %v671_v17 = vld [vmem:[%s751_s2] ss:$0 sm:$0xff]  ;;  %vm422_vm2 = vcmask 257024  }
   0xd   : > { %s166_s24 = scalar_lea.vmem %s749_s0, %s506_s19  ;;  %s680_s29 = scalar_lea.vmem %s752_s3, %s506_s19 }
   0xe   : > { %v273_v2 = vpack.c.b16 %v270_v1, %v270_v1  ;;  %v573_v6 = vld [vmem:[%s166_s24] sm:$0xff]  ;;  %v576_v7 = vld [vmem:[%s166_s24 + $0x18] sm:$0xff]  ;;  %v579_v8 = vld [vmem:[%s166_s24 + $0x30] sm:$0xff] }
   0xf   : > { %v582_v9 = vld [vmem:[%s166_s24 + $0x48] sm:$0xff]  ;;  %v577_v11 = vld [vmem:[%s166_s24 + $0x20] sm:$0xff]  ;;  %v580_v12 = vld [vmem:[%s166_s24 + $0x38] sm:$0xff] }
  0x10   : > { %v312_v3 = vsel %vm310_vm0, %v273_v2, 0  ;;  %v574_v10 = vld [vmem:[%s166_s24 + $0x8] sm:$0xff]  ;;  %v583_v13 = vld [vmem:[%s166_s24 + $0x50] sm:$0xff]  ;;  %v581_v16 = vld [vmem:[%s166_s24 + $0x40] sm:$0xff] }
  0x11   : > { %319 = vmatpush.bf16.msra.mxu0 %v312_v3  ;;  %586 = vmatpush.bf16.msra.mxu1 %v312_v3  ;;  %v575_v14 = vld [vmem:[%s166_s24 + $0x10] sm:$0xff]  ;;  %v578_v15 = vld [vmem:[%s166_s24 + $0x28] sm:$0xff] }
  0x12   : > { %587 = vmatpush.bf16.msra.mxu2 %v312_v3  ;;  %588 = vmatpush.bf16.msra.mxu3 %v312_v3 }
  0x15   : > { %320 = vmatpush.bf16.msra.mxu0 %v585_v4  ;;  %589 = vmatpush.bf16.msra.mxu1 %v585_v4 }
  0x16   : > { %590 = vmatpush.bf16.msra.mxu2 %v585_v4  ;;  %591 = vmatpush.bf16.msra.mxu3 %v585_v4 }
  0x19   : > { %321 = vmatpush.bf16.msra.mxu0 %v584_v5  ;;  %592 = vmatpush.bf16.msra.mxu1 %v584_v5 }
  0x1a   : > { %593 = vmatpush.bf16.msra.mxu2 %v584_v5  ;;  %594 = vmatpush.bf16.msra.mxu3 %v584_v5 }
  0x1c   : > { %560 = vmatmul.msk.bf16.vlgmr.msra.gmra.mxu0 %vm276_vm1, %v573_v6  ;;  %563 = vmatmul.msk.bf16.vlgmr.msra.gmra.mxu1 %vm276_vm1, %v576_v7 }
  0x1d   : > { %566 = vmatmul.msk.bf16.vlgmr.msra.gmra.mxu2 %vm276_vm1, %v579_v8  ;;  %569 = vmatmul.msk.bf16.vlgmr.msra.gmra.mxu3 %vm276_vm1, %v582_v9 }
  0x2c   : > { %561 = vmatmul.msk.bf16.gmra.mxu0 %vm276_vm1, %v574_v10  ;;  %564 = vmatmul.msk.bf16.gmra.mxu1 %vm276_vm1, %v577_v11 }
  0x2d   : > { %567 = vmatmul.msk.bf16.gmra.mxu2 %vm276_vm1, %v580_v12  ;;  %570 = vmatmul.msk.bf16.gmra.mxu3 %vm276_vm1, %v583_v13 }
  0x3c   : > { %562 = vmatmul.msk.bf16.gmra.mxu0 %vm276_vm1, %v575_v14  ;;  %565 = vmatmul.msk.bf16.gmra.mxu1 %vm276_vm1, %v578_v15 }
  0x3d   : > { %568 = vmatmul.msk.bf16.gmra.mxu2 %vm276_vm1, %v581_v16 }
  0x99   : > { %v323_v18 = vpop.f32.mrf.mxu0  ;;  %v338_v19 = vpop.f32.mrf.mxu1 }
  0x9a   : > { %v324_v20 = vadd.f32 %v671_v17, %v323_v18  ;;  %v339_v21 = vadd.f32 %v671_v17, %v338_v19 }
  0x9c   : > { %v378_v22 = vmax.f32 %v324_v20, 0.0  ;;  %v384_v23 = vmax.f32 %v339_v21, 0.0 }
  0x9e   : > { %v400_v24 = vpack.c.bf16 %v378_v22, %v378_v22  ;;  %v406_v25 = vpack.c.bf16 %v384_v23, %v384_v23 }
  0xa0   : > { %423 = vst.msk [vmem:[%s680_s29] sm:$0xf] %vm422_vm2, %v400_v24  ;;  %v353_v26 = vpop.f32.mrf.mxu2  ;;  %v368_v27 = vpop.f32.mrf.mxu3 }
  0xa1   : > { %429 = vst.msk [vmem:[%s680_s29 + $0x18] sm:$0xf] %vm422_vm2, %v406_v25  ;;  %v354_v28 = vadd.f32 %v671_v17, %v353_v26  ;;  %v325_v29 = vpop.f32.mrf.mxu0  ;;  %v340_v30 = vpop.f32.mrf.mxu1  ;;  %v369_v31 = vadd.f32 %v671_v17, %v368_v27 }
  0xa2   : > { %v326_v32 = vadd.f32 %v671_v17, %v325_v29  ;;  %v341_v33 = vadd.f32 %v671_v17, %v340_v30 }
  0xa3   : > { %v390_v34 = vmax.f32 %v354_v28, 0.0  ;;  %v396_v35 = vmax.f32 %v369_v31, 0.0 }
  0xa4   : > { %v379_v36 = vmax.f32 %v326_v32, 0.0  ;;  %v385_v37 = vmax.f32 %v341_v33, 0.0 }
  0xa5   : > { %v412_v38 = vpack.c.bf16 %v390_v34, %v390_v34  ;;  %v418_v41 = vpack.c.bf16 %v396_v35, %v396_v35 }
  0xa6   : > { %v401_v39 = vpack.c.bf16 %v379_v36, %v379_v36  ;;  %v407_v40 = vpack.c.bf16 %v385_v37, %v385_v37 }
  0xa7   : > { %435 = vst.msk [vmem:[%s680_s29 + $0x30] sm:$0xf] %vm422_vm2, %v412_v38 }
  0xa8   : > { %424 = vst.msk [vmem:[%s680_s29 + $0x4] sm:$0xf] %vm422_vm2, %v401_v39  ;;  %v355_v42 = vpop.f32.mrf.mxu2  ;;  %v370_v43 = vpop.f32.mrf.mxu3 }
  0xa9   : > { %430 = vst.msk [vmem:[%s680_s29 + $0x1c] sm:$0xf] %vm422_vm2, %v407_v40  ;;  %v356_v44 = vadd.f32 %v671_v17, %v355_v42  ;;  %v328_v45 = vpop.f32.mrf.mxu0  ;;  %v343_v46 = vpop.f32.mrf.mxu1  ;;  %v371_v47 = vadd.f32 %v671_v17, %v370_v43 }
  0xaa   : > { %441 = vst.msk [vmem:[%s680_s29 + $0x48] sm:$0xf] %vm422_vm2, %v418_v41  ;;  %v329_v48 = vadd.f32 %v671_v17, %v328_v45  ;;  %v344_v49 = vadd.f32 %v671_v17, %v343_v46 }
  0xab   : > { %v391_v50 = vmax.f32 %v356_v44, 0.0  ;;  %v397_v51 = vmax.f32 %v371_v47, 0.0 }
  0xac   : > { %v380_v52 = vmax.f32 %v329_v48, 0.0  ;;  %v386_v53 = vmax.f32 %v344_v49, 0.0 }
  0xad   : > { %v413_v54 = vpack.c.bf16 %v391_v50, %v391_v50  ;;  %v419_v57 = vpack.c.bf16 %v397_v51, %v397_v51 }
  0xae   : > { %v402_v55 = vpack.c.bf16 %v380_v52, %v380_v52  ;;  %v408_v56 = vpack.c.bf16 %v386_v53, %v386_v53 }
  0xaf   : > { %436 = vst.msk [vmem:[%s680_s29 + $0x34] sm:$0xf] %vm422_vm2, %v413_v54 }
  0xb0   : > { %425 = vst.msk [vmem:[%s680_s29 + $0x8] sm:$0xf] %vm422_vm2, %v402_v55  ;;  %v358_v58 = vpop.f32.mrf.mxu2  ;;  %v373_v59 = vpop.f32.mrf.mxu3 }
  0xb1   : > { %431 = vst.msk [vmem:[%s680_s29 + $0x20] sm:$0xf] %vm422_vm2, %v408_v56  ;;  %v359_v60 = vadd.f32 %v671_v17, %v358_v58  ;;  %v330_v61 = vpop.f32.mrf.mxu0  ;;  %v345_v62 = vpop.f32.mrf.mxu1  ;;  %v374_v63 = vadd.f32 %v671_v17, %v373_v59 }
  0xb2   : > { %442 = vst.msk [vmem:[%s680_s29 + $0x4c] sm:$0xf] %vm422_vm2, %v419_v57  ;;  %v331_v0 = vadd.f32 %v671_v17, %v330_v61  ;;  %v346_v1 = vadd.f32 %v671_v17, %v345_v62 }
  0xb3   : > { %v392_v2 = vmax.f32 %v359_v60, 0.0  ;;  %v398_v3 = vmax.f32 %v374_v63, 0.0 }
  0xb4   : > { %v381_v4 = vmax.f32 %v331_v0, 0.0  ;;  %v387_v5 = vmax.f32 %v346_v1, 0.0 }
  0xb5   : > { %v414_v6 = vpack.c.bf16 %v392_v2, %v392_v2  ;;  %v420_v9 = vpack.c.bf16 %v398_v3, %v398_v3 }
  0xb6   : > { %v403_v7 = vpack.c.bf16 %v381_v4, %v381_v4  ;;  %v409_v8 = vpack.c.bf16 %v387_v5, %v387_v5 }
  0xb7   : > { %437 = vst.msk [vmem:[%s680_s29 + $0x38] sm:$0xf] %vm422_vm2, %v414_v6 }
  0xb8   : > { %426 = vst.msk [vmem:[%s680_s29 + $0xc] sm:$0xf] %vm422_vm2, %v403_v7  ;;  %v360_v10 = vpop.f32.mrf.mxu2  ;;  %v375_v11 = vpop.f32.mrf.mxu3 }
  0xb9   : > { %432 = vst.msk [vmem:[%s680_s29 + $0x24] sm:$0xf] %vm422_vm2, %v409_v8  ;;  %v361_v12 = vadd.f32 %v671_v17, %v360_v10  ;;  %v333_v13 = vpop.f32.mrf.mxu0  ;;  %v348_v14 = vpop.f32.mrf.mxu1  ;;  %v376_v15 = vadd.f32 %v671_v17, %v375_v11 }
  0xba   : > { %443 = vst.msk [vmem:[%s680_s29 + $0x50] sm:$0xf] %vm422_vm2, %v420_v9  ;;  %v334_v16 = vadd.f32 %v671_v17, %v333_v13  ;;  %v349_v18 = vadd.f32 %v671_v17, %v348_v14 }
  0xbb   : > { %v393_v19 = vmax.f32 %v361_v12, 0.0  ;;  %v399_v20 = vmax.f32 %v376_v15, 0.0 }
  0xbc   : > { %v382_v21 = vmax.f32 %v334_v16, 0.0  ;;  %v388_v22 = vmax.f32 %v349_v18, 0.0 }
  0xbd   : > { %v415_v23 = vpack.c.bf16 %v393_v19, %v393_v19  ;;  %v421_v26 = vpack.c.bf16 %v399_v20, %v399_v20 }
  0xbe   : > { %v404_v24 = vpack.c.bf16 %v382_v21, %v382_v21  ;;  %v410_v25 = vpack.c.bf16 %v388_v22, %v388_v22 }
  0xbf   : > { %438 = vst.msk [vmem:[%s680_s29 + $0x3c] sm:$0xf] %vm422_vm2, %v415_v23 }
  0xc0   : > { %427 = vst.msk [vmem:[%s680_s29 + $0x10] sm:$0xf] %vm422_vm2, %v404_v24  ;;  %v363_v27 = vpop.f32.mrf.mxu2 }
  0xc1   : > { %433 = vst.msk [vmem:[%s680_s29 + $0x28] sm:$0xf] %vm422_vm2, %v410_v25  ;;  %v364_v28 = vadd.f32 %v671_v17, %v363_v27  ;;  %v335_v29 = vpop.f32.mrf.mxu0  ;;  %v350_v30 = vpop.f32.mrf.mxu1 }
  0xc2   : > { %444 = vst.msk [vmem:[%s680_s29 + $0x54] sm:$0xf] %vm422_vm2, %v421_v26  ;;  %v336_v31 = vadd.f32 %v671_v17, %v335_v29  ;;  %v351_v32 = vadd.f32 %v671_v17, %v350_v30 }
  0xc3   : > { %v394_v33 = vmax.f32 %v364_v28, 0.0 }
  0xc4   : > { %v383_v34 = vmax.f32 %v336_v31, 0.0  ;;  %v389_v35 = vmax.f32 %v351_v32, 0.0 }
  0xc5   : > { %v416_v36 = vpack.c.bf16 %v394_v33, %v394_v33 }
  0xc6   : > { %v405_v37 = vpack.c.bf16 %v383_v34, %v383_v34  ;;  %v411_v38 = vpack.c.bf16 %v389_v35, %v389_v35 }
  0xc7   : > { %439 = vst.msk [vmem:[%s680_s29 + $0x40] sm:$0xf] %vm422_vm2, %v416_v36 }
  0xc8   : > { %428 = vst.msk [vmem:[%s680_s29 + $0x14] sm:$0xf] %vm422_vm2, %v405_v37  ;;  %v365_v39 = vpop.f32.mrf.mxu2 }
  0xc9   : > { %434 = vst.msk [vmem:[%s680_s29 + $0x2c] sm:$0xf] %vm422_vm2, %v411_v38  ;;  %v366_v40 = vadd.f32 %v671_v17, %v365_v39 }
  0xcb   : > { %v395_v41 = vmax.f32 %v366_v40, 0.0 }
  0xcd   : > { %v417_v42 = vpack.c.bf16 %v395_v41, %v395_v41 }
  0xcf   : > { %440 = vst.msk [vmem:[%s680_s29 + $0x44] sm:$0xf] %vm422_vm2, %v417_v42 }
  0xd0 PF: > { %s13_s12 = sadd.s32 1, %s610_s12  }
  0xd1   : > { %p10_p4 = scmp.ge.s32.totalorder %s13_s12, 4  }
  0xd3   :  { %12 = sbr.rel (!%p10_p4) target bundleno = 1 (0x1), region = 62 }

// kernel: inception_stem.6
= control target key start
LH: loop header
LB: loop body
LE: loop exit
PB: predicated region body
PF: predicated region fallthrough
CT: control target
= control target key end

     0   :  { %s1038_s12 = smov 0   ;;  %s1230_s0 = inlined_call_operand.vmem [shape: bf16[256,288], index: 0, kind: input, shape index: {}]   ;;  %s1231_s1 = inlined_call_operand.vmem [shape: bf16[288,32], index: 1, kind: input, shape index: {}]   ;;  %s1232_s2 = inlined_call_operand.vmem [shape: f32[1,32], index: 2, kind: input, shape index: {}]   ;;  %s1233_s3 = inlined_call_operand.vmem [shape: bf16[256,32], index: 3, kind: output, shape index: {}]  }
   0x1 LB: > { %s755_s13 = sadd.s32 4294967295, %s1016_s12   ;;  %p759_p0 = scmp.ge.s32.totalorder %s1016_s12, 1  ;;  %s1016_s12 = sphi %s1038_s12, %s13_s12  }
   0x2   : > { %p139_p1 = scmp.lt.s32.totalorder %s1016_s12, 3 }
   0x4   : > { %p140_p2 = pnand %p759_p0, %p139_p1 }
   0x5   : > { %s760_s20 = sshll.u32 (!%p140_p2), %s755_s13, 4 }
   0x6   : > { %143 = sbr.rel (%p140_p2) target bundleno = 280 (0x118), region = 32  ;;  %p165_p3 = scmp.lt.s32.totalorder (!%p140_p2), %s760_s20, 31 }
   0xb   : > { %v973_v0 = vld [vmem:[%s1231_s1 + $0x38] sm:$0xff]  ;;  %v983_v1 = vld [vmem:[%s1231_s1 + $0x88] sm:$0xff]  ;;  %v972_v3 = vld [vmem:[%s1231_s1 + $0x30] sm:$0xff]  ;;  %s1235_s20 = smov (!%p165_p3, %s760_s20), 31  ;;  %vm478_vm0 = vcmask 261120   ;;  %vm682_vm1 = vcmask 257024  }
   0xc   : > { %v1055_v2 = vld [vmem:[%s1231_s1 + $0x78] sm:$0xff]  ;;  %503 = vmatpush.bf16.msra.mxu0 %v973_v0  ;;  %984 = vmatpush.bf16.msra.mxu3 %v973_v0  ;;  %v982_v4 = vld [vmem:[%s1231_s1 + $0x80] sm:$0xff]  ;;  %v980_v5 = vld [vmem:[%s1231_s1 + $0x70] sm:$0xff]  ;;  %s1000_s27 = smul.u32 12, %s1235_s20  ;;  %s763_s6 = sshll.u32 %s1235_s20, 2 }
   0xd   : > { %607 = vmatpush.bf16.msra.mxu2 %v983_v1  ;;  %552 = vmatpush.bf16.msra.mxu1 %v1055_v2  ;;  %v971_v6 = vld [vmem:[%s1231_s1 + $0x28] sm:$0xff]  ;;  %v970_v11 = vld [vmem:[%s1231_s1 + $0x20] sm:$0xff]  ;;  %v969_v13 = vld [vmem:[%s1231_s1 + $0x18] sm:$0xff]  ;;  %s1178_s8 = scalar_lea.vmem %s1233_s3, %s763_s6 }
   0xe   : > { %s1076_s5 = scalar_lea.vmem %s1230_s0, %s1000_s27  ;;  %v979_v7 = vld [vmem:[%s1231_s1 + $0x68] sm:$0xff]  ;;  %v978_v12 = vld [vmem:[%s1231_s1 + $0x60] sm:$0xff]  ;;  %v977_v14 = vld [vmem:[%s1231_s1 + $0x58] sm:$0xff] }
   0xf   : > { %v774_v8 = vld [vmem:[%s1076_s5 + $0x8] sm:$0xf]  ;;  %v944_v9 = vld [vmem:[%s1076_s5 + $0x10] sm:$0xf0]  ;;  %v786_v17 = vld [vmem:[%s1076_s5 + $0x20] sm:$0xf] }
  0x10   : > { %504 = vmatpush.bf16.msra.mxu0 %v972_v3  ;;  %985 = vmatpush.bf16.msra.mxu3 %v972_v3  ;;  %v775_v10 = vor.u32 %v944_v9, %v774_v8  ;;  %v968_v15 = vld [vmem:[%s1231_s1 + $0x10] sm:$0xff]  ;;  %v947_v18 = vld [vmem:[%s1076_s5 + $0x28] sm:$0xf0]  ;;  %v966_v22 = vld [vmem:[%s1231_s1] sm:$0xff] }
  0x11   : > { %608 = vmatpush.bf16.msra.mxu2 %v982_v4  ;;  %553 = vmatpush.bf16.msra.mxu1 %v980_v5  ;;  %v976_v16 = vld [vmem:[%s1231_s1 + $0x50] sm:$0xff]  ;;  %v967_v19 = vld [vmem:[%s1231_s1 + $0x8] sm:$0xff]  ;;  %v787_v20 = vor.u32 %v947_v18, %v786_v17  ;;  %v766_v23 = vld [vmem:[%s1076_s5] sm:$0xf] }
  0x12   : > { %v975_v21 = vld [vmem:[%s1231_s1 + $0x48] sm:$0xff]  ;;  %v838_v25 = vld [vmem:[%s1076_s5 + $0x90] sm:$0xf]  ;;  %v961_v26 = vld [vmem:[%s1076_s5 + $0x98] sm:$0xf0] }
  0x13   : > { %v943_v24 = vld [vmem:[%s1076_s5 + $0x8] sm:$0xf0]  ;;  %v974_v27 = vld [vmem:[%s1231_s1 + $0x40] sm:$0xff]  ;;  %v768_v29 = vld [vmem:[%s1076_s5 + $0xc] sm:$0xf0]  ;;  %v839_v31 = vor.u32 %v961_v26, %v838_v25 }
  0x14   : > { %505 = vmatpush.bf16.msra.mxu0 %v971_v6  ;;  %986 = vmatpush.bf16.msra.mxu3 %v971_v6  ;;  %v942_v28 = vld [vmem:[%s1076_s5 + $0x4] sm:$0xf]  ;;  %v767_v30 = vor.u32 %v943_v24, %v766_v23  ;;  %v798_v33 = vld [vmem:[%s1076_s5 + $0x38] sm:$0xf]  ;;  %v850_v38 = vld [vmem:[%s1076_s5 + $0xa8] sm:$0xf] }
  0x15   : > { %932 = vmatmul.msk.bf16.vlgmr.msra.gmra.mxu2 %vm478_vm0, %v775_v10  ;;  %554 = vmatpush.bf16.msra.mxu1 %v979_v7  ;;  %v771_v32 = vor.u32 %v942_v28, %v768_v29  ;;  %v950_v34 = vld [vmem:[%s1076_s5 + $0x40] sm:$0xf0]  ;;  %v778_v36 = vld [vmem:[%s1076_s5 + $0x18] sm:$0xf]  ;;  %v964_v39 = vld [vmem:[%s1076_s5 + $0xb0] sm:$0xf0] }
  0x16   : > { %v799_v35 = vor.u32 %v950_v34, %v798_v33  ;;  %v946_v37 = vld [vmem:[%s1076_s5 + $0x20] sm:$0xf0]  ;;  %v945_v40 = vld [vmem:[%s1076_s5 + $0x1c] sm:$0xf]  ;;  %v780_v41 = vld [vmem:[%s1076_s5 + $0x24] sm:$0xf0]  ;;  %v851_v43 = vor.u32 %v964_v39, %v850_v38 }
  0x17   : > { %v779_v42 = vor.u32 %v946_v37, %v778_v36  ;;  %v783_v44 = vor.u32 %v945_v40, %v780_v41  ;;  %v810_v45 = vld [vmem:[%s1076_s5 + $0x50] sm:$0xf]  ;;  %v953_v46 = vld [vmem:[%s1076_s5 + $0x58] sm:$0xf0]  ;;  %v960_v50 = vld [vmem:[%s1076_s5 + $0x94] sm:$0xf] }
  0x18   : > { %506 = vmatpush.bf16.msra.mxu0 %v970_v11  ;;  %987 = vmatpush.bf16.msra.mxu3 %v970_v11  ;;  %v811_v47 = vor.u32 %v953_v46, %v810_v45  ;;  %v790_v48 = vld [vmem:[%s1076_s5 + $0x30] sm:$0xf]  ;;  %v949_v49 = vld [vmem:[%s1076_s5 + $0x38] sm:$0xf0]  ;;  %v840_v51 = vld [vmem:[%s1076_s5 + $0x9c] sm:$0xf0] }
  0x19   : > { %555 = vmatpush.bf16.msra.mxu1 %v978_v12  ;;  %v948_v52 = vld [vmem:[%s1076_s5 + $0x34] sm:$0xf]  ;;  %v792_v53 = vld [vmem:[%s1076_s5 + $0x3c] sm:$0xf0]  ;;  %v791_v54 = vor.u32 %v949_v49, %v790_v48  ;;  %v843_v55 = vor.u32 %v960_v50, %v840_v51  ;;  %v822_v57 = vld [vmem:[%s1076_s5 + $0x68] sm:$0xf] }
  0x1a   : > { %v795_v56 = vor.u32 %v948_v52, %v792_v53  ;;  %v956_v58 = vld [vmem:[%s1076_s5 + $0x70] sm:$0xf0]  ;;  %v802_v60 = vld [vmem:[%s1076_s5 + $0x48] sm:$0xf]  ;;  %v963_v62 = vld [vmem:[%s1076_s5 + $0xac] sm:$0xf] }
  0x1b   : > { %v823_v59 = vor.u32 %v956_v58, %v822_v57  ;;  %v952_v61 = vld [vmem:[%s1076_s5 + $0x50] sm:$0xf0]  ;;  %v852_v63 = vld [vmem:[%s1076_s5 + $0xb4] sm:$0xf0]  ;;  %v951_v0 = vld [vmem:[%s1076_s5 + $0x4c] sm:$0xf] }
  0x1c   : > { %507 = vmatpush.bf16.msra.mxu0 %v969_v13  ;;  %988 = vmatpush.bf16.msra.mxu3 %v969_v13  ;;  %v804_v1 = vld [vmem:[%s1076_s5 + $0x54] sm:$0xf0]  ;;  %v855_v3 = vor.u32 %v963_v62, %v852_v63  ;;  %v959_v6 = vld [vmem:[%s1076_s5 + $0x88] sm:$0xf0]  ;;  %v814_v8 = vld [vmem:[%s1076_s5 + $0x60] sm:$0xf] }
  0x1d   : > { %556 = vmatpush.bf16.msra.mxu1 %v977_v14  ;;  %v807_v4 = vor.u32 %v951_v0, %v804_v1  ;;  %v955_v9 = vld [vmem:[%s1076_s5 + $0x68] sm:$0xf0]  ;;  %v954_v10 = vld [vmem:[%s1076_s5 + $0x64] sm:$0xf]  ;;  %v816_v11 = vld [vmem:[%s1076_s5 + $0x6c] sm:$0xf0] }
  0x1e   : > { %v819_v13 = vor.u32 %v954_v10, %v816_v11  ;;  %v826_v17 = vld [vmem:[%s1076_s5 + $0x78] sm:$0xf]  ;;  %v958_v18 = vld [vmem:[%s1076_s5 + $0x80] sm:$0xf0]  ;;  %v858_v23 = vld [vmem:[%s1076_s5 + $0xb0] sm:$0xf] }
  0x1f   : > { %v965_v24 = vld [vmem:[%s1076_s5 + $0xb8] sm:$0xf0]  ;;  %v1171_v28 = vld [vmem:[%s1232_s2] ss:$0 sm:$0xff] }
  0x20   : > { %508 = vmatpush.bf16.msra.mxu0 %v968_v15  ;;  %989 = vmatpush.bf16.msra.mxu3 %v968_v15  ;;  %v962_v15 = vld [vmem:[%s1076_s5 + $0xa0] sm:$0xf0]  ;;  %v859_v25 = vor.u32 %v965_v24, %v858_v23 }
  0x21   : > { %557 = vmatpush.bf16.msra.mxu1 %v976_v16 }
  0x24   : > { %509 = vmatpush.bf16.msra.mxu0 %v967_v19  ;;  %990 = vmatpush.bf16.msra.mxu3 %v967_v19  ;;  %v957_v19 = vld [vmem:[%s1076_s5 + $0x7c] sm:$0xf] }
  0x25   : > { %933 = vmatmul.msk.bf16.gmra.mxu2 %vm478_vm0, %v787_v20  ;;  %558 = vmatpush.bf16.msra.mxu1 %v975_v21  ;;  %v828_v20 = vld [vmem:[%s1076_s5 + $0x84] sm:$0xf0] }
  0x28   : > { %510 = vmatpush.bf16.msra.mxu0 %v966_v22  ;;  %991 = vmatpush.bf16.msra.mxu3 %v966_v22  ;;  %v831_v22 = vor.u32 %v957_v19, %v828_v20 }
  0x29   : > { %559 = vmatpush.bf16.msra.mxu1 %v974_v27 }
  0x2b   : > { %511 = vmatmul.bf16.vlgmr.msra.gmra.mxu0 %v767_v30  ;;  %541 = vmatmul.bf16.vlgmr.msra.gmra.mxu3 %v839_v31 }
  0x2c   : > { %992 = vmatpush.bf16.msrb.mxu3 %v1055_v2  ;;  %560 = vmatmul.bf16.vlgmr.msra.gmra.mxu1 %v771_v32  ;;  %v803_v2 = vor.u32 %v952_v61, %v802_v60 }
  0x30   : > { %993 = vmatpush.bf16.msrb.mxu3 %v980_v5  ;;  %v834_v5 = vld [vmem:[%s1076_s5 + $0x80] sm:$0xf] }
  0x34   : > { %994 = vmatpush.bf16.msrb.mxu3 %v979_v7  ;;  %v835_v7 = vor.u32 %v959_v6, %v834_v5 }
  0x35   : > { %934 = vmatmul.msk.bf16.gmra.mxu2 %vm478_vm0, %v799_v35 }
  0x38   : > { %995 = vmatpush.bf16.msrb.mxu3 %v978_v12  ;;  %v815_v12 = vor.u32 %v955_v9, %v814_v8 }
  0x3b   : > { %516 = vmatmul.bf16.gmra.mxu0 %v779_v42  ;;  %546 = vmatmul.bf16.gmra.mxu3 %v851_v43 }
  0x3c   : > { %996 = vmatpush.bf16.msrb.mxu3 %v977_v14  ;;  %565 = vmatmul.bf16.gmra.mxu1 %v783_v44  ;;  %v846_v14 = vld [vmem:[%s1076_s5 + $0x98] sm:$0xf] }
  0x40   : > { %997 = vmatpush.bf16.msrb.mxu3 %v976_v16  ;;  %v847_v16 = vor.u32 %v962_v15, %v846_v14 }
  0x44   : > { %998 = vmatpush.bf16.msrb.mxu3 %v975_v21  ;;  %v827_v21 = vor.u32 %v958_v18, %v826_v17 }
  0x45   : > { %935 = vmatmul.msk.bf16.gmra.mxu2 %vm478_vm0, %v811_v47 }
  0x48   : > { %999 = vmatpush.bf16.msrb.mxu3 %v974_v27 }
  0x4b   : > { %521 = vmatmul.bf16.gmra.mxu0 %v791_v54  ;;  %590 = vmatmul.bf16.vlgmr.msrb.gmra.mxu3 %v843_v55 }
  0x4c   : > { %570 = vmatmul.bf16.gmra.mxu1 %v795_v56 }
  0x55   : > { %936 = vmatmul.msk.bf16.gmra.mxu2 %vm478_vm0, %v823_v59 }
  0x5b   : > { %526 = vmatmul.bf16.gmra.mxu0 %v803_v2  ;;  %595 = vmatmul.bf16.gmra.mxu3 %v855_v3 }
  0x5c   : > { %575 = vmatmul.bf16.gmra.mxu1 %v807_v4 }
  0x65   : > { %937 = vmatmul.msk.bf16.gmra.mxu2 %vm478_vm0, %v835_v7 }
  0x6b   : > { %531 = vmatmul.bf16.gmra.mxu0 %v815_v12 }
  0x6c   : > { %580 = vmatmul.bf16.gmra.mxu1 %v819_v13 }
  0x75   : > { %938 = vmatmul.msk.bf16.gmra.mxu2 %vm478_vm0, %v847_v16 }
  0x7b   : > { %536 = vmatmul.bf16.gmra.mxu0 %v827_v21 }
  0x7c   : > { %585 = vmatmul.bf16.gmra.mxu1 %v831_v22 }
  0x85   : > { %939 = vmatmul.msk.bf16.gmra.mxu2 %vm478_vm0, %v859_v25 }
  0x98   : > { %v610_v26 = vpop.f32.mrf.mxu2 }
  0xa0   : > { %v612_v27 = vpop.f32.mrf.mxu2 }
  0xa8   : > { %v615_v29 = vpop.f32.mrf.mxu2  ;;  %v512_v30 = vpop.f32.mrf.mxu0 }
  0xa9   : > { %v513_v31 = vadd.f32 %v1171_v28, %v512_v30  ;;  %v561_v32 = vpop.f32.mrf.mxu1 }
  0xab   : > { %v562_v33 = vadd.f32 %v561_v32, %v513_v31 }
  0xad   : > { %v611_v34 = vadd.f32 %v610_v26, %v562_v33 }
  0xae   : > { %v542_v58 = vpop.f32.mrf.mxu3 }
  0xaf   : > { %v650_v35 = vmax.f32 %v611_v34, 0.0 }
  0xb0   : > { %v617_v36 = vpop.f32.mrf.mxu2  ;;  %v514_v37 = vpop.f32.mrf.mxu0 }
  0xb1   : > { %v666_v38 = vpack.c.bf16 %v650_v35, %v650_v35  ;;  %v515_v39 = vadd.f32 %v1171_v28, %v514_v37  ;;  %v563_v40 = vpop.f32.mrf.mxu1 }
  0xb3   : > { %683 = vst.msk [vmem:[%s1178_s8] sm:$0xf] %vm682_vm1, %v666_v38  ;;  %v564_v41 = vadd.f32 %v563_v40, %v515_v39 }
  0xb5   : > { %v613_v42 = vadd.f32 %v612_v27, %v564_v41 }
  0xb6   : > { %v544_v4 = vpop.f32.mrf.mxu3 }
  0xb7   : > { %v651_v43 = vmax.f32 %v613_v42, 0.0 }
  0xb8   : > { %v620_v44 = vpop.f32.mrf.mxu2  ;;  %v517_v45 = vpop.f32.mrf.mxu0 }
  0xb9   : > { %v667_v46 = vpack.c.bf16 %v651_v43, %v651_v43  ;;  %v518_v47 = vadd.f32 %v1171_v28, %v517_v45  ;;  %v566_v48 = vpop.f32.mrf.mxu1 }
  0xbb   : > { %684 = vst.msk [vmem:[%s1178_s8 + $0x4] sm:$0xf] %vm682_vm1, %v667_v46  ;;  %v567_v49 = vadd.f32 %v566_v48, %v518_v47  ;;  %v543_v47 = vadd.f32 %v1171_v28, %v542_v58 }
  0xbd   : > { %v616_v50 = vadd.f32 %v615_v29, %v567_v49 }
  0xbe   : > { %v547_v16 = vpop.f32.mrf.mxu3 }
  0xbf   : > { %v652_v51 = vmax.f32 %v616_v50, 0.0 }
  0xc0   : > { %v622_v52 = vpop.f32.mrf.mxu2  ;;  %v519_v53 = vpop.f32.mrf.mxu0 }
  0xc1   : > { %v668_v54 = vpack.c.bf16 %v652_v51, %v652_v51  ;;  %v520_v55 = vadd.f32 %v1171_v28, %v519_v53  ;;  %v568_v56 = vpop.f32.mrf.mxu1 }
  0xc3   : > { %685 = vst.msk [vmem:[%s1178_s8 + $0x8] sm:$0xf] %vm682_vm1, %v668_v54  ;;  %v569_v57 = vadd.f32 %v568_v56, %v520_v55 }
  0xc5   : > { %v618_v59 = vadd.f32 %v617_v36, %v569_v57 }
  0xc6   : > { %v549_v29 = vpop.f32.mrf.mxu3 }
  0xc7   : > { %v653_v60 = vmax.f32 %v618_v59, 0.0 }
  0xc8   : > { %v625_v61 = vpop.f32.mrf.mxu2  ;;  %v522_v62 = vpop.f32.mrf.mxu0 }
  0xc9   : > { %v669_v63 = vpack.c.bf16 %v653_v60, %v653_v60  ;;  %v523_v0 = vadd.f32 %v1171_v28, %v522_v62  ;;  %v571_v1 = vpop.f32.mrf.mxu1  ;;  %v545_v60 = vadd.f32 %v1171_v28, %v544_v4 }
  0xcb   : > { %686 = vst.msk [vmem:[%s1178_s8 + $0xc] sm:$0xf] %vm682_vm1, %v669_v63  ;;  %v572_v2 = vadd.f32 %v571_v1, %v523_v0 }
  0xcd   : > { %v621_v3 = vadd.f32 %v620_v44, %v572_v2 }
  0xce   : > { %v591_v39 = vpop.f32.mrf.mxu3 }
  0xcf   : > { %v654_v5 = vmax.f32 %v621_v3, 0.0  ;;  %v592_v50 = vadd.f32 %v591_v39, %v543_v47 }
  0xd0   : > { %v627_v6 = vpop.f32.mrf.mxu2  ;;  %v524_v7 = vpop.f32.mrf.mxu0 }
  0xd1   : > { %v670_v8 = vpack.c.bf16 %v654_v5, %v654_v5  ;;  %v525_v9 = vadd.f32 %v1171_v28, %v524_v7  ;;  %v573_v10 = vpop.f32.mrf.mxu1 }
  0xd3   : > { %687 = vst.msk [vmem:[%s1178_s8 + $0x10] sm:$0xf] %vm682_vm1, %v670_v8  ;;  %v574_v11 = vadd.f32 %v573_v10, %v525_v9  ;;  %v548_v9 = vadd.f32 %v1171_v28, %v547_v16 }
  0xd5   : > { %v623_v12 = vadd.f32 %v622_v52, %v574_v11 }
  0xd6   : > { %v593_v51 = vpop.f32.mrf.mxu3 }
  0xd7   : > { %v655_v13 = vmax.f32 %v623_v12, 0.0  ;;  %v594_v0 = vadd.f32 %v593_v51, %v545_v60 }
  0xd8   : > { %v630_v14 = vpop.f32.mrf.mxu2  ;;  %v527_v15 = vpop.f32.mrf.mxu0 }
  0xd9   : > { %v671_v17 = vpack.c.bf16 %v655_v13, %v655_v13  ;;  %v528_v18 = vadd.f32 %v1171_v28, %v527_v15  ;;  %v576_v19 = vpop.f32.mrf.mxu1 }
  0xdb   : > { %688 = vst.msk [vmem:[%s1178_s8 + $0x14] sm:$0xf] %vm682_vm1, %v671_v17  ;;  %v577_v20 = vadd.f32 %v576_v19, %v528_v18 }
  0xdd   : > { %v626_v21 = vadd.f32 %v625_v61, %v577_v20  ;;  %v550_v20 = vadd.f32 %v1171_v28, %v549_v29 }
  0xde   : > { %v596_v8 = vpop.f32.mrf.mxu3 }
  0xdf   : > { %v656_v22 = vmax.f32 %v626_v21, 0.0 }
  0xe0   : > { %v632_v23 = vpop.f32.mrf.mxu2  ;;  %v529_v24 = vpop.f32.mrf.mxu0 }
  0xe1   : > { %v672_v25 = vpack.c.bf16 %v656_v22, %v656_v22  ;;  %v530_v26 = vadd.f32 %v1171_v28, %v529_v24  ;;  %v578_v27 = vpop.f32.mrf.mxu1 }
  0xe3   : > { %689 = vst.msk [vmem:[%s1178_s8 + $0x18] sm:$0xf] %vm682_vm1, %v672_v25  ;;  %v579_v30 = vadd.f32 %v578_v27, %v530_v26 }
  0xe5   : > { %v628_v31 = vadd.f32 %v627_v6, %v579_v30 }
  0xe6   : > { %v598_v21 = vpop.f32.mrf.mxu3 }
  0xe7   : > { %v657_v32 = vmax.f32 %v628_v31, 0.0 }
  0xe8   : > { %v635_v33 = vpop.f32.mrf.mxu2  ;;  %v532_v34 = vpop.f32.mrf.mxu0 }
  0xe9   : > { %v673_v35 = vpack.c.bf16 %v657_v32, %v657_v32  ;;  %v533_v36 = vadd.f32 %v1171_v28, %v532_v34  ;;  %v581_v37 = vpop.f32.mrf.mxu1 }
  0xeb   : > { %690 = vst.msk [vmem:[%s1178_s8 + $0x1c] sm:$0xf] %vm682_vm1, %v673_v35  ;;  %v582_v38 = vadd.f32 %v581_v37, %v533_v36 }
  0xed   : > { %v631_v40 = vadd.f32 %v630_v14, %v582_v38  ;;  %v597_v14 = vadd.f32 %v596_v8, %v548_v9 }
  0xef   : > { %v658_v41 = vmax.f32 %v631_v40, 0.0 }
  0xf0   : > { %v637_v42 = vpop.f32.mrf.mxu2  ;;  %v534_v43 = vpop.f32.mrf.mxu0 }
  0xf1   : > { %v674_v44 = vpack.c.bf16 %v658_v41, %v658_v41  ;;  %v535_v45 = vadd.f32 %v1171_v28, %v534_v43  ;;  %v583_v46 = vpop.f32.mrf.mxu1 }
  0xf3   : > { %691 = vst.msk [vmem:[%s1178_s8 + $0x20] sm:$0xf] %vm682_vm1, %v674_v44  ;;  %v584_v48 = vadd.f32 %v583_v46, %v535_v45 }
  0xf5   : > { %v633_v49 = vadd.f32 %v632_v23, %v584_v48  ;;  %v599_v23 = vadd.f32 %v598_v21, %v550_v20 }
  0xf7   : > { %v659_v52 = vmax.f32 %v633_v49, 0.0 }
  0xf8   : > { %v640_v53 = vpop.f32.mrf.mxu2  ;;  %v537_v54 = vpop.f32.mrf.mxu0 }
  0xf9   : > { %v675_v55 = vpack.c.bf16 %v659_v52, %v659_v52  ;;  %v641_v56 = vadd.f32 %v640_v53, %v592_v50  ;;  %v538_v57 = vadd.f32 %v1171_v28, %v537_v54  ;;  %v586_v59 = vpop.f32.mrf.mxu1 }
  0xfb   : > { %692 = vst.msk [vmem:[%s1178_s8 + $0x24] sm:$0xf] %vm682_vm1, %v675_v55  ;;  %v662_v58 = vmax.f32 %v641_v56, 0.0  ;;  %v587_v61 = vadd.f32 %v586_v59, %v538_v57 }
  0xfd   : > { %v678_v62 = vpack.c.bf16 %v662_v58, %v662_v58  ;;  %v636_v63 = vadd.f32 %v635_v33, %v587_v61 }
  0xff   : > { %695 = vst.msk [vmem:[%s1178_s8 + $0x30] sm:$0xf] %vm682_vm1, %v678_v62  ;;  %v660_v1 = vmax.f32 %v636_v63, 0.0 }
 0x100   : > { %v642_v2 = vpop.f32.mrf.mxu2  ;;  %v539_v3 = vpop.f32.mrf.mxu0 }
 0x101   : > { %v676_v5 = vpack.c.bf16 %v660_v1, %v660_v1  ;;  %v643_v6 = vadd.f32 %v642_v2, %v594_v0  ;;  %v540_v7 = vadd.f32 %v1171_v28, %v539_v3  ;;  %v588_v4 = vpop.f32.mrf.mxu1 }
 0x103   : > { %693 = vst.msk [vmem:[%s1178_s8 + $0x28] sm:$0xf] %vm682_vm1, %v676_v5  ;;  %v663_v10 = vmax.f32 %v643_v6, 0.0  ;;  %v589_v11 = vadd.f32 %v588_v4, %v540_v7 }
 0x105   : > { %v679_v12 = vpack.c.bf16 %v663_v10, %v663_v10  ;;  %v638_v13 = vadd.f32 %v637_v42, %v589_v11 }
 0x107   : > { %696 = vst.msk [vmem:[%s1178_s8 + $0x34] sm:$0xf] %vm682_vm1, %v679_v12  ;;  %v661_v15 = vmax.f32 %v638_v13, 0.0 }
 0x108   : > { %v645_v17 = vpop.f32.mrf.mxu2 }
 0x109   : > { %v677_v18 = vpack.c.bf16 %v661_v15, %v661_v15  ;;  %v646_v19 = vadd.f32 %v645_v17, %v597_v14 }
 0x10b   : > { %694 = vst.msk [vmem:[%s1178_s8 + $0x2c] sm:$0xf] %vm682_vm1, %v677_v18  ;;  %v664_v16 = vmax.f32 %v646_v19, 0.0 }
 0x10d   : > { %v680_v22 = vpack.c.bf16 %v664_v16, %v664_v16 }
 0x10f   : > { %697 = vst.msk [vmem:[%s1178_s8 + $0x38] sm:$0xf] %vm682_vm1, %v680_v22 }
 0x110   : > { %v647_v24 = vpop.f32.mrf.mxu2 }
 0x111   : > { %v648_v25 = vadd.f32 %v647_v24, %v599_v23 }
 0x113   : > { %v665_v26 = vmax.f32 %v648_v25, 0.0 }
 0x115   : > { %v681_v27 = vpack.c.bf16 %v665_v26, %v665_v26 }
 0x117   : > { %698 = vst.msk [vmem:[%s1178_s8 + $0x3c] sm:$0xf] %vm682_vm1, %v681_v27 }
 0x118 PF: > { %s13_s12 = sadd.s32 1, %s1016_s12  }
 0x119   : > { %p10_p4 = scmp.ge.s32.totalorder %s13_s12, 4  }
 0x11b   :  { %12 = sbr.rel (!%p10_p4) target bundleno = 1 (0x1), region = 62 }

// kernel: inception_stem.7
= control target key start
LH: loop header
LB: loop body
LE: loop exit
PB: predicated region body
PF: predicated region fallthrough
CT: control target
= control target key end

     0   :  { %s1038_s12 = smov 0   ;;  %s1230_s0 = inlined_call_operand.vmem [shape: bf16[256,288], index: 0, kind: input, shape index: {}]   ;;  %s1231_s1 = inlined_call_operand.vmem [shape: bf16[288,64], index: 1, kind: input, shape index: {}]   ;;  %s1232_s2 = inlined_call_operand.vmem [shape: f32[1,64], index: 2, kind: input, shape index: {}]   ;;  %s1233_s3 = inlined_call_operand.vmem [shape: bf16[256,64], index: 3, kind: output, shape index: {}]  }
   0x1 LB: > { %s755_s13 = sadd.s32 4294967295, %s1016_s12   ;;  %p759_p0 = scmp.ge.s32.totalorder %s1016_s12, 1  ;;  %s1016_s12 = sphi %s1038_s12, %s13_s12  }
   0x2   : > { %p139_p1 = scmp.lt.s32.totalorder %s1016_s12, 3 }
   0x4   : > { %p140_p2 = pnand %p759_p0, %p139_p1 }
   0x5   : > { %s760_s20 = sshll.u32 (!%p140_p2), %s755_s13, 4 }
   0x6   : > { %143 = sbr.rel (%p140_p2) target bundleno = 280 (0x118), region = 32  ;;  %p165_p3 = scmp.lt.s32.totalorder (!%p140_p2), %s760_s20, 31 }
   0xb   : > { %v973_v0 = vld [vmem:[%s1231_s1 + $0x38] sm:$0xff]  ;;  %v983_v1 = vld [vmem:[%s1231_s1 + $0x88] sm:$0xff]  ;;  %v972_v3 = vld [vmem:[%s1231_s1 + $0x30] sm:$0xff]  ;;  %s1235_s20 = smov (!%p165_p3, %s760_s20), 31  ;;  %vm478_vm0 = vcmask 261120   ;;  %vm682_vm1 = vcmask 519168  }
   0xc   : > { %v1055_v2 = vld [vmem:[%s1231_s1 + $0x78] sm:$0xff]  ;;  %503 = vmatpush.bf16.msra.mxu0 %v973_v0  ;;  %984 = vmatpush.bf16.msra.mxu3 %v973_v0  ;;  %v982_v4 = vld [vmem:[%s1231_s1 + $0x80] sm:$0xff]  ;;  %v980_v5 = vld [vmem:[%s1231_s1 + $0x70] sm:$0xff]  ;;  %s1000_s27 = smul.u32 12, %s1235_s20  ;;  %s763_s6 = sshll.u32 %s1235_s20, 2 }
   0xd   : > { %607 = vmatpush.bf16.msra.mxu2 %v983_v1  ;;  %552 = vmatpush.bf16.msra.mxu1 %v1055_v2  ;;  %v971_v6 = vld [vmem:[%s1231_s1 + $0x28] sm:$0xff]  ;;  %v970_v11 = vld [vmem:[%s1231_s1 + $0x20] sm:$0xff]  ;;  %v969_v13 = vld [vmem:[%s1231_s1 + $0x18] sm:$0xff]  ;;  %s1178_s8 = scalar_lea.vmem %s1233_s3, %s763_s6 }
   0xe   : > { %s1076_s5 = scalar_lea.vmem %s1230_s0, %s1000_s27  ;;  %v979_v7 = vld [vmem:[%s1231_s1 + $0x68] sm:$0xff]  ;;  %v978_v12 = vld [vmem:[%s1231_s1 + $0x60] sm:$0xff]  ;;  %v977_v14 = vld [vmem:[%s1231_s1 + $0x58] sm:$0xff] }
   0xf   : > { %v774_v8 = vld [vmem:[%s1076_s5 + $0x8] sm:$0xf]  ;;  %v944_v9 = vld [vmem:[%s1076_s5 + $0x10] sm:$0xf0]  ;;  %v786_v17 = vld [vmem:[%s1076_s5 + $0x20] sm:$0xf] }
  0x10   : > { %504 = vmatpush.bf16.msra.mxu0 %v972_v3  ;;  %985 = vmatpush.bf16.msra.mxu3 %v972_v3  ;;  %v775_v10 = vor.u32 %v944_v9, %v774_v8  ;;  %v968_v15 = vld [vmem:[%s1231_s1 + $0x10] sm:$0xff]  ;;  %v947_v18 = vld [vmem:[%s1076_s5 + $0x28] sm:$0xf0]  ;;  %v966_v22 = vld [vmem:[%s1231_s1] sm:$0xff] }
  0x11   : > { %608 = vmatpush.bf16.msra.mxu2 %v982_v4  ;;  %553 = vmatpush.bf16.msra.mxu1 %v980_v5  ;;  %v976_v16 = vld [vmem:[%s1231_s1 + $0x50] sm:$0xff]  ;;  %v967_v19 = vld [vmem:[%s1231_s1 + $0x8] sm:$0xff]  ;;  %v787_v20 = vor.u32 %v947_v18, %v786_v17  ;;  %v766_v23 = vld [vmem:[%s1076_s5] sm:$0xf] }
  0x12   : > { %v975_v21 = vld [vmem:[%s1231_s1 + $0x48] sm:$0xff]  ;;  %v838_v25 = vld [vmem:[%s1076_s5 + $0x90] sm:$0xf]  ;;  %v961_v26 = vld [vmem:[%s1076_s5 + $0x98] sm:$0xf0] }
  0x13   : > { %v943_v24 = vld [vmem:[%s1076_s5 + $0x8] sm:$0xf0]  ;;  %v974_v27 = vld [vmem:[%s1231_s1 + $0x40] sm:$0xff]  ;;  %v768_v29 = vld [vmem:[%s1076_s5 + $0xc] sm:$0xf0]  ;;  %v839_v31 = vor.u32 %v961_v26, %v838_v25 }
  0x14   : > { %505 = vmatpush.bf16.msra.mxu0 %v971_v6  ;;  %986 = vmatpush.bf16.msra.mxu3 %v971_v6  ;;  %v942_v28 = vld [vmem:[%s1076_s5 + $0x4] sm:$0xf]  ;;  %v767_v30 = vor.u32 %v943_v24, %v766_v23  ;;  %v798_v33 = vld [vmem:[%s1076_s5 + $0x38] sm:$0xf]  ;;  %v850_v38 = vld [vmem:[%s1076_s5 + $0xa8] sm:$0xf] }
  0x15   : > { %932 = vmatmul.msk.bf16.vlgmr.msra.gmra.mxu2 %vm478_vm0, %v775_v10  ;;  %554 = vmatpush.bf16.msra.mxu1 %v979_v7  ;;  %v771_v32 = vor.u32 %v942_v28, %v768_v29  ;;  %v950_v34 = vld [vmem:[%s1076_s5 + $0x40] sm:$0xf0]  ;;  %v778_v36 = vld [vmem:[%s1076_s5 + $0x18] sm:$0xf]  ;;  %v964_v39 = vld [vmem:[%s1076_s5 + $0xb0] sm:$0xf0] }
  0x16   : > { %v799_v35 = vor.u32 %v950_v34, %v798_v33  ;;  %v946_v37 = vld [vmem:[%s1076_s5 + $0x20] sm:$0xf0]  ;;  %v945_v40 = vld [vmem:[%s1076_s5 + $0x1c] sm:$0xf]  ;;  %v780_v41 = vld [vmem:[%s1076_s5 + $0x24] sm:$0xf0]  ;;  %v851_v43 = vor.u32 %v964_v39, %v850_v38 }
  0x17   : > { %v779_v42 = vor.u32 %v946_v37, %v778_v36  ;;  %v783_v44 = vor.u32 %v945_v40, %v780_v41  ;;  %v810_v45 = vld [vmem:[%s1076_s5 + $0x50] sm:$0xf]  ;;  %v953_v46 = vld [vmem:[%s1076_s5 + $0x58] sm:$0xf0]  ;;  %v960_v50 = vld [vmem:[%s1076_s5 + $0x94] sm:$0xf] }
  0x18   : > { %506 = vmatpush.bf16.msra.mxu0 %v970_v11  ;;  %987 = vmatpush.bf16.msra.mxu3 %v970_v11  ;;  %v811_v47 = vor.u32 %v953_v46, %v810_v45  ;;  %v790_v48 = vld [vmem:[%s1076_s5 + $0x30] sm:$0xf]  ;;  %v949_v49 = vld [vmem:[%s1076_s5 + $0x38] sm:$0xf0]  ;;  %v840_v51 = vld [vmem:[%s1076_s5 + $0x9c] sm:$0xf0] }
  0x19   : > { %555 = vmatpush.bf16.msra.mxu1 %v978_v12  ;;  %v948_v52 = vld [vmem:[%s1076_s5 + $0x34] sm:$0xf]  ;;  %v792_v53 = vld [vmem:[%s1076_s5 + $0x3c] sm:$0xf0]  ;;  %v791_v54 = vor.u32 %v949_v49, %v790_v48  ;;  %v843_v55 = vor.u32 %v960_v50, %v840_v51  ;;  %v822_v57 = vld [vmem:[%s1076_s5 + $0x68] sm:$0xf] }
  0x1a   : > { %v795_v56 = vor.u32 %v948_v52, %v792_v53  ;;  %v956_v58 = vld [vmem:[%s1076_s5 + $0x70] sm:$0xf0]  ;;  %v802_v60 = vld [vmem:[%s1076_s5 + $0x48] sm:$0xf]  ;;  %v963_v62 = vld [vmem:[%s1076_s5 + $0xac] sm:$0xf] }
  0x1b   : > { %v823_v59 = vor.u32 %v956_v58, %v822_v57  ;;  %v952_v61 = vld [vmem:[%s1076_s5 + $0x50] sm:$0xf0]  ;;  %v852_v63 = vld [vmem:[%s1076_s5 + $0xb4] sm:$0xf0]  ;;  %v951_v0 = vld [vmem:[%s1076_s5 + $0x4c] sm:$0xf] }
  0x1c   : > { %507 = vmatpush.bf16.msra.mxu0 %v969_v13  ;;  %988 = vmatpush.bf16.msra.mxu3 %v969_v13  ;;  %v804_v1 = vld [vmem:[%s1076_s5 + $0x54] sm:$0xf0]  ;;  %v855_v3 = vor.u32 %v963_v62, %v852_v63  ;;  %v959_v6 = vld [vmem:[%s1076_s5 + $0x88] sm:$0xf0]  ;;  %v814_v8 = vld [vmem:[%s1076_s5 + $0x60] sm:$0xf] }
  0x1d   : > { %556 = vmatpush.bf16.msra.mxu1 %v977_v14  ;;  %v807_v4 = vor.u32 %v951_v0, %v804_v1  ;;  %v955_v9 = vld [vmem:[%s1076_s5 + $0x68] sm:$0xf0]  ;;  %v954_v10 = vld [vmem:[%s1076_s5 + $0x64] sm:$0xf]  ;;  %v816_v11 = vld [vmem:[%s1076_s5 + $0x6c] sm:$0xf0] }
  0x1e   : > { %v819_v13 = vor.u32 %v954_v10, %v816_v11  ;;  %v826_v17 = vld [vmem:[%s1076_s5 + $0x78] sm:$0xf]  ;;  %v958_v18 = vld [vmem:[%s1076_s5 + $0x80] sm:$0xf0]  ;;  %v858_v23 = vld [vmem:[%s1076_s5 + $0xb0] sm:$0xf] }
  0x1f   : > { %v965_v24 = vld [vmem:[%s1076_s5 + $0xb8] sm:$0xf0]  ;;  %v1171_v28 = vld [vmem:[%s1232_s2] ss:$0 sm:$0xff] }
  0x20   : > { %508 = vmatpush.bf16.msra.mxu0 %v968_v15  ;;  %989 = vmatpush.bf16.msra.mxu3 %v968_v15  ;;  %v962_v15 = vld [vmem:[%s1076_s5 + $0xa0] sm:$0xf0]  ;;  %v859_v25 = vor.u32 %v965_v24, %v858_v23 }
  0x21   : > { %557 = vmatpush.bf16.msra.mxu1 %v976_v16 }
  0x24   : > { %509 = vmatpush.bf16.msra.mxu0 %v967_v19  ;;  %990 = vmatpush.bf16.msra.mxu3 %v967_v19  ;;  %v957_v19 = vld [vmem:[%s1076_s5 + $0x7c] sm:$0xf] }
  0x25   : > { %933 = vmatmul.msk.bf16.gmra.mxu2 %vm478_vm0, %v787_v20  ;;  %558 = vmatpush.bf16.msra.mxu1 %v975_v21  ;;  %v828_v20 = vld [vmem:[%s1076_s5 + $0x84] sm:$0xf0] }
  0x28   : > { %510 = vmatpush.bf16.msra.mxu0 %v966_v22  ;;  %991 = vmatpush.bf16.msra.mxu3 %v966_v22  ;;  %v831_v22 = vor.u32 %v957_v19, %v828_v20 }
  0x29   : > { %559 = vmatpush.bf16.msra.mxu1 %v974_v27 }
  0x2b   : > { %511 = vmatmul.bf16.vlgmr.msra.gmra.mxu0 %v767_v30  ;;  %541 = vmatmul.bf16.vlgmr.msra.gmra.mxu3 %v839_v31 }
  0x2c   : > { %992 = vmatpush.bf16.msrb.mxu3 %v1055_v2  ;;  %560 = vmatmul.bf16.vlgmr.msra.gmra.mxu1 %v771_v32  ;;  %v803_v2 = vor.u32 %v952_v61, %v802_v60 }
  0x30   : > { %993 = vmatpush.bf16.msrb.mxu3 %v980_v5  ;;  %v834_v5 = vld [vmem:[%s1076_s5 + $0x80] sm:$0xf] }
  0x34   : > { %994 = vmatpush.bf16.msrb.mxu3 %v979_v7  ;;  %v835_v7 = vor.u32 %v959_v6, %v834_v5 }
  0x35   : > { %934 = vmatmul.msk.bf16.gmra.mxu2 %vm478_vm0, %v799_v35 }
  0x38   : > { %995 = vmatpush.bf16.msrb.mxu3 %v978_v12  ;;  %v815_v12 = vor.u32 %v955_v9, %v814_v8 }
  0x3b   : > { %516 = vmatmul.bf16.gmra.mxu0 %v779_v42  ;;  %546 = vmatmul.bf16.gmra.mxu3 %v851_v43 }
  0x3c   : > { %996 = vmatpush.bf16.msrb.mxu3 %v977_v14  ;;  %565 = vmatmul.bf16.gmra.mxu1 %v783_v44  ;;  %v846_v14 = vld [vmem:[%s1076_s5 + $0x98] sm:$0xf] }
  0x40   : > { %997 = vmatpush.bf16.msrb.mxu3 %v976_v16  ;;  %v847_v16 = vor.u32 %v962_v15, %v846_v14 }
  0x44   : > { %998 = vmatpush.bf16.msrb.mxu3 %v975_v21  ;;  %v827_v21 = vor.u32 %v958_v18, %v826_v17 }
  0x45   : > { %935 = vmatmul.msk.bf16.gmra.mxu2 %vm478_vm0, %v811_v47 }
  0x48   : > { %999 = vmatpush.bf16.msrb.mxu3 %v974_v27 }
  0x4b   : > { %521 = vmatmul.bf16.gmra.mxu0 %v791_v54  ;;  %590 = vmatmul.bf16.vlgmr.msrb.gmra.mxu3 %v843_v55 }
  0x4c   : > { %570 = vmatmul.bf16.gmra.mxu1 %v795_v56 }
  0x55   : > { %936 = vmatmul.msk.bf16.gmra.mxu2 %vm478_vm0, %v823_v59 }
  0x5b   : > { %526 = vmatmul.bf16.gmra.mxu0 %v803_v2  ;;  %595 = vmatmul.bf16.gmra.mxu3 %v855_v3 }
  0x5c   : > { %575 = vmatmul.bf16.gmra.mxu1 %v807_v4 }
  0x65   : > { %937 = vmatmul.msk.bf16.gmra.mxu2 %vm478_vm0, %v835_v7 }
  0x6b   : > { %531 = vmatmul.bf16.gmra.mxu0 %v815_v12 }
  0x6c   : > { %580 = vmatmul.bf16.gmra.mxu1 %v819_v13 }
  0x75   : > { %938 = vmatmul.msk.bf16.gmra.mxu2 %vm478_vm0, %v847_v16 }
  0x7b   : > { %536 = vmatmul.bf16.gmra.mxu0 %v827_v21 }
  0x7c   : > { %585 = vmatmul.bf16.gmra.mxu1 %v831_v22 }
  0x85   : > { %939 = vmatmul.msk.bf16.gmra.mxu2 %vm478_vm0, %v859_v25 }
  0x98   : > { %v610_v26 = vpop.f32.mrf.mxu2 }
  0xa0   : > { %v612_v27 = vpop.f32.mrf.mxu2 }
  0xa8   : > { %v615_v29 = vpop.f32.mrf.mxu2  ;;  %v512_v30 = vpop.f32.mrf.mxu0 }
  0xa9   : > { %v513_v31 = vadd.f32 %v1171_v28, %v512_v30  ;;  %v561_v32 = vpop.f32.mrf.mxu1 }
  0xab   : > { %v562_v33 = vadd.f32 %v561_v32, %v513_v31 }
  0xad   : > { %v611_v34 = vadd.f32 %v610_v26, %v562_v33 }
  0xae   : > { %v542_v58 = vpop.f32.mrf.mxu3 }
  0xaf   : > { %v650_v35 = vmax.f32 %v611_v34, 0.0 }
  0xb0   : > { %v617_v36 = vpop.f32.mrf.mxu2  ;;  %v514_v37 = vpop.f32.mrf.mxu0 }
  0xb1   : > { %v666_v38 = vpack.c.bf16 %v650_v35, %v650_v35  ;;  %v515_v39 = vadd.f32 %v1171_v28, %v514_v37  ;;  %v563_v40 = vpop.f32.mrf.mxu1 }
  0xb3   : > { %683 = vst.msk [vmem:[%s1178_s8] sm:$0xf] %vm682_vm1, %v666_v38  ;;  %v564_v41 = vadd.f32 %v563_v40, %v515_v39 }
  0xb5   : > { %v613_v42 = vadd.f32 %v612_v27, %v564_v41 }
  0xb6   : > { %v544_v4 = vpop.f32.mrf.mxu3 }
  0xb7   : > { %v651_v43 = vmax.f32 %v613_v42, 0.0 }
  0xb8   : > { %v620_v44 = vpop.f32.mrf.mxu2  ;;  %v517_v45 = vpop.f32.mrf.mxu0 }
  0xb9   : > { %v667_v46 = vpack.c.bf16 %v651_v43, %v651_v43  ;;  %v518_v47 = vadd.f32 %v1171_v28, %v517_v45  ;;  %v566_v48 = vpop.f32.mrf.mxu1 }
  0xbb   : > { %684 = vst.msk [vmem:[%s1178_s8 + $0x4] sm:$0xf] %vm682_vm1, %v667_v46  ;;  %v567_v49 = vadd.f32 %v566_v48, %v518_v47  ;;  %v543_v47 = vadd.f32 %v1171_v28, %v542_v58 }
  0xbd   : > { %v616_v50 = vadd.f32 %v615_v29, %v567_v49 }
  0xbe   : > { %v547_v16 = vpop.f32.mrf.mxu3 }
  0xbf   : > { %v652_v51 = vmax.f32 %v616_v50, 0.0 }
  0xc0   : > { %v622_v52 = vpop.f32.mrf.mxu2  ;;  %v519_v53 = vpop.f32.mrf.mxu0 }
  0xc1   : > { %v668_v54 = vpack.c.bf16 %v652_v51, %v652_v51  ;;  %v520_v55 = vadd.f32 %v1171_v28, %v519_v53  ;;  %v568_v56 = vpop.f32.mrf.mxu1 }
  0xc3   : > { %685 = vst.msk [vmem:[%s1178_s8 + $0x8] sm:$0xf] %vm682_vm1, %v668_v54  ;;  %v569_v57 = vadd.f32 %v568_v56, %v520_v55 }
  0xc5   : > { %v618_v59 = vadd.f32 %v617_v36, %v569_v57 }
  0xc6   : > { %v549_v29 = vpop.f32.mrf.mxu3 }
  0xc7   : > { %v653_v60 = vmax.f32 %v618_v59, 0.0 }
  0xc8   : > { %v625_v61 = vpop.f32.mrf.mxu2  ;;  %v522_v62 = vpop.f32.mrf.mxu0 }
  0xc9   : > { %v669_v63 = vpack.c.bf16 %v653_v60, %v653_v60  ;;  %v523_v0 = vadd.f32 %v1171_v28, %v522_v62  ;;  %v571_v1 = vpop.f32.mrf.mxu1  ;;  %v545_v60 = vadd.f32 %v1171_v28, %v544_v4 }
  0xcb   : > { %686 = vst.msk [vmem:[%s1178_s8 + $0xc] sm:$0xf] %vm682_vm1, %v669_v63  ;;  %v572_v2 = vadd.f32 %v571_v1, %v523_v0 }
  0xcd   : > { %v621_v3 = vadd.f32 %v620_v44, %v572_v2 }
  0xce   : > { %v591_v39 = vpop.f32.mrf.mxu3 }
  0xcf   : > { %v654_v5 = vmax.f32 %v621_v3, 0.0  ;;  %v592_v50 = vadd.f32 %v591_v39, %v543_v47 }
  0xd0   : > { %v627_v6 = vpop.f32.mrf.mxu2  ;;  %v524_v7 = vpop.f32.mrf.mxu0 }
  0xd1   : > { %v670_v8 = vpack.c.bf16 %v654_v5, %v654_v5  ;;  %v525_v9 = vadd.f32 %v1171_v28, %v524_v7  ;;  %v573_v10 = vpop.f32.mrf.mxu1 }
  0xd3   : > { %687 = vst.msk [vmem:[%s1178_s8 + $0x10] sm:$0xf] %vm682_vm1, %v670_v8  ;;  %v574_v11 = vadd.f32 %v573_v10, %v525_v9  ;;  %v548_v9 = vadd.f32 %v1171_v28, %v547_v16 }
  0xd5   : > { %v623_v12 = vadd.f32 %v622_v52, %v574_v11 }
  0xd6   : > { %v593_v51 = vpop.f32.mrf.mxu3 }
  0xd7   : > { %v655_v13 = vmax.f32 %v623_v12, 0.0  ;;  %v594_v0 = vadd.f32 %v593_v51, %v545_v60 }
  0xd8   : > { %v630_v14 = vpop.f32.mrf.mxu2  ;;  %v527_v15 = vpop.f32.mrf.mxu0 }
  0xd9   : > { %v671_v17 = vpack.c.bf16 %v655_v13, %v655_v13  ;;  %v528_v18 = vadd.f32 %v1171_v28, %v527_v15  ;;  %v576_v19 = vpop.f32.mrf.mxu1 }
  0xdb   : > { %688 = vst.msk [vmem:[%s1178_s8 + $0x14] sm:$0xf] %vm682_vm1, %v671_v17  ;;  %v577_v20 = vadd.f32 %v576_v19, %v528_v18 }
  0xdd   : > { %v626_v21 = vadd.f32 %v625_v61, %v577_v20  ;;  %v550_v20 = vadd.f32 %v1171_v28, %v549_v29 }
  0xde   : > { %v596_v8 = vpop.f32.mrf.mxu3 }
  0xdf   : > { %v656_v22 = vmax.f32 %v626_v21, 0.0 }
  0xe0   : > { %v632_v23 = vpop.f32.mrf.mxu2  ;;  %v529_v24 = vpop.f32.mrf.mxu0 }
  0xe1   : > { %v672_v25 = vpack.c.bf16 %v656_v22, %v656_v22  ;;  %v530_v26 = vadd.f32 %v1171_v28, %v529_v24  ;;  %v578_v27 = vpop.f32.mrf.mxu1 }
  0xe3   : > { %689 = vst.msk [vmem:[%s1178_s8 + $0x18] sm:$0xf] %vm682_vm1, %v672_v25  ;;  %v579_v30 = vadd.f32 %v578_v27, %v530_v26 }
  0xe5   : > { %v628_v31 = vadd.f32 %v627_v6, %v579_v30 }
  0xe6   : > { %v598_v21 = vpop.f32.mrf.mxu3 }
  0xe7   : > { %v657_v32 = vmax.f32 %v628_v31, 0.0 }
  0xe8   : > { %v635_v33 = vpop.f32.mrf.mxu2  ;;  %v532_v34 = vpop.f32.mrf.mxu0 }
  0xe9   : > { %v673_v35 = vpack.c.bf16 %v657_v32, %v657_v32  ;;  %v533_v36 = vadd.f32 %v1171_v28, %v532_v34  ;;  %v581_v37 = vpop.f32.mrf.mxu1 }
  0xeb   : > { %690 = vst.msk [vmem:[%s1178_s8 + $0x1c] sm:$0xf] %vm682_vm1, %v673_v35  ;;  %v582_v38 = vadd.f32 %v581_v37, %v533_v36 }
  0xed   : > { %v631_v40 = vadd.f32 %v630_v14, %v582_v38  ;;  %v597_v14 = vadd.f32 %v596_v8, %v548_v9 }
  0xef   : > { %v658_v41 = vmax.f32 %v631_v40, 0.0 }
  0xf0   : > { %v637_v42 = vpop.f32.mrf.mxu2  ;;  %v534_v43 = vpop.f32.mrf.mxu0 }
  0xf1   : > { %v674_v44 = vpack.c.bf16 %v658_v41, %v658_v41  ;;  %v535_v45 = vadd.f32 %v1171_v28, %v534_v43  ;;  %v583_v46 = vpop.f32.mrf.mxu1 }
  0xf3   : > { %691 = vst.msk [vmem:[%s1178_s8 + $0x20] sm:$0xf] %vm682_vm1, %v674_v44  ;;  %v584_v48 = vadd.f32 %v583_v46, %v535_v45 }
  0xf5   : > { %v633_v49 = vadd.f32 %v632_v23, %v584_v48  ;;  %v599_v23 = vadd.f32 %v598_v21, %v550_v20 }
  0xf7   : > { %v659_v52 = vmax.f32 %v633_v49, 0.0 }
  0xf8   : > { %v640_v53 = vpop.f32.mrf.mxu2  ;;  %v537_v54 = vpop.f32.mrf.mxu0 }
  0xf9   : > { %v675_v55 = vpack.c.bf16 %v659_v52, %v659_v52  ;;  %v641_v56 = vadd.f32 %v640_v53, %v592_v50  ;;  %v538_v57 = vadd.f32 %v1171_v28, %v537_v54  ;;  %v586_v59 = vpop.f32.mrf.mxu1 }
  0xfb   : > { %692 = vst.msk [vmem:[%s1178_s8 + $0x24] sm:$0xf] %vm682_vm1, %v675_v55  ;;  %v662_v58 = vmax.f32 %v641_v56, 0.0  ;;  %v587_v61 = vadd.f32 %v586_v59, %v538_v57 }
  0xfd   : > { %v678_v62 = vpack.c.bf16 %v662_v58, %v662_v58  ;;  %v636_v63 = vadd.f32 %v635_v33, %v587_v61 }
  0xff   : > { %695 = vst.msk [vmem:[%s1178_s8 + $0x30] sm:$0xf] %vm682_vm1, %v678_v62  ;;  %v660_v1 = vmax.f32 %v636_v63, 0.0 }
 0x100   : > { %v642_v2 = vpop.f32.mrf.mxu2  ;;  %v539_v3 = vpop.f32.mrf.mxu0 }
 0x101   : > { %v676_v5 = vpack.c.bf16 %v660_v1, %v660_v1  ;;  %v643_v6 = vadd.f32 %v642_v2, %v594_v0  ;;  %v540_v7 = vadd.f32 %v1171_v28, %v539_v3  ;;  %v588_v4 = vpop.f32.mrf.mxu1 }
 0x103   : > { %693 = vst.msk [vmem:[%s1178_s8 + $0x28] sm:$0xf] %vm682_vm1, %v676_v5  ;;  %v663_v10 = vmax.f32 %v643_v6, 0.0  ;;  %v589_v11 = vadd.f32 %v588_v4, %v540_v7 }
 0x105   : > { %v679_v12 = vpack.c.bf16 %v663_v10, %v663_v10  ;;  %v638_v13 = vadd.f32 %v637_v42, %v589_v11 }
 0x107   : > { %696 = vst.msk [vmem:[%s1178_s8 + $0x34] sm:$0xf] %vm682_vm1, %v679_v12  ;;  %v661_v15 = vmax.f32 %v638_v13, 0.0 }
 0x108   : > { %v645_v17 = vpop.f32.mrf.mxu2 }
 0x109   : > { %v677_v18 = vpack.c.bf16 %v661_v15, %v661_v15  ;;  %v646_v19 = vadd.f32 %v645_v17, %v597_v14 }
 0x10b   : > { %694 = vst.msk [vmem:[%s1178_s8 + $0x2c] sm:$0xf] %vm682_vm1, %v677_v18  ;;  %v664_v16 = vmax.f32 %v646_v19, 0.0 }
 0x10d   : > { %v680_v22 = vpack.c.bf16 %v664_v16, %v664_v16 }
 0x10f   : > { %697 = vst.msk [vmem:[%s1178_s8 + $0x38] sm:$0xf] %vm682_vm1, %v680_v22 }
 0x110   : > { %v647_v24 = vpop.f32.mrf.mxu2 }
 0x111   : > { %v648_v25 = vadd.f32 %v647_v24, %v599_v23 }
 0x113   : > { %v665_v26 = vmax.f32 %v648_v25, 0.0 }
 0x115   : > { %v681_v27 = vpack.c.bf16 %v665_v26, %v665_v26 }
 0x117   : > { %698 = vst.msk [vmem:[%s1178_s8 + $0x3c] sm:$0xf] %vm682_vm1, %v681_v27 }
 0x118 PF: > { %s13_s12 = sadd.s32 1, %s1016_s12  }
 0x119   : > { %p10_p4 = scmp.ge.s32.totalorder %s13_s12, 4  }
 0x11b   :  { %12 = sbr.rel (!%p10_p4) target bundleno = 1 (0x1), region = 62 }

// kernel: inception_stem.8
= control target key start
LH: loop header
LB: loop body
LE: loop exit
PB: predicated region body
PF: predicated region fallthrough
CT: control target
= control target key end

     0   :  { %s1514_s21 = smov 0   ;;  %s1801_s0 = inlined_call_operand.vmem [shape: bf16[64,576], index: 0, kind: input, shape index: {}]   ;;  %s1802_s1 = inlined_call_operand.vmem [shape: bf16[576,96], index: 1, kind: input, shape index: {}]   ;;  %s1803_s2 = inlined_call_operand.vmem [shape: f32[1,96], index: 2, kind: input, shape index: {}]   ;;  %s1804_s3 = inlined_call_operand.vmem [shape: bf16[64,128], index: 3, kind: input, shape index: {}]   ;;  %s1805_s4 = inlined_call_operand.vmem [shape: bf16[96,128], index: 4, kind: input, shape index: {}]   ;;  %s1806_s5 = inlined_call_operand.vmem [shape: f32[1,128], index: 5, kind: input, shape index: {}]   ;;  %s1807_s6 = inlined_call_operand.vmem [shape: bf16[64,128], index: 6, kind: output, shape index: {}]  }
   0x1 LB: > { %s1126_s22 = sadd.s32 4294967295, %s1476_s21   ;;  %p1130_p0 = scmp.ge.s32.totalorder %s1476_s21, 1  ;;  %s1476_s21 = sphi %s1514_s21, %s16_s21  }
   0x2   : > { %p214_p1 = scmp.lt.s32.totalorder %s1476_s21, 3 }
   0x4   : > { %p215_p2 = pnand %p1130_p0, %p214_p1 }
   0x5   : > { %s1131_s29 = sshll.u32 (!%p215_p2), %s1126_s22, 2  ;;  %s1478_s23 = smov (!%p215_p2), 64  }
   0x6   : > { %218 = sbr.rel (%p215_p2) target bundleno = 374 (0x176), region = 44  ;;  %p246_p3 = scmp.lt.s32.totalorder (!%p215_p2), %s1131_s29, 7 }
   0xb   : > { %v1384_v0 = vld [vmem:[%s1802_s1 + $0x38] sm:$0xff]  ;;  %v1383_v4 = vld [vmem:[%s1802_s1 + $0x30] sm:$0xff]  ;;  %s1809_s29 = smov (!%p246_p3, %s1131_s29), 7  ;;  %v1382_v8 = vld [vmem:[%s1802_s1 + $0x28] sm:$0xff]  ;;  %vm613_vm0 = vcmask 523264   ;;  %vm975_vm1 = vcmask 785408  }
   0xc   : > { %v1400_v1 = vld [vmem:[%s1802_s1 + $0xb8] sm:$0xff]  ;;  %620 = vmatpush.bf16.msra.mxu0 %v1384_v0  ;;  %v1399_v5 = vld [vmem:[%s1802_s1 + $0xb0] sm:$0xff]  ;;  %v1398_v9 = vld [vmem:[%s1802_s1 + $0xa8] sm:$0xff]  ;;  %s1438_s25 = smul.u32 20, %s1809_s29  ;;  %s1134_s14 = sshll.u32 %s1809_s29, 2 }
   0xd   : > { %v1408_v2 = vld [vmem:[%s1802_s1 + $0xf8] sm:$0xff]  ;;  %658 = vmatpush.bf16.msra.mxu2 %v1400_v1  ;;  %v1407_v6 = vld [vmem:[%s1802_s1 + $0xf0] sm:$0xff]  ;;  %v1406_v10 = vld [vmem:[%s1802_s1 + $0xe8] sm:$0xff]  ;;  %s256_s18 = scalar_lea.vmem %s1807_s6, %s1134_s14 }
   0xe   : > { %v1392_v3 = vld [vmem:[%s1802_s1 + $0x78] sm:$0xff]  ;;  %677 = vmatpush.bf16.msra.mxu3 %v1408_v2  ;;  %v1391_v7 = vld [vmem:[%s1802_s1 + $0x70] sm:$0xff]  ;;  %v1390_v11 = vld [vmem:[%s1802_s1 + $0x68] sm:$0xff]  ;;  %s1579_s15 = scalar_lea.vmem %s1801_s0, %s1438_s25 }
   0xf   : > { %639 = vmatpush.bf16.msra.mxu1 %v1392_v3  ;;  %v1381_v12 = vld [vmem:[%s1802_s1 + $0x20] sm:$0xff]  ;;  %v1380_v16 = vld [vmem:[%s1802_s1 + $0x18] sm:$0xff]  ;;  %v1379_v24 = vld [vmem:[%s1802_s1 + $0x10] sm:$0xff] }
  0x10   : > { %621 = vmatpush.bf16.msra.mxu0 %v1383_v4  ;;  %v1397_v13 = vld [vmem:[%s1802_s1 + $0xa0] sm:$0xff]  ;;  %v1396_v17 = vld [vmem:[%s1802_s1 + $0x98] sm:$0xff]  ;;  %v1395_v26 = vld [vmem:[%s1802_s1 + $0x90] sm:$0xff] }
  0x11   : > { %659 = vmatpush.bf16.msra.mxu2 %v1399_v5  ;;  %v1405_v14 = vld [vmem:[%s1802_s1 + $0xe0] sm:$0xff]  ;;  %v1588_v19 = vld [vmem:[%s1579_s15 + $0x14] sm:$0xff]  ;;  %v1611_v27 = vld [vmem:[%s1579_s15 + $0x8] sm:$0xff] }
  0x12   : > { %678 = vmatpush.bf16.msra.mxu3 %v1407_v6  ;;  %v1389_v15 = vld [vmem:[%s1802_s1 + $0x60] sm:$0xff]  ;;  %v1404_v20 = vld [vmem:[%s1802_s1 + $0xd8] sm:$0xff]  ;;  %v720_v23 = vunpack.c.l.bf16 %v1588_v19  ;;  %777 = vrot.lane.b32.xlu1 %v1588_v19, %s1478_s23  ;;  %v1403_v29 = vld [vmem:[%s1802_s1 + $0xd0] sm:$0xff]  ;;  %v807_v31 = vunpack.c.l.bf16 %v1611_v27 }
  0x13   : > { %640 = vmatpush.bf16.msra.mxu1 %v1391_v7  ;;  %v1585_v18 = vld [vmem:[%s1579_s15] sm:$0xff]  ;;  %v1388_v21 = vld [vmem:[%s1802_s1 + $0x58] sm:$0xff]  ;;  %v1387_v30 = vld [vmem:[%s1802_s1 + $0x50] sm:$0xff]  ;;  %875 = vrot.lane.b32.xlu2 %v1611_v27, %s1478_s23 }
  0x14   : > { %622 = vmatpush.bf16.msra.mxu0 %v1382_v8  ;;  %v719_v22 = vunpack.c.l.bf16 %v1585_v18  ;;  %v1614_v28 = vld [vmem:[%s1579_s15 + $0x1c] sm:$0xff]  ;;  %v1378_v34 = vld [vmem:[%s1802_s1 + $0x8] sm:$0xff]  ;;  %v1369_v43 = vld [vmem:[%s1579_s15 + $0x10] sm:$0xf0] }
  0x15   : > { %660 = vmatpush.bf16.msra.mxu2 %v1398_v9  ;;  %v808_v32 = vunpack.c.l.bf16 %v1614_v28  ;;  %v1394_v35 = vld [vmem:[%s1802_s1 + $0x88] sm:$0xff]  ;;  %v1377_v38 = vld [vmem:[%s1802_s1] sm:$0xff]  ;;  %v1370_v45 = vld [vmem:[%s1579_s15 + $0x18] sm:$0xf0] }
  0x16   : > { %679 = vmatpush.bf16.msra.mxu3 %v1406_v10  ;;  %v1448_v25 = vpack.i.bf16 %v720_v23, %v719_v22  ;;  %v1402_v36 = vld [vmem:[%s1802_s1 + $0xc8] sm:$0xff]  ;;  %v1393_v39 = vld [vmem:[%s1802_s1 + $0x80] sm:$0xff]  ;;  %v1139_v49 = vld [vmem:[%s1579_s15 + $0x14] sm:$0xf0] }
  0x17   : > { %641 = vmatpush.bf16.msra.mxu1 %v1390_v11  ;;  %v1453_v33 = vpack.i.bf16 %v808_v32, %v807_v31  ;;  %v1386_v37 = vld [vmem:[%s1802_s1 + $0x48] sm:$0xff]  ;;  %v1401_v40 = vld [vmem:[%s1802_s1 + $0xc0] sm:$0xff]  ;;  %v1412_v50 = vld [vmem:[%s1802_s1 + $0x118] sm:$0xff] }
  0x18   : > { %623 = vmatpush.bf16.msra.mxu0 %v1381_v12  ;;  %1449 = vrot.lane.b32.xlu0 %v1448_v25, %s1478_s23  ;;  %v1385_v41 = vld [vmem:[%s1802_s1 + $0x40] sm:$0xff]  ;;  %v1145_v44 = vld [vmem:[%s1579_s15 + $0x8] sm:$0xf]  ;;  %v1368_v46 = vld [vmem:[%s1579_s15 + $0xc] sm:$0xf] }
  0x19   : > { %661 = vmatpush.bf16.msra.mxu2 %v1397_v13  ;;  %v1137_v42 = vld [vmem:[%s1579_s15] sm:$0xf]  ;;  %v1367_v48 = vld [vmem:[%s1579_s15 + $0x4] sm:$0xf]  ;;  %v1146_v52 = vor.u32 %v1370_v45, %v1145_v44  ;;  %v1411_v55 = vld [vmem:[%s1802_s1 + $0x110] sm:$0xff] }
  0x1a   : > { %680 = vmatpush.bf16.msra.mxu3 %v1405_v14  ;;  %1454 = vrot.lane.b32.xlu1 %v1453_v33, %s1478_s23  ;;  %v1147_v47 = vld [vmem:[%s1579_s15 + $0x1c] sm:$0xf0]  ;;  %v1138_v51 = vor.u32 %v1369_v43, %v1137_v42  ;;  %v1142_v54 = vor.u32 %v1367_v48, %v1139_v49  ;;  %v1675_v56 = vld [vmem:[%s1579_s15 + $0x28] sm:$0xff]  ;;  %v1688_v61 = vld [vmem:[%s1579_s15 + $0x30] sm:$0xff] }
  0x1b   : > { %642 = vmatpush.bf16.msra.mxu1 %v1389_v15  ;;  %877 = vrot.lane.b32.xlu2 %v1614_v28, %s1478_s23  ;;  %v1150_v53 = vor.u32 %v1368_v46, %v1147_v47  ;;  %v1678_v57 = vld [vmem:[%s1579_s15 + $0x3c] sm:$0xff]  ;;  %v721_v58 = vunpack.c.l.bf16 %v1675_v56  ;;  %v1410_v60 = vld [vmem:[%s1802_s1 + $0x108] sm:$0xff]  ;;  %v809_v0 = vunpack.c.l.bf16 %v1688_v61  ;;  %v1165_v5 = vld [vmem:[%s1579_s15 + $0x30] sm:$0xf]  ;;  %v852_v47 = vrot.slane %v1614_v28, 4 }
  0x1c   : > { %624 = vmatpush.bf16.msra.mxu0 %v1380_v16  ;;  %v722_v59 = vunpack.c.l.bf16 %v1678_v57  ;;  %v1691_v62 = vld [vmem:[%s1579_s15 + $0x44] sm:$0xff]  ;;  %v1374_v4 = vld [vmem:[%s1579_s15 + $0x38] sm:$0xf0]  ;;  %v1373_v7 = vld [vmem:[%s1579_s15 + $0x34] sm:$0xf] }
  0x1d   : > { %662 = vmatpush.bf16.msra.mxu2 %v1396_v17  ;;  %v810_v1 = vunpack.c.l.bf16 %v1691_v62  ;;  %v1409_v2 = vld [vmem:[%s1802_s1 + $0x100] sm:$0xff]  ;;  %v1157_v3 = vld [vmem:[%s1579_s15 + $0x28] sm:$0xf]  ;;  %v1372_v9 = vld [vmem:[%s1579_s15 + $0x2c] sm:$0xf] }
  0x1e   : > { %681 = vmatpush.bf16.msra.mxu3 %v1404_v20  ;;  %v1458_v63 = vpack.i.bf16 %v722_v59, %v721_v58  ;;  %v1375_v6 = vld [vmem:[%s1579_s15 + $0x40] sm:$0xf0]  ;;  %v1167_v8 = vld [vmem:[%s1579_s15 + $0x44] sm:$0xf0]  ;;  %v1159_v10 = vld [vmem:[%s1579_s15 + $0x3c] sm:$0xf0]  ;;  %v1158_v12 = vor.u32 %v1374_v4, %v1157_v3 }
  0x1f   : > { %643 = vmatpush.bf16.msra.mxu1 %v1388_v21  ;;  %v1463_v11 = vpack.i.bf16 %v810_v1, %v809_v0  ;;  %v1166_v13 = vor.u32 %v1375_v6, %v1165_v5  ;;  %v1170_v14 = vor.u32 %v1373_v7, %v1167_v8  ;;  %v1162_v15 = vor.u32 %v1372_v9, %v1159_v10  ;;  %v1153_v16 = vld [vmem:[%s1579_s15 + $0x10] sm:$0xf]  ;;  %v1371_v17 = vld [vmem:[%s1579_s15 + $0x20] sm:$0xf0]  ;;  %v1173_v20 = vld [vmem:[%s1579_s15 + $0x38] sm:$0xf] }
  0x20   : > { %625 = vmatpush.bf16.msra.mxu0 %v1379_v24  ;;  %775 = vrot.lane.b32.xlu0 %v1585_v18, %s1478_s23  ;;  %v1376_v21 = vld [vmem:[%s1579_s15 + $0x48] sm:$0xf0]  ;;  %v1154_v24 = vor.u32 %v1371_v17, %v1153_v16  ;;  %v1415_v46 = vld [vmem:[%s1804_s3 + $0x10] sm:$0xff]  ;;  %v1421_v28 = vld [vmem:[%s1805_s4 + $0x20] sm:$0xff] }
  0x21   : > { %663 = vmatpush.bf16.msra.mxu2 %v1395_v26  ;;  %v1174_v25 = vor.u32 %v1376_v21, %v1173_v20  ;;  %v1413_v6 = vld [vmem:[%s1804_s3] sm:$0xff]  ;;  %v261_v10 = vld [vmem:[%s1579_s15 + $0x10] sm:$0xf]  ;;  %v1420_v17 = vld [vmem:[%s1805_s4 + $0x18] sm:$0xff] }
  0x22   : > { %682 = vmatpush.bf16.msra.mxu3 %v1403_v29  ;;  %779 = vrot.lane.b32.xlu1 %v1675_v56, %s1478_s23  ;;  %v752_v29 = vrot.slane %v1588_v19, 4  ;;  %v264_v7 = vld [vmem:[%s1579_s15 + $0x24] sm:$0xf]  ;;  %v907_v16 = vunpack.c.l.bf16 %v261_v10 }
  0x23   : > { %644 = vmatpush.bf16.msra.mxu1 %v1387_v30  ;;  %781 = vrot.lane.b32.xlu2 %v1678_v57, %s1478_s23 }
  0x24   : > { %626 = vmatpush.bf16.msra.mxu0 %v1378_v34 }
  0x25   : > { %664 = vmatpush.bf16.msra.mxu2 %v1394_v35  ;;  %v751_v35 = vrot.slane %v1585_v18, 4 }
  0x26   : > { %683 = vmatpush.bf16.msra.mxu3 %v1402_v36 }
  0x27   : > { %645 = vmatpush.bf16.msra.mxu1 %v1386_v37  ;;  %v759_v43 = vunpack.c.l.bf16 %v751_v35 }
  0x28   : > { %627 = vmatpush.bf16.msra.mxu0 %v1377_v38  ;;  %1459 = vrot.lane.b32.xlu0 %v1458_v63, %s1478_s23  ;;  %v760_v38 = vunpack.c.l.bf16 %v752_v29  ;;  %v754_v29 = vrot.slane %v1678_v57, 4  ;;  %v1418_v57 = vld [vmem:[%s1805_s4 + $0x8] sm:$0xff] }
  0x29   : > { %665 = vmatpush.bf16.msra.mxu2 %v1393_v39  ;;  %v1416_v39 = vld [vmem:[%s1804_s3 + $0x18] sm:$0xff] }
  0x2a   : > { %684 = vmatpush.bf16.msra.mxu3 %v1401_v40  ;;  %879 = vrot.lane.b32.xlu1 %v1688_v61, %s1478_s23 }
  0x2b   : > { %646 = vmatpush.bf16.msra.mxu1 %v1385_v41  ;;  %628 = vmatmul.bf16.vlgmr.msra.gmra.mxu0 %v1138_v51 }
  0x2c   : > { %700 = vmatpush.bf16.msrb.mxu0 %v1412_v50  ;;  %666 = vmatmul.bf16.vlgmr.msra.gmra.mxu2 %v1146_v52 }
  0x2d   : > { %685 = vmatmul.bf16.vlgmr.msra.gmra.mxu3 %v1150_v53  ;;  %881 = vrot.lane.b32.xlu2 %v1691_v62, %s1478_s23  ;;  %v1422_v53 = vld [vmem:[%s1805_s4 + $0x28] sm:$0xff] }
  0x2e   : > { %1434 = vmatpush.bf16.msrb.mxu3 %v1412_v50  ;;  %647 = vmatmul.bf16.vlgmr.msra.gmra.mxu1 %v1142_v54  ;;  %v1414_v54 = vld [vmem:[%s1804_s3 + $0x8] sm:$0xff] }
  0x2f   : > { %1035 = vmatpush.bf16.msrb.mxu2 %v1416_v39  ;;  %984 = vmatpush.bf16.msrb.mxu1 %v1422_v53 }
  0x30   : > { %701 = vmatpush.bf16.msrb.mxu0 %v1411_v55  ;;  %1464 = vrot.lane.b32.xlu0 %v1463_v11, %s1478_s23 }
  0x32   : > { %1435 = vmatpush.bf16.msrb.mxu3 %v1411_v55 }
  0x33   : > { %1036 = vmatpush.bf16.msrb.mxu2 %v1415_v46  ;;  %985 = vmatpush.bf16.msrb.mxu1 %v1421_v28 }
  0x34   : > { %702 = vmatpush.bf16.msrb.mxu0 %v1410_v60 }
  0x36   : > { %1436 = vmatpush.bf16.msrb.mxu3 %v1410_v60  ;;  %v851_v60 = vrot.slane %v1611_v27, 4 }
  0x37   : > { %1037 = vmatpush.bf16.msrb.mxu2 %v1414_v54  ;;  %986 = vmatpush.bf16.msrb.mxu1 %v1420_v17 }
  0x38   : > { %703 = vmatpush.bf16.msrb.mxu0 %v1409_v2  ;;  %v859_v9 = vunpack.c.l.bf16 %v851_v60 }
  0x3a   : > { %1437 = vmatpush.bf16.msrb.mxu3 %v1409_v2 }
  0x3b   : > { %633 = vmatmul.bf16.gmra.mxu0 %v1158_v12  ;;  %1038 = vmatpush.bf16.msrb.mxu2 %v1413_v6 }
  0x3c   : > { %671 = vmatmul.bf16.gmra.mxu2 %v1166_v13  ;;  %v908_v13 = vunpack.c.l.bf16 %v264_v7 }
  0x3d   : > { %690 = vmatmul.bf16.gmra.mxu3 %v1170_v14 }
  0x3e   : > { %652 = vmatmul.bf16.gmra.mxu1 %v1162_v15 }
  0x4b   : > { %1319 = vmatmul.msk.bf16.vlgmr.msrb.gmra.mxu0 %vm613_vm0, %v1154_v24 }
  0x4d   : > { %1320 = vmatmul.msk.bf16.vlgmr.msrb.gmra.mxu3 %vm613_vm0, %v1174_v25 }
  0x6d   : > { %v876_v33 = vpop.permute.xlu2 %875 }
  0x75   : > { %v878_v50 = vpop.permute.xlu2 %877 }
  0x76   : > { %v884_v52 = vrot.slane %v878_v50, 4 }
  0x78   : > { %v892_v5 = vunpack.c.l.bf16 %v884_v52 }
  0x84   : > { %v778_v26 = vpop.permute.xlu1 %777 }
  0x85   : > { %v784_v30 = vrot.slane %v778_v26, 4 }
  0x87   : > { %v792_v41 = vunpack.c.l.bf16 %v784_v30  ;;  %v753_v30 = vrot.slane %v1675_v56, 4 }
  0x89   : > { %v761_v39 = vunpack.c.l.bf16 %v753_v30 }
  0x8a   : > { %v1450_v34 = vpop.permute.xlu0 %1449 }
  0x8b   : > { %v1452_v36 = vunpack.i.h.bf16 %v1450_v34  ;;  %v1451_v37 = vunpack.i.l.bf16 %v1450_v34  ;;  %v782_v34 = vpop.permute.xlu2 %781 }
  0x8c   : > { %v1455_v44 = vpop.permute.xlu1 %1454 }
  0x8d   : > { %v740_v40 = vmax.f32 %v720_v23, %v1452_v36  ;;  %v739_v42 = vmax.f32 %v719_v22, %v1451_v37  ;;  %v1457_v49 = vunpack.i.h.bf16 %v1455_v44  ;;  %v860_v22 = vunpack.c.l.bf16 %v852_v47 }
  0x8e   : > { %v1456_v3 = vunpack.i.l.bf16 %v1455_v44  ;;  %v762_v37 = vunpack.c.l.bf16 %v754_v29 }
  0x8f   : > { %v764_v45 = vmax.f32 %v740_v40, %v760_v38  ;;  %v763_v23 = vmax.f32 %v739_v42, %v759_v43  ;;  %v786_v38 = vrot.slane %v782_v34, 4 }
  0x91   : > { %v796_v48 = vmax.f32 %v764_v45, %v792_v41  ;;  %v794_v43 = vunpack.c.l.bf16 %v786_v38 }
  0x92   : > { %v776_v19 = vpop.permute.xlu0 %775 }
  0x93   : > { %v812_v51 = vmax.f32 %v796_v48, %v808_v32  ;;  %v783_v18 = vrot.slane %v776_v19, 4  ;;  %v883_v32 = vrot.slane %v876_v33, 4  ;;  %v854_v19 = vrot.slane %v1691_v62, 4 }
  0x94   : > { %v780_v35 = vpop.permute.xlu1 %779 }
  0x95   : > { %v791_v55 = vunpack.c.l.bf16 %v783_v18  ;;  %v840_v63 = vmax.f32 %v812_v51, %v1457_v49  ;;  %v891_v11 = vunpack.c.l.bf16 %v883_v32  ;;  %v785_v40 = vrot.slane %v780_v35, 4  ;;  %v882_v18 = vpop.permute.xlu2 %881 }
  0x96   : > { %v862_v54 = vunpack.c.l.bf16 %v854_v19 }
  0x97   : > { %v795_v2 = vmax.f32 %v763_v23, %v791_v55  ;;  %v864_v4 = vmax.f32 %v840_v63, %v860_v22  ;;  %v793_v44 = vunpack.c.l.bf16 %v785_v40  ;;  %v853_v23 = vrot.slane %v1688_v61, 4  ;;  %v1417_v61 = vld [vmem:[%s1805_s4] sm:$0xff] }
  0x98   : > { %v886_v55 = vrot.slane %v882_v18, 4 }
  0x99   : > { %v811_v8 = vmax.f32 %v795_v2, %v807_v31  ;;  %v896_v14 = vmax.f32 %v864_v4, %v892_v5  ;;  %v861_v63 = vunpack.c.l.bf16 %v853_v23 }
  0x9a   : > { %v1460_v20 = vpop.permute.xlu0 %1459  ;;  %v894_v2 = vunpack.c.l.bf16 %v886_v55 }
  0x9b   : > { %v839_v12 = vmax.f32 %v811_v8, %v1456_v3  ;;  %v1462_v21 = vunpack.i.h.bf16 %v1460_v20  ;;  %v1461_v24 = vunpack.i.l.bf16 %v1460_v20  ;;  %v912_v27 = vmax.f32 %v896_v14, %v908_v13 }
  0x9c   : > { %v880_v60 = vpop.permute.xlu1 %879 }
  0x9d   : > { %v863_v15 = vmax.f32 %v839_v12, %v859_v9  ;;  %v742_v31 = vmax.f32 %v722_v59, %v1462_v21  ;;  %v741_v26 = vmax.f32 %v721_v58, %v1461_v24  ;;  %v1419_v59 = vld [vmem:[%s1805_s4 + $0x10] sm:$0xff]  ;;  %v885_v28 = vrot.slane %v880_v60, 4  ;;  %v1469_v60 = vld [vmem:[%s1806_s5] ss:$0 sm:$0xff] }
  0x9e   : > { %987 = vmatpush.bf16.msrb.mxu1 %v1419_v59 }
  0x9f   : > { %v895_v25 = vmax.f32 %v863_v15, %v891_v11  ;;  %v766_v42 = vmax.f32 %v742_v31, %v762_v37  ;;  %v765_v58 = vmax.f32 %v741_v26, %v761_v39  ;;  %v893_v7 = vunpack.c.l.bf16 %v885_v28 }
  0xa1   : > { %v911_v33 = vmax.f32 %v895_v25, %v907_v16  ;;  %v798_v45 = vmax.f32 %v766_v42, %v794_v43  ;;  %v797_v46 = vmax.f32 %v765_v58, %v793_v44  ;;  %v1468_v16 = vld [vmem:[%s1803_s2] ss:$0 sm:$0xff] }
  0xa2   : > { %v1465_v56 = vpop.permute.xlu0 %1464  ;;  %988 = vmatpush.bf16.msrb.mxu1 %v1418_v57 }
  0xa3   : > { %v915_v41 = vpack.c.bf16 %v912_v27, %v911_v33  ;;  %v1467_v47 = vunpack.i.h.bf16 %v1465_v56  ;;  %v1466_v48 = vunpack.i.l.bf16 %v1465_v56  ;;  %v813_v49 = vmax.f32 %v797_v46, %v809_v0  ;;  %v270_v0 = vld [vmem:[%s1579_s15 + $0x4c] sm:$0xf] }
  0xa4   : > { %v814_v50 = vmax.f32 %v798_v45, %v810_v1  ;;  %v267_v1 = vld [vmem:[%s1579_s15 + $0x38] sm:$0xf]  ;;  %v910_v3 = vunpack.c.l.bf16 %v270_v0 }
  0xa5   : > { %1363 = vmatmul.msk.bf16.vlgmr.msrb.gmra.mxu2 %vm613_vm0, %v915_v41  ;;  %v841_v52 = vmax.f32 %v813_v49, %v1466_v48  ;;  %v909_v6 = vunpack.c.l.bf16 %v267_v1 }
  0xa6   : > { %v842_v53 = vmax.f32 %v814_v50, %v1467_v47  ;;  %989 = vmatpush.bf16.msrb.mxu1 %v1417_v61 }
  0xa7   : > { %v865_v62 = vmax.f32 %v841_v52, %v861_v63 }
  0xa8   : > { %v629_v36 = vpop.f32.mrf.mxu0  ;;  %v866_v32 = vmax.f32 %v842_v53, %v862_v54 }
  0xa9   : > { %v897_v10 = vmax.f32 %v865_v62, %v893_v7  ;;  %v630_v24 = vadd.f32 %v1468_v16, %v629_v36 }
  0xaa   : > { %v898_v5 = vmax.f32 %v866_v32, %v894_v2 }
  0xab   : > { %v648_v4 = vpop.f32.mrf.mxu1  ;;  %v913_v13 = vmax.f32 %v897_v10, %v909_v6 }
  0xac   : > { %v914_v9 = vmax.f32 %v898_v5, %v910_v3  ;;  %v649_v27 = vadd.f32 %v648_v4, %v630_v24 }
  0xae   : > { %v916_v14 = vpack.c.bf16 %v914_v9, %v913_v13 }
  0xaf   : > { %v667_v8 = vpop.f32.mrf.mxu2 }
  0xb0   : > { %v686_v51 = vpop.f32.mrf.mxu3  ;;  %v631_v22 = vpop.f32.mrf.mxu0  ;;  %v668_v30 = vadd.f32 %v667_v8, %v649_v27 }
  0xb1   : > { %v632_v25 = vadd.f32 %v1468_v16, %v631_v22 }
  0xb2   : > { %v687_v37 = vadd.f32 %v686_v51, %v668_v30 }
  0xb3   : > { %v650_v15 = vpop.f32.mrf.mxu1 }
  0xb4   : > { %v651_v33 = vadd.f32 %v650_v15, %v632_v25 }
  0xb5   : > { %1364 = vmatmul.msk.bf16.gmra.mxu2 %vm613_vm0, %v916_v14 }
  0xb7   : > { %v669_v20 = vpop.f32.mrf.mxu2 }
  0xb8   : > { %v688_v11 = vpop.f32.mrf.mxu3  ;;  %v634_v12 = vpop.f32.mrf.mxu0  ;;  %v670_v35 = vadd.f32 %v669_v20, %v651_v33 }
  0xb9   : > { %v635_v58 = vadd.f32 %v1468_v16, %v634_v12 }
  0xba   : > { %v689_v38 = vadd.f32 %v688_v11, %v670_v35 }
  0xbb   : > { %v653_v26 = vpop.f32.mrf.mxu1 }
  0xbc   : > { %v654_v46 = vadd.f32 %v653_v26, %v635_v58 }
  0xbf   : > { %v672_v34 = vpop.f32.mrf.mxu2 }
  0xc0   : > { %v691_v17 = vpop.f32.mrf.mxu3  ;;  %v636_v21 = vpop.f32.mrf.mxu0  ;;  %v673_v48 = vadd.f32 %v672_v34, %v654_v46 }
  0xc1   : > { %v637_v59 = vadd.f32 %v1468_v16, %v636_v21 }
  0xc2   : > { %v692_v19 = vadd.f32 %v691_v17, %v673_v48 }
  0xc3   : > { %v655_v43 = vpop.f32.mrf.mxu1 }
  0xc4   : > { %v656_v57 = vadd.f32 %v655_v43, %v637_v59 }
  0xc7   : > { %v674_v56 = vpop.f32.mrf.mxu2 }
  0xc8   : > { %v693_v31 = vpop.f32.mrf.mxu3  ;;  %v705_v29 = vpop.f32.mrf.mxu0  ;;  %v675_v47 = vadd.f32 %v674_v56, %v656_v57 }
  0xc9   : > { %v706_v39 = vadd.f32 %v705_v29, %v687_v37 }
  0xca   : > { %v694_v50 = vadd.f32 %v693_v31, %v675_v47 }
  0xcb   : > { %v715_v44 = vmax.f32 %v706_v39, 0.0 }
  0xd0   : > { %v710_v40 = vpop.f32.mrf.mxu3  ;;  %v707_v41 = vpop.f32.mrf.mxu0 }
  0xd1   : > { %v708_v42 = vadd.f32 %v707_v41, %v689_v38  ;;  %v711_v51 = vadd.f32 %v710_v40, %v692_v19 }
  0xd3   : > { %v716_v36 = vmax.f32 %v708_v42, 0.0  ;;  %v717_v22 = vmax.f32 %v711_v51, 0.0 }
  0xd5   : > { %v925_v45 = vpack.c.bf16 %v716_v36, %v715_v44 }
  0xd7   : > { %1345 = vmatmul.msk.bf16.vlgmr.msrb.gmra.mxu1 %vm975_vm1, %v925_v45 }
  0xd8   : > { %v712_v49 = vpop.f32.mrf.mxu3 }
  0xd9   : > { %v713_v23 = vadd.f32 %v712_v49, %v694_v50 }
  0xdb   : > { %v718_v18 = vmax.f32 %v713_v23, 0.0 }
  0xdd   : > { %v926_v52 = vpack.c.bf16 %v718_v18, %v717_v22 }
  0xe7   : > { %1346 = vmatmul.msk.bf16.gmra.mxu1 %vm975_vm1, %v926_v52 }
 0x128   : > { %v1040_v53 = vpop.f32.mrf.mxu2 }
 0x130   : > { %v1042_v63 = vpop.f32.mrf.mxu2 }
 0x138   : > { %v1045_v62 = vpop.f32.mrf.mxu2 }
 0x140   : > { %v1047_v6 = vpop.f32.mrf.mxu2 }
 0x154   : > { %v991_v54 = vpop.f32.mrf.mxu1 }
 0x155   : > { %v1041_v55 = vadd.f32 %v1040_v53, %v991_v54 }
 0x157   : > { %v1054_v0 = vadd.f32 %v1469_v60, %v1041_v55 }
 0x159   : > { %v1058_v1 = vmax.f32 %v1054_v0, 0.0 }
 0x15c   : > { %v993_v28 = vpop.f32.mrf.mxu1 }
 0x15d   : > { %v1043_v32 = vadd.f32 %v1042_v63, %v993_v28 }
 0x15f   : > { %v1055_v2 = vadd.f32 %v1469_v60, %v1043_v32 }
 0x161   : > { %v1059_v3 = vmax.f32 %v1055_v2, 0.0 }
 0x163   : > { %v1426_v61 = vpack.c.bf16 %v1059_v3, %v1058_v1 }
 0x164   : > { %v996_v4 = vpop.f32.mrf.mxu1 }
 0x165   : > { %1427 = vst [vmem:[%s256_s18] sm:$0xff] %v1426_v61   ;;  %v1046_v5 = vadd.f32 %v1045_v62, %v996_v4 }
 0x167   : > { %v1056_v8 = vadd.f32 %v1469_v60, %v1046_v5 }
 0x169   : > { %v1060_v11 = vmax.f32 %v1056_v8, 0.0 }
 0x16c   : > { %v998_v7 = vpop.f32.mrf.mxu1 }
 0x16d   : > { %v1048_v9 = vadd.f32 %v1047_v6, %v998_v7 }
 0x16f   : > { %v1057_v10 = vadd.f32 %v1469_v60, %v1048_v9 }
 0x171   : > { %v1061_v12 = vmax.f32 %v1057_v10, 0.0 }
 0x173   : > { %v1431_v13 = vpack.c.bf16 %v1061_v12, %v1060_v11 }
 0x175   : > { %1433 = vst [vmem:[%s256_s18 + $0x8] sm:$0xff] %v1431_v13  }
 0x176 PF: > { %s16_s21 = sadd.s32 1, %s1476_s21  }
 0x177   : > { %p13_p4 = scmp.ge.s32.totalorder %s16_s21, 4  }
 0x179   :  { %15 = sbr.rel (!%p13_p4) target bundleno = 1 (0x1), region = 74 }

// kernel: inception_stem.9
= control target key start
LH: loop header
LB: loop body
LE: loop exit
PB: predicated region body
PF: predicated region fallthrough
CT: control target
= control target key end

     0   :  { %10 = vsyncpa [#allocation3], 0  ;;  %s7920_s0 = inlined_call_operand.vmem [shape: bf16[2,16,1152], index: 0, kind: input, shape index: {}]   ;;  %s7921_s1 = inlined_call_operand.vmem [shape: bf16[1152,192], index: 1, kind: input, shape index: {}]   ;;  %s7922_s2 = inlined_call_operand.vmem [shape: f32[1,192], index: 2, kind: input, shape index: {}]   ;;  %s7923_s3 = inlined_call_operand.vmem [shape: bf16[1728,192], index: 3, kind: input, shape index: {}]   ;;  %s7924_s4 = inlined_call_operand.vmem [shape: f32[1,192], index: 4, kind: input, shape index: {}]   ;;  %s7925_s5 = inlined_call_operand.hbm [shape: f32[2,1,384], index: 5, kind: output, shape index: {}]  }
   0x1   :  { %12 = vsyncpa [#allocation3 + $0x1], 0  ;;  %s5412_s18 = smov 0   ;;  %s5414_s19 = smov 0  }
   0x2   :  { %s5416_s20 = smov 0   ;;  %s5418_s21 = smov 0  }
   0x3 LB: > { %s5433_s22 = sadd.s32 4294967295, %s5379_s21   ;;  %s3404_s23 = sadd.s32 4294967294, %s5379_s21   ;;  %s5379_s21 = sphi %s5418_s21, %s7933_s21   ;;  %s5375_s20 = sphi %s5416_s20, %s7932_s20   ;;  %s5371_s19 = sphi %s5414_s19, %s7931_s19   ;;  %s5367_s18 = sphi %s5412_s18, %s7930_s18  }
   0x4   : > { %s5437_s24 = sadd.s32 1, %s5379_s21   ;;  %s135_s25 = sadd.s32 1, %s5375_s20 }
   0x5   : > { %s132_s26 = ssub.s32 %s5379_s21, %s5437_s24  ;;  %p145_p0 = scmp.ne.s32.totalorder %s5375_s20, %s5371_s19 }
   0x6   : > { %p133_p1 = scmp.eq.s32.totalorder %s132_s26, 0  ;;  %p146_p2 = scmp.eq.s32.totalorder %s5433_s22, 1 }
   0x7   : > { %p151_p3 = scmp.ne.s32.totalorder %s5371_s19, %s5367_s18  ;;  %p152_p4 = scmp.eq.s32.totalorder %s3404_s23, 1 }
   0x8   : > { %s5448_s27 = scalar_select %p133_p1, %s5375_s20, %s135_s25  }
   0x9   : > { %p5450_p5 = por %p146_p2, %p145_p0  ;;  %p5454_p6 = por %p152_p4, %p151_p3 }
   0xa   : > { %p3407_p7 = scmp.ge.s32.totalorder %s5379_s21, 1  ;;  %p190_p8 = scmp.lt.s32.totalorder %s5379_s21, 3 }
   0xc   : > { %p191_p9 = pnand %p3407_p7, %p190_p8 }
   0xd   : > { %p218_p10 = scmp.lt.s32.totalorder (!%p191_p9), %s5433_s22, 1  ;;  %s5276_s25 = smul.u32 (!%p191_p9), 3, %s5433_s22 }
   0xe   : > { %194 = sbr.rel (%p191_p9) target bundleno = 774 (0x306), region = 40  ;;  %s5337_s17 = scalar_lea.hbm (!%p191_p9), %s7925_s5, 6 }
   0xf   : > { %s3340_s6 = scalar_lea.hbm (!%p191_p9), %s7925_s5, %s5276_s25 }
  0x10   : > { %s3344_s11 = sshll.u32 (!%p191_p9), %s3340_s6, 4  ;;  %s3345_s11 = int_to_ptr.hbm [resolvable:$true] %s3344_s11 }
  0x13   : > { %v3503_v0 = vld [vmem:[%s7921_s1 + $0x70] sm:$0xf]  ;;  %v4929_v1 = vld [vmem:[%s7921_s1 + $0x74] sm:$0xf0]  ;;  %v3495_v11 = vld [vmem:[%s7921_s1 + $0x60] sm:$0xf] }
  0x14   : > { %v3567_v2 = vld [vmem:[%s7921_s1 + $0xf0] sm:$0xf]  ;;  %v3504_v3 = vor.u32 %v4929_v1, %v3503_v0  ;;  %v4945_v4 = vld [vmem:[%s7921_s1 + $0xf4] sm:$0xf0]  ;;  %v4927_v13 = vld [vmem:[%s7921_s1 + $0x64] sm:$0xf0] }
  0x15   : > { %v3631_v5 = vld [vmem:[%s7921_s1 + $0x170] sm:$0xf]  ;;  %v4961_v6 = vld [vmem:[%s7921_s1 + $0x174] sm:$0xf0]  ;;  %v3568_v7 = vor.u32 %v4945_v4, %v3567_v2  ;;  %v3559_v14 = vld [vmem:[%s7921_s1 + $0xe0] sm:$0xf]  ;;  %v3496_v16 = vor.u32 %v4927_v13, %v3495_v11 }
  0x16   : > { %v3632_v8 = vor.u32 %v4961_v6, %v3631_v5  ;;  %v3695_v9 = vld [vmem:[%s7921_s1 + $0x1f0] sm:$0xf]  ;;  %v4977_v10 = vld [vmem:[%s7921_s1 + $0x1f4] sm:$0xf0]  ;;  %1150 = vmatpush.bf16.msra.mxu0 %v3504_v3  ;;  %v4943_v15 = vld [vmem:[%s7921_s1 + $0xe4] sm:$0xf0] }
  0x17   : > { %v3696_v12 = vor.u32 %v4977_v10, %v3695_v9  ;;  %1164 = vmatpush.bf16.msra.mxu1 %v3568_v7  ;;  %v3560_v17 = vor.u32 %v4943_v15, %v3559_v14  ;;  %v3623_v18 = vld [vmem:[%s7921_s1 + $0x160] sm:$0xf]  ;;  %v4959_v19 = vld [vmem:[%s7921_s1 + $0x164] sm:$0xf0]  ;;  %v3487_v23 = vld [vmem:[%s7921_s1 + $0x50] sm:$0xf] }
  0x18   : > { %1178 = vmatpush.bf16.msra.mxu2 %v3632_v8  ;;  %v3687_v20 = vld [vmem:[%s7921_s1 + $0x1e0] sm:$0xf]  ;;  %v3624_v21 = vor.u32 %v4959_v19, %v3623_v18  ;;  %v4975_v22 = vld [vmem:[%s7921_s1 + $0x1e4] sm:$0xf0]  ;;  %v4925_v24 = vld [vmem:[%s7921_s1 + $0x54] sm:$0xf0] }
  0x19   : > { %1192 = vmatpush.bf16.msra.mxu3 %v3696_v12  ;;  %v3688_v25 = vor.u32 %v4975_v22, %v3687_v20  ;;  %v3551_v26 = vld [vmem:[%s7921_s1 + $0xd0] sm:$0xf]  ;;  %v4941_v27 = vld [vmem:[%s7921_s1 + $0xd4] sm:$0xf0]  ;;  %v3488_v29 = vor.u32 %v4925_v24, %v3487_v23  ;;  %v3479_v35 = vld [vmem:[%s7921_s1 + $0x40] sm:$0xf] }
  0x1a   : > { %v3615_v28 = vld [vmem:[%s7921_s1 + $0x150] sm:$0xf]  ;;  %1151 = vmatpush.bf16.msra.mxu0 %v3496_v16  ;;  %v4957_v30 = vld [vmem:[%s7921_s1 + $0x154] sm:$0xf0]  ;;  %v3552_v33 = vor.u32 %v4941_v27, %v3551_v26  ;;  %v4923_v36 = vld [vmem:[%s7921_s1 + $0x44] sm:$0xf0] }
  0x1b   : > { %v3679_v31 = vld [vmem:[%s7921_s1 + $0x1d0] sm:$0xf]  ;;  %v4973_v32 = vld [vmem:[%s7921_s1 + $0x1d4] sm:$0xf0]  ;;  %1165 = vmatpush.bf16.msra.mxu1 %v3560_v17  ;;  %v3616_v34 = vor.u32 %v4957_v30, %v3615_v28  ;;  %v3543_v37 = vld [vmem:[%s7921_s1 + $0xc0] sm:$0xf]  ;;  %v3480_v44 = vor.u32 %v4923_v36, %v3479_v35 }
  0x1c   : > { %1179 = vmatpush.bf16.msra.mxu2 %v3624_v21  ;;  %v3680_v38 = vor.u32 %v4973_v32, %v3679_v31  ;;  %v4939_v39 = vld [vmem:[%s7921_s1 + $0xc4] sm:$0xf0]  ;;  %v3607_v40 = vld [vmem:[%s7921_s1 + $0x140] sm:$0xf]  ;;  %v3471_v47 = vld [vmem:[%s7921_s1 + $0x30] sm:$0xf] }
  0x1d   : > { %1193 = vmatpush.bf16.msra.mxu3 %v3688_v25  ;;  %v4955_v41 = vld [vmem:[%s7921_s1 + $0x144] sm:$0xf0]  ;;  %v3671_v42 = vld [vmem:[%s7921_s1 + $0x1c0] sm:$0xf]  ;;  %v3544_v45 = vor.u32 %v4939_v39, %v3543_v37  ;;  %v4921_v48 = vld [vmem:[%s7921_s1 + $0x34] sm:$0xf0] }
  0x1e   : > { %v4971_v43 = vld [vmem:[%s7921_s1 + $0x1c4] sm:$0xf0]  ;;  %1152 = vmatpush.bf16.msra.mxu0 %v3488_v29  ;;  %v3608_v46 = vor.u32 %v4955_v41, %v3607_v40  ;;  %v3535_v49 = vld [vmem:[%s7921_s1 + $0xb0] sm:$0xf]  ;;  %v4937_v51 = vld [vmem:[%s7921_s1 + $0xb4] sm:$0xf0]  ;;  %v3472_v56 = vor.u32 %v4921_v48, %v3471_v47 }
  0x1f   : > { %1166 = vmatpush.bf16.msra.mxu1 %v3552_v33  ;;  %v3672_v50 = vor.u32 %v4971_v43, %v3671_v42  ;;  %v3599_v52 = vld [vmem:[%s7921_s1 + $0x130] sm:$0xf]  ;;  %v4953_v53 = vld [vmem:[%s7921_s1 + $0x134] sm:$0xf0]  ;;  %v3536_v57 = vor.u32 %v4937_v51, %v3535_v49  ;;  %v3463_v59 = vld [vmem:[%s7921_s1 + $0x20] sm:$0xf] }
  0x20   : > { %1180 = vmatpush.bf16.msra.mxu2 %v3616_v34  ;;  %v3663_v54 = vld [vmem:[%s7921_s1 + $0x1b0] sm:$0xf]  ;;  %v4969_v55 = vld [vmem:[%s7921_s1 + $0x1b4] sm:$0xf0]  ;;  %v3600_v58 = vor.u32 %v4953_v53, %v3599_v52  ;;  %v4919_v60 = vld [vmem:[%s7921_s1 + $0x24] sm:$0xf0] }
  0x21   : > { %1194 = vmatpush.bf16.msra.mxu3 %v3680_v38  ;;  %v3527_v61 = vld [vmem:[%s7921_s1 + $0xa0] sm:$0xf]  ;;  %v3664_v62 = vor.u32 %v4969_v55, %v3663_v54  ;;  %v4935_v63 = vld [vmem:[%s7921_s1 + $0xa4] sm:$0xf0]  ;;  %v3464_v4 = vor.u32 %v4919_v60, %v3463_v59  ;;  %v3455_v7 = vld [vmem:[%s7921_s1 + $0x10] sm:$0xf] }
  0x22   : > { %1153 = vmatpush.bf16.msra.mxu0 %v3480_v44  ;;  %v3591_v0 = vld [vmem:[%s7921_s1 + $0x120] sm:$0xf]  ;;  %v4951_v1 = vld [vmem:[%s7921_s1 + $0x124] sm:$0xf0]  ;;  %v3528_v5 = vor.u32 %v4935_v63, %v3527_v61  ;;  %v4917_v8 = vld [vmem:[%s7921_s1 + $0x14] sm:$0xf0] }
  0x23   : > { %1167 = vmatpush.bf16.msra.mxu1 %v3544_v45  ;;  %v3655_v2 = vld [vmem:[%s7921_s1 + $0x1a0] sm:$0xf]  ;;  %v4967_v3 = vld [vmem:[%s7921_s1 + $0x1a4] sm:$0xf0]  ;;  %v3592_v6 = vor.u32 %v4951_v1, %v3591_v0  ;;  %v3519_v9 = vld [vmem:[%s7921_s1 + $0x90] sm:$0xf]  ;;  %v3456_v16 = vor.u32 %v4917_v8, %v3455_v7 }
  0x24   : > { %1181 = vmatpush.bf16.msra.mxu2 %v3608_v46  ;;  %v3656_v10 = vor.u32 %v4967_v3, %v3655_v2  ;;  %v4933_v11 = vld [vmem:[%s7921_s1 + $0x94] sm:$0xf0]  ;;  %v3583_v12 = vld [vmem:[%s7921_s1 + $0x110] sm:$0xf]  ;;  %v3447_v17 = vld [vmem:[%s7921_s1] sm:$0xf] }
  0x25   : > { %1195 = vmatpush.bf16.msra.mxu3 %v3672_v50  ;;  %v4949_v13 = vld [vmem:[%s7921_s1 + $0x114] sm:$0xf0]  ;;  %v3647_v14 = vld [vmem:[%s7921_s1 + $0x190] sm:$0xf]  ;;  %v4915_v18 = vld [vmem:[%s7921_s1 + $0x4] sm:$0xf0]  ;;  %v3520_v19 = vor.u32 %v4933_v11, %v3519_v9 }
  0x26   : > { %1154 = vmatpush.bf16.msra.mxu0 %v3472_v56  ;;  %v4965_v15 = vld [vmem:[%s7921_s1 + $0x194] sm:$0xf0]  ;;  %v3584_v20 = vor.u32 %v4949_v13, %v3583_v12  ;;  %v3511_v21 = vld [vmem:[%s7921_s1 + $0x80] sm:$0xf]  ;;  %v4931_v22 = vld [vmem:[%s7921_s1 + $0x84] sm:$0xf0]  ;;  %v3448_v31 = vor.u32 %v4915_v18, %v3447_v17 }
  0x27   : > { %1168 = vmatpush.bf16.msra.mxu1 %v3536_v57  ;;  %v3575_v23 = vld [vmem:[%s7921_s1 + $0x100] sm:$0xf]  ;;  %v3648_v24 = vor.u32 %v4965_v15, %v3647_v14  ;;  %v4947_v25 = vld [vmem:[%s7921_s1 + $0x104] sm:$0xf0]  ;;  %v3759_v26 = vld [vmem:[%s7921_s1 + $0x270] sm:$0xf]  ;;  %v3512_v35 = vor.u32 %v4931_v22, %v3511_v21 }
  0x28   : > { %1182 = vmatpush.bf16.msra.mxu2 %v3600_v58  ;;  %v4993_v27 = vld [vmem:[%s7921_s1 + $0x274] sm:$0xf0]  ;;  %v3823_v28 = vld [vmem:[%s7921_s1 + $0x2f0] sm:$0xf]  ;;  %v3639_v33 = vld [vmem:[%s7921_s1 + $0x180] sm:$0xf]  ;;  %v3576_v36 = vor.u32 %v4947_v25, %v3575_v23 }
  0x29   : > { %1196 = vmatpush.bf16.msra.mxu3 %v3664_v62  ;;  %v5009_v29 = vld [vmem:[%s7921_s1 + $0x2f4] sm:$0xf0]  ;;  %v3887_v30 = vld [vmem:[%s7921_s1 + $0x370] sm:$0xf]  ;;  %v4963_v34 = vld [vmem:[%s7921_s1 + $0x184] sm:$0xf0]  ;;  %v3760_v39 = vor.u32 %v4993_v27, %v3759_v26 }
  0x2a   : > { %1155 = vmatpush.bf16.msra.mxu0 %v3464_v4  ;;  %v5025_v32 = vld [vmem:[%s7921_s1 + $0x374] sm:$0xf0]  ;;  %v3951_v37 = vld [vmem:[%s7921_s1 + $0x3f0] sm:$0xf]  ;;  %v3824_v40 = vor.u32 %v5009_v29, %v3823_v28  ;;  %v3751_v41 = vld [vmem:[%s7921_s1 + $0x260] sm:$0xf]  ;;  %v3640_v43 = vor.u32 %v4963_v34, %v3639_v33 }
  0x2b   : > { %1169 = vmatpush.bf16.msra.mxu1 %v3528_v5  ;;  %v5041_v38 = vld [vmem:[%s7921_s1 + $0x3f4] sm:$0xf0]  ;;  %v3888_v42 = vor.u32 %v5025_v32, %v3887_v30  ;;  %v4991_v44 = vld [vmem:[%s7921_s1 + $0x264] sm:$0xf0]  ;;  %v3815_v45 = vld [vmem:[%s7921_s1 + $0x2e0] sm:$0xf] }
  0x2c   : > { %1183 = vmatpush.bf16.msra.mxu2 %v3592_v6  ;;  %v5007_v46 = vld [vmem:[%s7921_s1 + $0x2e4] sm:$0xf0]  ;;  %v3952_v47 = vor.u32 %v5041_v38, %v3951_v37  ;;  %v3879_v48 = vld [vmem:[%s7921_s1 + $0x360] sm:$0xf]  ;;  %v3752_v52 = vor.u32 %v4991_v44, %v3751_v41  ;;  %v3743_v54 = vld [vmem:[%s7921_s1 + $0x250] sm:$0xf] }
  0x2d   : > { %1197 = vmatpush.bf16.msra.mxu3 %v3656_v10  ;;  %v5023_v49 = vld [vmem:[%s7921_s1 + $0x364] sm:$0xf0]  ;;  %v3943_v50 = vld [vmem:[%s7921_s1 + $0x3e0] sm:$0xf]  ;;  %v3816_v53 = vor.u32 %v5007_v46, %v3815_v45  ;;  %v4989_v55 = vld [vmem:[%s7921_s1 + $0x254] sm:$0xf0] }
  0x2e   : > { %1156 = vmatpush.bf16.msra.mxu0 %v3456_v16  ;;  %v5039_v51 = vld [vmem:[%s7921_s1 + $0x3e4] sm:$0xf0]  ;;  %v3807_v56 = vld [vmem:[%s7921_s1 + $0x2d0] sm:$0xf]  ;;  %v3880_v57 = vor.u32 %v5023_v49, %v3879_v48  ;;  %v5005_v58 = vld [vmem:[%s7921_s1 + $0x2d4] sm:$0xf0]  ;;  %v3744_v2 = vor.u32 %v4989_v55, %v3743_v54 }
  0x2f   : > { %1170 = vmatpush.bf16.msra.mxu1 %v3520_v19  ;;  %v3871_v59 = vld [vmem:[%s7921_s1 + $0x350] sm:$0xf]  ;;  %s219_s15 = scalar_select %p218_p10, %s5433_s22, 1  ;;  %v3944_v60 = vor.u32 %v5039_v51, %v3943_v50  ;;  %v5021_v61 = vld [vmem:[%s7921_s1 + $0x354] sm:$0xf0]  ;;  %v3808_v3 = vor.u32 %v5005_v58, %v3807_v56  ;;  %vm1575_vm0 = vcmask 523264  }
  0x30   : > { %1184 = vmatpush.bf16.msra.mxu2 %v3584_v20  ;;  %v3935_v62 = vld [vmem:[%s7921_s1 + $0x3d0] sm:$0xf]  ;;  %v5037_v63 = vld [vmem:[%s7921_s1 + $0x3d4] sm:$0xf0]  ;;  %v3735_v0 = vld [vmem:[%s7921_s1 + $0x240] sm:$0xf]  ;;  %v3872_v7 = vor.u32 %v5021_v61, %v3871_v59 }
  0x31   : > { %1198 = vmatpush.bf16.msra.mxu3 %v3648_v24  ;;  %v4987_v1 = vld [vmem:[%s7921_s1 + $0x244] sm:$0xf0]  ;;  %s5275_s10 = smul.u32 72, %s219_s15  ;;  %v3799_v4 = vld [vmem:[%s7921_s1 + $0x2c0] sm:$0xf]  ;;  %v3936_v11 = vor.u32 %v5037_v63, %v3935_v62  ;;  %vm1634_vm1 = vcmask 1040384  }
  0x32   : > { %1157 = vmatpush.bf16.msra.mxu0 %v3448_v31  ;;  %v5003_v5 = vld [vmem:[%s7921_s1 + $0x2c4] sm:$0xf0]  ;;  %v3863_v6 = vld [vmem:[%s7921_s1 + $0x340] sm:$0xf]  ;;  %v3736_v15 = vor.u32 %v4987_v1, %v3735_v0  ;;  %v3727_v22 = vld [vmem:[%s7921_s1 + $0x230] sm:$0xf] }
  0x33   : > { %1171 = vmatpush.bf16.msra.mxu1 %v3512_v35  ;;  %v5019_v8 = vld [vmem:[%s7921_s1 + $0x344] sm:$0xf0]  ;;  %v3927_v9 = vld [vmem:[%s7921_s1 + $0x3c0] sm:$0xf]  ;;  %s5753_s9 = scalar_lea.vmem %s7920_s0, %s5275_s10  ;;  %v3800_v20 = vor.u32 %v5003_v5, %v3799_v4  ;;  %v4985_v27 = vld [vmem:[%s7921_s1 + $0x234] sm:$0xf0] }
  0x34   : > { %1185 = vmatpush.bf16.msra.mxu2 %v3576_v36  ;;  %v5035_v10 = vld [vmem:[%s7921_s1 + $0x3c4] sm:$0xf0]  ;;  %v3411_v12 = vld [vmem:[%s5753_s9] sm:$0xf]  ;;  %v4909_v13 = vld [vmem:[%s5753_s9 + $0x20] sm:$0xf0]  ;;  %v3864_v26 = vor.u32 %v5019_v8, %v3863_v6  ;;  %v3728_v36 = vor.u32 %v4985_v27, %v3727_v22 }
  0x35   : > { %1199 = vmatpush.bf16.msra.mxu3 %v3640_v43  ;;  %v3419_v14 = vld [vmem:[%s5753_s9 + $0x8] sm:$0xf]  ;;  %v5758_v16 = vor.u32 %v4909_v13, %v3411_v12  ;;  %v4910_v17 = vld [vmem:[%s5753_s9 + $0x28] sm:$0xf0]  ;;  %v4905_v18 = vld [vmem:[%s5753_s9 + $0x4] sm:$0xf]  ;;  %v3928_v31 = vor.u32 %v5035_v10, %v3927_v9 }
  0x36   : > { %1206 = vmatpush.bf16.msrb.mxu0 %v3760_v39  ;;  %v3413_v19 = vld [vmem:[%s5753_s9 + $0x24] sm:$0xf0]  ;;  %v5763_v21 = vor.u32 %v4910_v17, %v3419_v14  ;;  %v4906_v24 = vld [vmem:[%s5753_s9 + $0xc] sm:$0xf]  ;;  %v3421_v25 = vld [vmem:[%s5753_s9 + $0x2c] sm:$0xf0] }
  0x37   : > { %1220 = vmatpush.bf16.msrb.mxu1 %v3824_v40  ;;  %v5768_v23 = vor.u32 %v4905_v18, %v3413_v19  ;;  %1158 = vmatmul.bf16.vlgmr.msra.gmra.mxu0 %v5758_v16  ;;  %v3791_v28 = vld [vmem:[%s7921_s1 + $0x2b0] sm:$0xf]  ;;  %v5001_v29 = vld [vmem:[%s7921_s1 + $0x2b4] sm:$0xf0]  ;;  %v5782_v30 = vor.u32 %v4906_v24, %v3421_v25  ;;  %v3719_v38 = vld [vmem:[%s7921_s1 + $0x220] sm:$0xf] }
  0x38   : > { %1234 = vmatpush.bf16.msrb.mxu2 %v3888_v42  ;;  %v3855_v32 = vld [vmem:[%s7921_s1 + $0x330] sm:$0xf]  ;;  %v5017_v33 = vld [vmem:[%s7921_s1 + $0x334] sm:$0xf0]  ;;  %v3792_v37 = vor.u32 %v5001_v29, %v3791_v28  ;;  %v4983_v40 = vld [vmem:[%s7921_s1 + $0x224] sm:$0xf0] }
  0x39   : > { %1248 = vmatpush.bf16.msrb.mxu3 %v3952_v47  ;;  %1186 = vmatmul.bf16.vlgmr.msra.gmra.mxu2 %v5763_v21  ;;  %v3919_v34 = vld [vmem:[%s7921_s1 + $0x3b0] sm:$0xf]  ;;  %v5033_v35 = vld [vmem:[%s7921_s1 + $0x3b4] sm:$0xf0]  ;;  %v3856_v39 = vor.u32 %v5017_v33, %v3855_v32  ;;  %v3783_v41 = vld [vmem:[%s7921_s1 + $0x2a0] sm:$0xf]  ;;  %v3720_v48 = vor.u32 %v4983_v40, %v3719_v38 }
  0x3a   : > { %1207 = vmatpush.bf16.msrb.mxu0 %v3752_v52  ;;  %1172 = vmatmul.bf16.vlgmr.msra.gmra.mxu1 %v5768_v23  ;;  %v4999_v42 = vld [vmem:[%s7921_s1 + $0x2a4] sm:$0xf0]  ;;  %v3920_v43 = vor.u32 %v5033_v35, %v3919_v34  ;;  %v3847_v44 = vld [vmem:[%s7921_s1 + $0x320] sm:$0xf]  ;;  %v3711_v50 = vld [vmem:[%s7921_s1 + $0x210] sm:$0xf] }
  0x3b   : > { %1221 = vmatpush.bf16.msrb.mxu1 %v3816_v53  ;;  %1200 = vmatmul.bf16.vlgmr.msra.gmra.mxu3 %v5782_v30  ;;  %v5015_v45 = vld [vmem:[%s7921_s1 + $0x324] sm:$0xf0]  ;;  %v3911_v46 = vld [vmem:[%s7921_s1 + $0x3a0] sm:$0xf]  ;;  %v3784_v49 = vor.u32 %v4999_v42, %v3783_v41  ;;  %v4981_v51 = vld [vmem:[%s7921_s1 + $0x214] sm:$0xf0] }
  0x3c   : > { %1235 = vmatpush.bf16.msrb.mxu2 %v3880_v57  ;;  %v5031_v47 = vld [vmem:[%s7921_s1 + $0x3a4] sm:$0xf0]  ;;  %v3848_v52 = vor.u32 %v5015_v45, %v3847_v44  ;;  %v3775_v53 = vld [vmem:[%s7921_s1 + $0x290] sm:$0xf]  ;;  %v4997_v54 = vld [vmem:[%s7921_s1 + $0x294] sm:$0xf0]  ;;  %v3712_v0 = vor.u32 %v4981_v51, %v3711_v50 }
  0x3d   : > { %1249 = vmatpush.bf16.msrb.mxu3 %v3944_v60  ;;  %v3839_v55 = vld [vmem:[%s7921_s1 + $0x310] sm:$0xf]  ;;  %v3912_v56 = vor.u32 %v5031_v47, %v3911_v46  ;;  %v5013_v57 = vld [vmem:[%s7921_s1 + $0x314] sm:$0xf0]  ;;  %v3703_v60 = vld [vmem:[%s7921_s1 + $0x200] sm:$0xf]  ;;  %v3776_v1 = vor.u32 %v4997_v54, %v3775_v53 }
  0x3e   : > { %1208 = vmatpush.bf16.msrb.mxu0 %v3744_v2  ;;  %v3903_v58 = vld [vmem:[%s7921_s1 + $0x390] sm:$0xf]  ;;  %v5029_v59 = vld [vmem:[%s7921_s1 + $0x394] sm:$0xf0]  ;;  %v4979_v61 = vld [vmem:[%s7921_s1 + $0x204] sm:$0xf0]  ;;  %v3840_v5 = vor.u32 %v5013_v57, %v3839_v55 }
  0x3f   : > { %1222 = vmatpush.bf16.msrb.mxu1 %v3808_v3  ;;  %v3767_v62 = vld [vmem:[%s7921_s1 + $0x280] sm:$0xf]  ;;  %v4995_v63 = vld [vmem:[%s7921_s1 + $0x284] sm:$0xf0]  ;;  %v4015_v4 = vld [vmem:[%s7921_s1 + $0x470] sm:$0xf]  ;;  %v3904_v9 = vor.u32 %v5029_v59, %v3903_v58  ;;  %v3704_v17 = vor.u32 %v4979_v61, %v3703_v60 }
  0x40   : > { %1236 = vmatpush.bf16.msrb.mxu2 %v3872_v7  ;;  %v3831_v2 = vld [vmem:[%s7921_s1 + $0x300] sm:$0xf]  ;;  %v5011_v3 = vld [vmem:[%s7921_s1 + $0x304] sm:$0xf0]  ;;  %v5057_v6 = vld [vmem:[%s7921_s1 + $0x474] sm:$0xf0]  ;;  %v3768_v18 = vor.u32 %v4995_v63, %v3767_v62 }
  0x41   : > { %1250 = vmatpush.bf16.msrb.mxu3 %v3936_v11  ;;  %v4928_v7 = vld [vmem:[%s7921_s1 + $0x74] sm:$0xf]  ;;  %v3505_v8 = vld [vmem:[%s7921_s1 + $0x78] sm:$0xf0]  ;;  %v3895_v12 = vld [vmem:[%s7921_s1 + $0x380] sm:$0xf]  ;;  %v3832_v24 = vor.u32 %v5011_v3, %v3831_v2  ;;  %v4016_v25 = vor.u32 %v5057_v6, %v4015_v4 }
  0x42   : > { %1209 = vmatpush.bf16.msrb.mxu0 %v3736_v15  ;;  %v4944_v10 = vld [vmem:[%s7921_s1 + $0xf4] sm:$0xf]  ;;  %v3569_v11 = vld [vmem:[%s7921_s1 + $0xf8] sm:$0xf0]  ;;  %v5027_v13 = vld [vmem:[%s7921_s1 + $0x384] sm:$0xf0]  ;;  %v3508_v29 = vor.u32 %v4928_v7, %v3505_v8 }
  0x43   : > { %1223 = vmatpush.bf16.msrb.mxu1 %v3800_v20  ;;  %v3427_v14 = vld [vmem:[%s5753_s9 + $0x10] sm:$0xf]  ;;  %v4911_v15 = vld [vmem:[%s5753_s9 + $0x30] sm:$0xf0]  ;;  %v3435_v19 = vld [vmem:[%s5753_s9 + $0x18] sm:$0xf]  ;;  %v3896_v35 = vor.u32 %v5027_v13, %v3895_v12 }
  0x44   : > { %1237 = vmatpush.bf16.msrb.mxu2 %v3864_v26  ;;  %v4912_v20 = vld [vmem:[%s5753_s9 + $0x38] sm:$0xf0]  ;;  %v4960_v22 = vld [vmem:[%s7921_s1 + $0x174] sm:$0xf]  ;;  %v3429_v28 = vld [vmem:[%s5753_s9 + $0x34] sm:$0xf0] }
  0x45   : > { %1251 = vmatpush.bf16.msrb.mxu3 %v3928_v31  ;;  %v3633_v26 = vld [vmem:[%s7921_s1 + $0x178] sm:$0xf0]  ;;  %v4907_v27 = vld [vmem:[%s5753_s9 + $0x14] sm:$0xf]  ;;  %v3572_v31 = vor.u32 %v4944_v10, %v3569_v11  ;;  %v4007_v33 = vld [vmem:[%s7921_s1 + $0x460] sm:$0xf]  ;;  %v5917_v40 = vor.u32 %v4912_v20, %v3435_v19 }
  0x46   : > { %1210 = vmatpush.bf16.msrb.mxu0 %v3728_v36  ;;  %v4908_v32 = vld [vmem:[%s5753_s9 + $0x1c] sm:$0xf]  ;;  %v5055_v34 = vld [vmem:[%s7921_s1 + $0x464] sm:$0xf0]  ;;  %v5908_v36 = vor.u32 %v4911_v15, %v3427_v14  ;;  %v4926_v38 = vld [vmem:[%s7921_s1 + $0x64] sm:$0xf]  ;;  %v3636_v41 = vor.u32 %v4960_v22, %v3633_v26  ;;  %v5925_v44 = vor.u32 %v4907_v27, %v3429_v28 }
  0x47   : > { %1224 = vmatpush.bf16.msrb.mxu1 %v3792_v37  ;;  %v3437_v37 = vld [vmem:[%s5753_s9 + $0x3c] sm:$0xf0]  ;;  %v4942_v42 = vld [vmem:[%s7921_s1 + $0xe4] sm:$0xf]  ;;  %v4008_v45 = vor.u32 %v5055_v34, %v4007_v33  ;;  %v3625_v47 = vld [vmem:[%s7921_s1 + $0x168] sm:$0xf0] }
  0x48   : > { %1238 = vmatpush.bf16.msrb.mxu2 %v3856_v39  ;;  %v3497_v39 = vld [vmem:[%s7921_s1 + $0x68] sm:$0xf0]  ;;  %v4958_v46 = vld [vmem:[%s7921_s1 + $0x164] sm:$0xf]  ;;  %v3999_v50 = vld [vmem:[%s7921_s1 + $0x450] sm:$0xf] }
  0x49   : > { %1252 = vmatpush.bf16.msrb.mxu3 %v3920_v43  ;;  %v3561_v43 = vld [vmem:[%s7921_s1 + $0xe8] sm:$0xf0]  ;;  %v5053_v51 = vld [vmem:[%s7921_s1 + $0x454] sm:$0xf0]  ;;  %v4924_v53 = vld [vmem:[%s7921_s1 + $0x54] sm:$0xf]  ;;  %v3628_v55 = vor.u32 %v4958_v46, %v3625_v47 }
  0x4a   : > { %1211 = vmatpush.bf16.msrb.mxu0 %v3720_v48  ;;  %v5933_v48 = vor.u32 %v4908_v32, %v3437_v37  ;;  %v3489_v54 = vld [vmem:[%s7921_s1 + $0x58] sm:$0xf0]  ;;  %v4000_v58 = vor.u32 %v5053_v51, %v3999_v50  ;;  %v4956_v59 = vld [vmem:[%s7921_s1 + $0x154] sm:$0xf]  ;;  %v3991_v62 = vld [vmem:[%s7921_s1 + $0x440] sm:$0xf] }
  0x4b   : > { %1225 = vmatpush.bf16.msrb.mxu1 %v3784_v49  ;;  %v3500_v49 = vor.u32 %v4926_v38, %v3497_v39  ;;  %v3553_v57 = vld [vmem:[%s7921_s1 + $0xd8] sm:$0xf0]  ;;  %v3492_v61 = vor.u32 %v4924_v53, %v3489_v54  ;;  %v5051_v63 = vld [vmem:[%s7921_s1 + $0x444] sm:$0xf0]  ;;  %v3481_v2 = vld [vmem:[%s7921_s1 + $0x48] sm:$0xf0] }
  0x4c   : > { %1239 = vmatpush.bf16.msrb.mxu2 %v3848_v52  ;;  %v3564_v52 = vor.u32 %v4942_v42, %v3561_v43  ;;  %v3617_v60 = vld [vmem:[%s7921_s1 + $0x158] sm:$0xf0]  ;;  %v4938_v4 = vld [vmem:[%s7921_s1 + $0xc4] sm:$0xf]  ;;  %v3992_v6 = vor.u32 %v5051_v63, %v3991_v62  ;;  %v3609_v8 = vld [vmem:[%s7921_s1 + $0x148] sm:$0xf0] }
  0x4d   : > { %1253 = vmatpush.bf16.msrb.mxu3 %v3912_v56  ;;  %v4940_v56 = vld [vmem:[%s7921_s1 + $0xd4] sm:$0xf]  ;;  %v3620_v3 = vor.u32 %v4956_v59, %v3617_v60  ;;  %v4954_v7 = vld [vmem:[%s7921_s1 + $0x144] sm:$0xf]  ;;  %v3983_v10 = vld [vmem:[%s7921_s1 + $0x430] sm:$0xf] }
  0x4e   : > { %1212 = vmatpush.bf16.msrb.mxu0 %v3712_v0  ;;  %v3556_v0 = vor.u32 %v4940_v56, %v3553_v57  ;;  %v5049_v11 = vld [vmem:[%s7921_s1 + $0x434] sm:$0xf0]  ;;  %v4920_v13 = vld [vmem:[%s7921_s1 + $0x34] sm:$0xf]  ;;  %v3473_v14 = vld [vmem:[%s7921_s1 + $0x38] sm:$0xf0]  ;;  %v3612_v15 = vor.u32 %v4954_v7, %v3609_v8 }
  0x4f   : > { %1226 = vmatpush.bf16.msrb.mxu1 %v3776_v1  ;;  %v4922_v1 = vld [vmem:[%s7921_s1 + $0x44] sm:$0xf]  ;;  %v3984_v19 = vor.u32 %v5049_v11, %v3983_v10  ;;  %v4952_v20 = vld [vmem:[%s7921_s1 + $0x134] sm:$0xf]  ;;  %v3601_v22 = vld [vmem:[%s7921_s1 + $0x138] sm:$0xf0] }
  0x50   : > { %1240 = vmatpush.bf16.msrb.mxu2 %v3840_v5  ;;  %v3545_v5 = vld [vmem:[%s7921_s1 + $0xc8] sm:$0xf0]  ;;  %v5047_v26 = vld [vmem:[%s7921_s1 + $0x424] sm:$0xf0]  ;;  %v4918_v28 = vld [vmem:[%s7921_s1 + $0x24] sm:$0xf] }
  0x51   : > { %1254 = vmatpush.bf16.msrb.mxu3 %v3904_v9  ;;  %v3484_v9 = vor.u32 %v4922_v1, %v3481_v2  ;;  %v3548_v12 = vor.u32 %v4938_v4, %v3545_v5  ;;  %v4934_v32 = vld [vmem:[%s7921_s1 + $0xa4] sm:$0xf]  ;;  %v3529_v33 = vld [vmem:[%s7921_s1 + $0xa8] sm:$0xf0]  ;;  %v3967_v39 = vld [vmem:[%s7921_s1 + $0x410] sm:$0xf] }
  0x52   : > { %1213 = vmatpush.bf16.msrb.mxu0 %v3704_v17  ;;  %v4936_v17 = vld [vmem:[%s7921_s1 + $0xb4] sm:$0xf]  ;;  %v3593_v37 = vld [vmem:[%s7921_s1 + $0x128] sm:$0xf0]  ;;  %v3532_v42 = vor.u32 %v4934_v32, %v3529_v33  ;;  %v3585_v51 = vld [vmem:[%s7921_s1 + $0x118] sm:$0xf0] }
  0x53   : > { %1227 = vmatpush.bf16.msrb.mxu1 %v3768_v18  ;;  %v3537_v18 = vld [vmem:[%s7921_s1 + $0xb8] sm:$0xf0]  ;;  %v4916_v43 = vld [vmem:[%s7921_s1 + $0x14] sm:$0xf]  ;;  %v3959_v53 = vld [vmem:[%s7921_s1 + $0x400] sm:$0xf] }
  0x54   : > { %1241 = vmatpush.bf16.msrb.mxu2 %v3832_v24  ;;  %v3476_v24 = vor.u32 %v4920_v13, %v3473_v14  ;;  %v3540_v27 = vor.u32 %v4936_v17, %v3537_v18  ;;  %v4932_v46 = vld [vmem:[%s7921_s1 + $0x94] sm:$0xf]  ;;  %v5043_v54 = vld [vmem:[%s7921_s1 + $0x404] sm:$0xf0]  ;;  %v3449_v57 = vld [vmem:[%s7921_s1 + $0x8] sm:$0xf0] }
  0x55   : > { %1255 = vmatpush.bf16.msrb.mxu3 %v3896_v35  ;;  %1214 = vmatmul.bf16.vlgmr.msrb.gmra.mxu0 %v5908_v36  ;;  %v4950_v35 = vld [vmem:[%s7921_s1 + $0x124] sm:$0xf]  ;;  %v4948_v50 = vld [vmem:[%s7921_s1 + $0x114] sm:$0xf]  ;;  %v3513_v59 = vld [vmem:[%s7921_s1 + $0x88] sm:$0xf0]  ;;  %v3960_v4 = vor.u32 %v5043_v54, %v3959_v53 }
  0x56   : > { %1262 = vmatpush.bf16.msra.mxu0 %v4016_v25  ;;  %1228 = vmatmul.bf16.vlgmr.msrb.gmra.mxu1 %v5925_v44  ;;  %v3975_v25 = vld [vmem:[%s7921_s1 + $0x420] sm:$0xf]  ;;  %v3596_v47 = vor.u32 %v4950_v35, %v3593_v37  ;;  %v3697_v62 = vld [vmem:[%s7921_s1 + $0x1f8] sm:$0xf0]  ;;  %v4992_v63 = vld [vmem:[%s7921_s1 + $0x274] sm:$0xf] }
  0x57   : > { %1276 = vmatpush.bf16.msra.mxu1 %v3508_v29  ;;  %1242 = vmatmul.bf16.vlgmr.msrb.gmra.mxu2 %v5917_v40  ;;  %v3465_v29 = vld [vmem:[%s7921_s1 + $0x28] sm:$0xf0]  ;;  %v3976_v34 = vor.u32 %v5047_v26, %v3975_v25  ;;  %v3761_v1 = vld [vmem:[%s7921_s1 + $0x278] sm:$0xf0]  ;;  %v5008_v2 = vld [vmem:[%s7921_s1 + $0x2f4] sm:$0xf] }
  0x58   : > { %1290 = vmatpush.bf16.msra.mxu2 %v3572_v31  ;;  %1256 = vmatmul.bf16.vlgmr.msrb.gmra.mxu3 %v5933_v48  ;;  %v3604_v31 = vor.u32 %v4952_v20, %v3601_v22  ;;  %v3468_v38 = vor.u32 %v4918_v28, %v3465_v29  ;;  %v4946_v5 = vld [vmem:[%s7921_s1 + $0x104] sm:$0xf]  ;;  %v3443_v7 = vld [vmem:[%s5753_s9 + $0x20] sm:$0xf]  ;;  %v5024_v11 = vld [vmem:[%s7921_s1 + $0x374] sm:$0xf]  ;;  %v3764_v14 = vor.u32 %v4992_v63, %v3761_v1 }
  0x59   : > { %1304 = vmatpush.bf16.msra.mxu3 %v3636_v41  ;;  %v5045_v41 = vld [vmem:[%s7921_s1 + $0x414] sm:$0xf0]  ;;  %v4913_v10 = vld [vmem:[%s5753_s9 + $0x40] sm:$0xf0]  ;;  %v3689_v17 = vld [vmem:[%s7921_s1 + $0x1e8] sm:$0xf0] }
  0x5a   : > { %1263 = vmatpush.bf16.msra.mxu0 %v4008_v45  ;;  %v3457_v45 = vld [vmem:[%s7921_s1 + $0x18] sm:$0xf0]  ;;  %v4990_v20 = vld [vmem:[%s7921_s1 + $0x264] sm:$0xf]  ;;  %v3753_v22 = vld [vmem:[%s7921_s1 + $0x268] sm:$0xf0] }
  0x5b   : > { %1277 = vmatpush.bf16.msra.mxu1 %v3500_v49  ;;  %v3521_v49 = vld [vmem:[%s7921_s1 + $0x98] sm:$0xf0]  ;;  %v3460_v56 = vor.u32 %v4916_v43, %v3457_v45  ;;  %v5006_v26 = vld [vmem:[%s7921_s1 + $0x2e4] sm:$0xf]  ;;  %v3756_v32 = vor.u32 %v4990_v20, %v3753_v22  ;;  %v4972_v33 = vld [vmem:[%s7921_s1 + $0x1d4] sm:$0xf] }
  0x5c   : > { %1291 = vmatpush.bf16.msra.mxu2 %v3564_v52  ;;  %v3968_v52 = vor.u32 %v5045_v41, %v3967_v39  ;;  %v3524_v60 = vor.u32 %v4932_v46, %v3521_v49  ;;  %v5022_v29 = vld [vmem:[%s7921_s1 + $0x364] sm:$0xf]  ;;  %v4988_v37 = vld [vmem:[%s7921_s1 + $0x254] sm:$0xf]  ;;  %v3873_v46 = vld [vmem:[%s7921_s1 + $0x358] sm:$0xf0] }
  0x5d   : > { %1305 = vmatpush.bf16.msra.mxu3 %v3628_v55  ;;  %v4914_v55 = vld [vmem:[%s7921_s1 + $0x4] sm:$0xf]  ;;  %v5004_v41 = vld [vmem:[%s7921_s1 + $0x2d4] sm:$0xf]  ;;  %v3793_v1 = vld [vmem:[%s7921_s1 + $0x2b8] sm:$0xf0] }
  0x5e   : > { %1264 = vmatpush.bf16.msra.mxu0 %v4000_v58  ;;  %v4930_v58 = vld [vmem:[%s7921_s1 + $0x84] sm:$0xf]  ;;  %v3452_v8 = vor.u32 %v4914_v55, %v3449_v57  ;;  %v5020_v45 = vld [vmem:[%s7921_s1 + $0x354] sm:$0xf]  ;;  %v3649_v20 = vld [vmem:[%s7921_s1 + $0x198] sm:$0xf0] }
  0x5f   : > { %1278 = vmatpush.bf16.msra.mxu1 %v3492_v61  ;;  %v4976_v61 = vld [vmem:[%s7921_s1 + $0x1f4] sm:$0xf]  ;;  %v3516_v13 = vor.u32 %v4930_v58, %v3513_v59  ;;  %v4970_v49 = vld [vmem:[%s7921_s1 + $0x1c4] sm:$0xf]  ;;  %v3876_v53 = vor.u32 %v5020_v45, %v3873_v46  ;;  %v3665_v59 = vld [vmem:[%s7921_s1 + $0x1b8] sm:$0xf0] }
  0x60   : > { %1292 = vmatpush.bf16.msra.mxu2 %v3556_v0  ;;  %v3588_v0 = vor.u32 %v4948_v50, %v3585_v51  ;;  %v3673_v50 = vld [vmem:[%s7921_s1 + $0x1c8] sm:$0xf0]  ;;  %v5002_v54 = vld [vmem:[%s7921_s1 + $0x2c4] sm:$0xf]  ;;  %v4968_v58 = vld [vmem:[%s7921_s1 + $0x1b4] sm:$0xf] }
  0x61   : > { %1306 = vmatpush.bf16.msra.mxu3 %v3620_v3  ;;  %v3825_v3 = vld [vmem:[%s7921_s1 + $0x2f8] sm:$0xf0]  ;;  %v3676_v55 = vor.u32 %v4970_v49, %v3673_v50  ;;  %v5056_v49 = vld [vmem:[%s7921_s1 + $0x474] sm:$0xf]  ;;  %s215_s10 = sand.u32 1, %s5371_s19   ;;  %s5381_s15 = smov 64  }
  0x62   : > { %1265 = vmatpush.bf16.msra.mxu0 %v3992_v6  ;;  %v3577_v6 = vld [vmem:[%s7921_s1 + $0x108] sm:$0xf0]  ;;  %v3828_v18 = vor.u32 %v5008_v2, %v3825_v3  ;;  %v3668_v2 = vor.u32 %v4968_v58, %v3665_v59  ;;  %v5016_v3 = vld [vmem:[%s7921_s1 + $0x334] sm:$0xf]  ;;  %v3953_v45 = vld [vmem:[%s7921_s1 + $0x3f8] sm:$0xf0] }
  0x63   : > { %1279 = vmatpush.bf16.msra.mxu1 %v3484_v9  ;;  %v3700_v9 = vor.u32 %v4976_v61, %v3697_v62  ;;  %v4984_v61 = vld [vmem:[%s7921_s1 + $0x234] sm:$0xf]  ;;  %v3729_v62 = vld [vmem:[%s7921_s1 + $0x238] sm:$0xf0]  ;;  %v5054_v58 = vld [vmem:[%s7921_s1 + $0x464] sm:$0xf] }
  0x64   : > { %1293 = vmatpush.bf16.msra.mxu2 %v3548_v12  ;;  %v3889_v12 = vld [vmem:[%s7921_s1 + $0x378] sm:$0xf0]  ;;  %v4009_v59 = vld [vmem:[%s7921_s1 + $0x468] sm:$0xf0]  ;;  %s6871_s8 = smul.u32 3, %s215_s10  ;;  %s3330_s22 = scalar_lea.sflag [#allocation3], %s215_s10 }
  0x65   : > { %1307 = vmatpush.bf16.msra.mxu3 %v3612_v15  ;;  %v4974_v15 = vld [vmem:[%s7921_s1 + $0x1e4] sm:$0xf]  ;;  %v3892_v25 = vor.u32 %v5024_v11, %v3889_v12  ;;  %v4017_v50 = vld [vmem:[%s7921_s1 + $0x478] sm:$0xf0]  ;;  %s5331_s9 = sshra.s32 %s3345_s11, 4  ;;  %s5332_s9 = int_to_ptr.hbm [resolvable:$true] %s5331_s9 }
  0x66   : > { %1266 = vmatpush.bf16.msra.mxu0 %v3984_v19  ;;  %v3580_v19 = vor.u32 %v4946_v5, %v3577_v6  ;;  %v3692_v28 = vor.u32 %v4974_v15, %v3689_v17  ;;  %v3732_v5 = vor.u32 %v4984_v61, %v3729_v62  ;;  %v4966_v6 = vld [vmem:[%s7921_s1 + $0x1a4] sm:$0xf]  ;;  %v3849_v17 = vld [vmem:[%s7921_s1 + $0x328] sm:$0xf0]  ;;  %v4012_v61 = vor.u32 %v5054_v58, %v4009_v59  ;;  %v5036_v62 = vld [vmem:[%s7921_s1 + $0x3d4] sm:$0xf]  ;;  %p5338_p0 = scmp.lt.s32.totalorder %s5332_s9, %s7925_s5 }
  0x67   : > { %1280 = vmatpush.bf16.msra.mxu1 %v3476_v24  ;;  %v6121_v24 = vor.u32 %v4913_v10, %v3443_v7  ;;  %v3657_v7 = vld [vmem:[%s7921_s1 + $0x1a8] sm:$0xf0]  ;;  %v4998_v12 = vld [vmem:[%s7921_s1 + $0x2a4] sm:$0xf]  ;;  %s6936_s12 = scalar_lea.vmem [#allocation2], %s6871_s8  ;;  %s5333_s13 = scalar_lea.hbm %s5332_s9, 3 }
  0x68   : > { %1294 = vmatpush.bf16.msra.mxu2 %v3540_v27  ;;  %v3817_v27 = vld [vmem:[%s7921_s1 + $0x2e8] sm:$0xf0]  ;;  %v5014_v15 = vld [vmem:[%s7921_s1 + $0x324] sm:$0xf]  ;;  %s3342_s7 = sshll.u32 %s6936_s12, 4  ;;  %p5334_p11 = scmp.ne.s32.totalorder %s5332_s9, %s5333_s13  ;;  %s3343_s7 = int_to_ptr.vmem [resolvable:$true] %s3342_s7 }
  0x69   : > { %1308 = vmatpush.bf16.msra.mxu3 %v3604_v31  ;;  %v3881_v31 = vld [vmem:[%s7921_s1 + $0x368] sm:$0xf0]  ;;  %v3820_v35 = vor.u32 %v5006_v26, %v3817_v27  ;;  %v3713_v26 = vld [vmem:[%s7921_s1 + $0x218] sm:$0xf0]  ;;  %v3852_v27 = vor.u32 %v5014_v15, %v3849_v17  ;;  %p5339_p1 = scmp.lt.s32.totalorder %s5337_s17, %s5333_s13 }
  0x6a   : > { %1267 = vmatpush.bf16.msra.mxu0 %v3976_v34  ;;  %v3681_v34 = vld [vmem:[%s7921_s1 + $0x1d8] sm:$0xf0]  ;;  %v3884_v39 = vor.u32 %v5022_v29, %v3881_v31  ;;  %v3721_v10 = vld [vmem:[%s7921_s1 + $0x228] sm:$0xf0]  ;;  %p5335_p12 = pnand %p5334_p11, %p5450_p5 }
  0x6b   : > { %1281 = vmatpush.bf16.msra.mxu1 %v3468_v38  ;;  %v3745_v38 = vld [vmem:[%s7921_s1 + $0x258] sm:$0xf0]  ;;  %v3684_v43 = vor.u32 %v4972_v33, %v3681_v34  ;;  %v4962_v34 = vld [vmem:[%s7921_s1 + $0x184] sm:$0xf]  ;;  %v3977_v15 = vld [vmem:[%s7921_s1 + $0x428] sm:$0xf0]  ;;  %p5340_p2 = por %p5339_p1, %p5338_p0 }
  0x6c   : > { %1295 = vmatpush.bf16.msra.mxu2 %v3532_v42  ;;  %v3809_v42 = vld [vmem:[%s7921_s1 + $0x2d8] sm:$0xf0]  ;;  %p5336_p13 = pneg %p5335_p12 }
  0x6d   : > { %1309 = vmatpush.bf16.msra.mxu3 %v3596_v47  ;;  %v3748_v47 = vor.u32 %v4988_v37, %v3745_v38  ;;  %v3812_v51 = vor.u32 %v5004_v41, %v3809_v42  ;;  %v3777_v29 = vld [vmem:[%s7921_s1 + $0x298] sm:$0xf0]  ;;  %v3641_v37 = vld [vmem:[%s7921_s1 + $0x188] sm:$0xf0]  ;;  %v4978_v38 = vld [vmem:[%s7921_s1 + $0x204] sm:$0xf] }
  0x6e   : > { %1268 = vmatpush.bf16.msra.mxu0 %v3968_v52  ;;  %v4986_v52 = vld [vmem:[%s7921_s1 + $0x244] sm:$0xf]  ;;  %v3841_v33 = vld [vmem:[%s7921_s1 + $0x318] sm:$0xf0]  ;;  %p5341_p3 = pnand %p5340_p2, %p5336_p13 }
  0x6f   : > { %1282 = vmatpush.bf16.msra.mxu1 %v3460_v56  ;;  %v5018_v56 = vld [vmem:[%s7921_s1 + $0x344] sm:$0xf] }
  0x70   : > { %1296 = vmatpush.bf16.msra.mxu2 %v3524_v60  ;;  %v4994_v42 = vld [vmem:[%s7921_s1 + $0x284] sm:$0xf] }
  0x71   : > { %1310 = vmatpush.bf16.msra.mxu3 %v3588_v0  ;;  %v5000_v0 = vld [vmem:[%s7921_s1 + $0x2b4] sm:$0xf] }
  0x72   : > { %1269 = vmatpush.bf16.msra.mxu0 %v3960_v4  ;;  %v3857_v4 = vld [vmem:[%s7921_s1 + $0x338] sm:$0xf0] }
  0x73   : > { %1283 = vmatpush.bf16.msra.mxu1 %v3452_v8  ;;  %v3796_v8 = vor.u32 %v5000_v0, %v3793_v1  ;;  %v3860_v11 = vor.u32 %v5016_v3, %v3857_v4  ;;  %v5052_v0 = vld [vmem:[%s7921_s1 + $0x454] sm:$0xf]  ;;  %v4001_v1 = vld [vmem:[%s7921_s1 + $0x458] sm:$0xf0]  ;;  %v3929_v4 = vld [vmem:[%s7921_s1 + $0x3c8] sm:$0xf0] }
  0x74   : > { %1297 = vmatpush.bf16.msra.mxu2 %v3516_v13  ;;  %v3785_v13 = vld [vmem:[%s7921_s1 + $0x2a8] sm:$0xf0]  ;;  %v4004_v3 = vor.u32 %v5052_v0, %v4001_v1  ;;  %v5097_v0 = vld [vmem:[%s7923_s3 + $0x134] sm:$0xf0] }
  0x75   : > { %1311 = vmatpush.bf16.msra.mxu3 %v3580_v19  ;;  %1270 = vmatmul.bf16.vlgmr.msra.gmra.mxu0 %v6121_v24  ;;  %v4964_v19 = vld [vmem:[%s7921_s1 + $0x194] sm:$0xf]  ;;  %v3788_v22 = vor.u32 %v4998_v12, %v3785_v13  ;;  %v5030_v12 = vld [vmem:[%s7921_s1 + $0x3a4] sm:$0xf]  ;;  %v3913_v13 = vld [vmem:[%s7921_s1 + $0x3a8] sm:$0xf0] }
  0x76   : > { %1318 = vmatpush.bf16.msrb.mxu0 %v3700_v9  ;;  %1284 = vmatmul.bf16.vlgmr.msra.gmra.mxu1 %v5758_v16  ;;  %v3865_v16 = vld [vmem:[%s7921_s1 + $0x348] sm:$0xf0]  ;;  %v4982_v9 = vld [vmem:[%s7921_s1 + $0x224] sm:$0xf]  ;;  %v3652_v31 = vor.u32 %v4964_v19, %v3649_v20  ;;  %v3916_v17 = vor.u32 %v5030_v12, %v3913_v13  ;;  %v5028_v19 = vld [vmem:[%s7921_s1 + $0x394] sm:$0xf] }
  0x77   : > { %1332 = vmatpush.bf16.msrb.mxu1 %v3764_v14  ;;  %1298 = vmatmul.bf16.vlgmr.msra.gmra.mxu2 %v5768_v23  ;;  %v3737_v23 = vld [vmem:[%s7921_s1 + $0x248] sm:$0xf0]  ;;  %v3868_v63 = vor.u32 %v5018_v56, %v3865_v16  ;;  %v3660_v14 = vor.u32 %v4966_v6, %v3657_v7  ;;  %v5038_v56 = vld [vmem:[%s7921_s1 + $0x3e4] sm:$0xf]  ;;  %v5032_v6 = vld [vmem:[%s7921_s1 + $0x3b4] sm:$0xf] }
  0x78   : > { %1346 = vmatpush.bf16.msrb.mxu2 %v3828_v18  ;;  %1312 = vmatmul.bf16.vlgmr.msra.gmra.mxu3 %v5763_v21  ;;  %v3801_v21 = vld [vmem:[%s7921_s1 + $0x2c8] sm:$0xf0]  ;;  %v3740_v57 = vor.u32 %v4986_v52, %v3737_v23  ;;  %v3724_v18 = vor.u32 %v4982_v9, %v3721_v10  ;;  %v5010_v52 = vld [vmem:[%s7921_s1 + $0x304] sm:$0xf]  ;;  %v3921_v7 = vld [vmem:[%s7921_s1 + $0x3b8] sm:$0xf0] }
  0x79   : > { %1360 = vmatpush.bf16.msrb.mxu3 %v3892_v25  ;;  %v3804_v60 = vor.u32 %v5002_v54, %v3801_v21  ;;  %v4980_v25 = vld [vmem:[%s7921_s1 + $0x214] sm:$0xf]  ;;  %v3833_v23 = vld [vmem:[%s7921_s1 + $0x308] sm:$0xf0]  ;;  %v3985_v9 = vld [vmem:[%s7921_s1 + $0x438] sm:$0xf0]  ;;  %v3924_v10 = vor.u32 %v5032_v6, %v3921_v7 }
  0x7a   : > { %1319 = vmatpush.bf16.msrb.mxu0 %v3692_v28  ;;  %v4996_v28 = vld [vmem:[%s7921_s1 + $0x294] sm:$0xf]  ;;  %v3945_v16 = vld [vmem:[%s7921_s1 + $0x3e8] sm:$0xf0]  ;;  %v3905_v20 = vld [vmem:[%s7921_s1 + $0x398] sm:$0xf0] }
  0x7b   : > { %1333 = vmatpush.bf16.msrb.mxu1 %v3756_v32  ;;  %v5012_v32 = vld [vmem:[%s7921_s1 + $0x314] sm:$0xf]  ;;  %v3780_v41 = vor.u32 %v4996_v28, %v3777_v29  ;;  %v5026_v28 = vld [vmem:[%s7921_s1 + $0x384] sm:$0xf]  ;;  %v3897_v29 = vld [vmem:[%s7921_s1 + $0x388] sm:$0xf0] }
  0x7c   : > { %1347 = vmatpush.bf16.msrb.mxu2 %v3820_v35  ;;  %v3716_v35 = vor.u32 %v4980_v25, %v3713_v26  ;;  %v3844_v46 = vor.u32 %v5012_v32, %v3841_v33  ;;  %v3969_v25 = vld [vmem:[%s7921_s1 + $0x418] sm:$0xf0]  ;;  %v3908_v26 = vor.u32 %v5028_v19, %v3905_v20  ;;  %v3961_v32 = vld [vmem:[%s7921_s1 + $0x408] sm:$0xf0]  ;;  %v3900_v33 = vor.u32 %v5026_v28, %v3897_v29  ;;  %v5071_v12 = vld [vmem:[%s7923_s3 + $0x64] sm:$0xf0] }
  0x7d   : > { %1361 = vmatpush.bf16.msrb.mxu3 %v3884_v39  ;;  %v3705_v39 = vld [vmem:[%s7921_s1 + $0x208] sm:$0xf0]  ;;  %v5078_v13 = vld [vmem:[%s7923_s3 + $0xa4] sm:$0xf]  ;;  %v5077_v20 = vld [vmem:[%s7923_s3 + $0x94] sm:$0xf0] }
  0x7e   : > { %1320 = vmatpush.bf16.msrb.mxu0 %v3684_v43  ;;  %v5040_v43 = vld [vmem:[%s7921_s1 + $0x3f4] sm:$0xf]  ;;  %v4063_v28 = vld [vmem:[%s7923_s3 + $0x50] sm:$0xf]  ;;  %v5069_v29 = vld [vmem:[%s7923_s3 + $0x54] sm:$0xf0] }
  0x7f   : > { %1334 = vmatpush.bf16.msrb.mxu1 %v3748_v47  ;;  %v3769_v47 = vld [vmem:[%s7921_s1 + $0x288] sm:$0xf0]  ;;  %v3956_v54 = vor.u32 %v5040_v43, %v3953_v45 }
  0x80   : > { %1348 = vmatpush.bf16.msrb.mxu2 %v3812_v51  ;;  %v3644_v51 = vor.u32 %v4962_v34, %v3641_v37  ;;  %v3772_v21 = vor.u32 %v4994_v42, %v3769_v47 }
  0x81   : > { %1362 = vmatpush.bf16.msrb.mxu3 %v3876_v53  ;;  %v3708_v53 = vor.u32 %v4978_v38, %v3705_v39  ;;  %v6394_v39 = vld [vmem:[%s7922_s2] sm:$0x3] }
  0x82   : > { %1321 = vmatpush.bf16.msrb.mxu0 %v3676_v55  ;;  %v4020_v55 = vor.u32 %v5056_v49, %v4017_v50  ;;  %v380_v43 = vperm.slane %v6394_v39, 0 }
  0x83   : > { %1335 = vmatpush.bf16.msrb.mxu1 %v3740_v57  ;;  %v3836_v57 = vor.u32 %v5010_v52, %v3833_v23 }
  0x84   : > { %1349 = vmatpush.bf16.msrb.mxu2 %v3804_v60  ;;  %v3948_v60 = vor.u32 %v5038_v56, %v3945_v16 }
  0x85   : > { %1363 = vmatpush.bf16.msrb.mxu3 %v3868_v63  ;;  %v3937_v63 = vld [vmem:[%s7921_s1 + $0x3d8] sm:$0xf0] }
  0x86   : > { %1322 = vmatpush.bf16.msrb.mxu0 %v3668_v2  ;;  %v3940_v2 = vor.u32 %v5036_v62, %v3937_v63  ;;  %v4177_v63 = vld [vmem:[%s7923_s3 + $0x130] sm:$0xf] }
  0x87   : > { %1336 = vmatpush.bf16.msrb.mxu1 %v3732_v5  ;;  %v4178_v1 = vor.u32 %v5097_v0, %v4177_v63  ;;  %v4089_v63 = vld [vmem:[%s7923_s3 + $0x88] sm:$0xf0]  ;;  %v5096_v0 = vld [vmem:[%s7923_s3 + $0x134] sm:$0xf] }
  0x88   : > { %1350 = vmatpush.bf16.msrb.mxu2 %v3796_v8  ;;  %v5048_v8 = vld [vmem:[%s7921_s1 + $0x434] sm:$0xf] }
  0x89   : > { %1364 = vmatpush.bf16.msrb.mxu3 %v3860_v11  ;;  %v3988_v11 = vor.u32 %v5048_v8, %v3985_v9  ;;  %v4169_v8 = vld [vmem:[%s7923_s3 + $0x120] sm:$0xf]  ;;  %v5095_v9 = vld [vmem:[%s7923_s3 + $0x124] sm:$0xf0] }
  0x8a   : > { %1323 = vmatpush.bf16.msrb.mxu0 %v3660_v14  ;;  %v5046_v14 = vld [vmem:[%s7921_s1 + $0x424] sm:$0xf] }
  0x8b   : > { %1337 = vmatpush.bf16.msrb.mxu1 %v3724_v18  ;;  %v3980_v18 = vor.u32 %v5046_v14, %v3977_v15 }
  0x8c   : > { %1351 = vmatpush.bf16.msrb.mxu2 %v3788_v22  ;;  %v5044_v22 = vld [vmem:[%s7921_s1 + $0x414] sm:$0xf] }
  0x8d   : > { %1365 = vmatpush.bf16.msrb.mxu3 %v3852_v27  ;;  %v3972_v27 = vor.u32 %v5044_v22, %v3969_v25  ;;  %v4161_v25 = vld [vmem:[%s7923_s3 + $0x110] sm:$0xf] }
  0x8e   : > { %1324 = vmatpush.bf16.msrb.mxu0 %v3652_v31  ;;  %v5042_v31 = vld [vmem:[%s7921_s1 + $0x404] sm:$0xf] }
  0x8f   : > { %1338 = vmatpush.bf16.msrb.mxu1 %v3716_v35  ;;  %v3964_v34 = vor.u32 %v5042_v31, %v3961_v32  ;;  %v5076_v31 = vld [vmem:[%s7923_s3 + $0x94] sm:$0xf] }
  0x90   : > { %1352 = vmatpush.bf16.msrb.mxu2 %v3780_v41 }
  0x91   : > { %1366 = vmatpush.bf16.msrb.mxu3 %v3844_v46 }
  0x92   : > { %1325 = vmatpush.bf16.msrb.mxu0 %v3644_v51 }
  0x93   : > { %1339 = vmatpush.bf16.msrb.mxu1 %v3708_v53 }
  0x94   : > { %1353 = vmatpush.bf16.msrb.mxu2 %v3772_v21 }
  0x95   : > { %1367 = vmatpush.bf16.msrb.mxu3 %v3836_v57  ;;  %1326 = vmatmul.bf16.vlgmr.msrb.gmra.mxu0 %v5782_v30  ;;  %v5034_v30 = vld [vmem:[%s7921_s1 + $0x3c4] sm:$0xf] }
  0x96   : > { %1374 = vmatpush.bf16.msra.mxu0 %v3956_v54  ;;  %1340 = vmatmul.bf16.vlgmr.msrb.gmra.mxu1 %v5908_v36  ;;  %v5050_v36 = vld [vmem:[%s7921_s1 + $0x444] sm:$0xf] }
  0x97   : > { %1388 = vmatpush.bf16.msra.mxu1 %v4020_v55  ;;  %1354 = vmatmul.bf16.vlgmr.msrb.gmra.mxu2 %v5925_v44  ;;  %v3993_v44 = vld [vmem:[%s7921_s1 + $0x448] sm:$0xf0] }
  0x98   : > { %1368 = vmatmul.bf16.vlgmr.msrb.gmra.mxu3 %v5917_v40  ;;  %v3932_v40 = vor.u32 %v5034_v30, %v3929_v4  ;;  %v3996_v5 = vor.u32 %v5050_v36, %v3993_v44  ;;  %v5080_v30 = vld [vmem:[%s7923_s3 + $0xb4] sm:$0xf]  ;;  %v4113_v36 = vld [vmem:[%s7923_s3 + $0xb8] sm:$0xf0]  ;;  %v4103_v44 = vld [vmem:[%s7923_s3 + $0xa0] sm:$0xf] }
  0x99   : > { %v4116_v6 = vor.u32 %v5080_v30, %v4113_v36  ;;  %v5070_v30 = vld [vmem:[%s7923_s3 + $0x64] sm:$0xf] }
  0x9a   : > { %1375 = vmatpush.bf16.msra.mxu0 %v3948_v60  ;;  %v4111_v60 = vld [vmem:[%s7923_s3 + $0xb0] sm:$0xf] }
  0x9b   : > { %1389 = vmatpush.bf16.msra.mxu1 %v4012_v61  ;;  %v5081_v61 = vld [vmem:[%s7923_s3 + $0xb4] sm:$0xf0] }
  0x9c   : > { %v4112_v62 = vor.u32 %v5081_v61, %v4111_v60  ;;  %v5074_v60 = vld [vmem:[%s7923_s3 + $0x84] sm:$0xf] }
  0x9e   : > { %1376 = vmatpush.bf16.msra.mxu0 %v3940_v2  ;;  %1596 = vmatpush.bf16.msra.mxu3 %v4112_v62  ;;  %v4079_v2 = vld [vmem:[%s7923_s3 + $0x70] sm:$0xf] }
  0x9f   : > { %1390 = vmatpush.bf16.msra.mxu1 %v4004_v3  ;;  %v5073_v3 = vld [vmem:[%s7923_s3 + $0x74] sm:$0xf0] }
  0xa0   : > { %v4080_v4 = vor.u32 %v5073_v3, %v4079_v2  ;;  %v4092_v2 = vor.u32 %v5074_v60, %v4089_v63  ;;  %v4179_v3 = vld [vmem:[%s7923_s3 + $0x138] sm:$0xf0] }
  0xa1   : > { %v4182_v36 = vor.u32 %v5096_v0, %v4179_v3  ;;  %v4121_v0 = vld [vmem:[%s7923_s3 + $0xc0] sm:$0xf] }
  0xa2   : > { %1377 = vmatpush.bf16.msra.mxu0 %v3932_v40  ;;  %v5079_v40 = vld [vmem:[%s7923_s3 + $0xa4] sm:$0xf0]  ;;  %1579 = vmatpush.bf16.msra.mxu2 %v4080_v4  ;;  %v4073_v4 = vld [vmem:[%s7923_s3 + $0x68] sm:$0xf0]  ;;  %v4023_v3 = vld [vmem:[%s7923_s3] sm:$0xf] }
  0xa3   : > { %1391 = vmatpush.bf16.msra.mxu1 %v3996_v5  ;;  %v4104_v7 = vor.u32 %v5079_v40, %v4103_v44  ;;  %v4076_v44 = vor.u32 %v5070_v30, %v4073_v4  ;;  %v4145_v40 = vld [vmem:[%s7923_s3 + $0xf0] sm:$0xf]  ;;  %v5059_v30 = vld [vmem:[%s7923_s3 + $0x4] sm:$0xf0] }
  0xa4   : > { %v4307_v4 = vld [vmem:[%s7923_s3 + $0x230] sm:$0xf] }
  0xa5   : > { %1597 = vmatpush.bf16.msra.mxu3 %v4104_v7 }
  0xa6   : > { %1378 = vmatpush.bf16.msra.mxu0 %v3924_v10  ;;  %v4170_v10 = vor.u32 %v5095_v9, %v4169_v8  ;;  %v4047_v8 = vld [vmem:[%s7923_s3 + $0x30] sm:$0xf]  ;;  %v5065_v9 = vld [vmem:[%s7923_s3 + $0x34] sm:$0xf0] }
  0xa7   : > { %1392 = vmatpush.bf16.msra.mxu1 %v3988_v11  ;;  %v4071_v11 = vld [vmem:[%s7923_s3 + $0x60] sm:$0xf] }
  0xa8   : > { %v4072_v15 = vor.u32 %v5071_v12, %v4071_v11  ;;  %v4048_v11 = vor.u32 %v5065_v9, %v4047_v8  ;;  %v5094_v12 = vld [vmem:[%s7923_s3 + $0x124] sm:$0xf] }
  0xaa   : > { %1379 = vmatpush.bf16.msra.mxu0 %v3916_v17  ;;  %v4105_v17 = vld [vmem:[%s7923_s3 + $0xa8] sm:$0xf0]  ;;  %1580 = vmatpush.bf16.msra.mxu2 %v4072_v15  ;;  %v5068_v15 = vld [vmem:[%s7923_s3 + $0x54] sm:$0xf] }
  0xab   : > { %1393 = vmatpush.bf16.msra.mxu1 %v3980_v18  ;;  %v4095_v18 = vld [vmem:[%s7923_s3 + $0x90] sm:$0xf]  ;;  %v4108_v19 = vor.u32 %v5078_v13, %v4105_v17  ;;  %v4171_v13 = vld [vmem:[%s7923_s3 + $0x128] sm:$0xf0] }
  0xac   : > { %v4096_v22 = vor.u32 %v5077_v20, %v4095_v18  ;;  %v4174_v18 = vor.u32 %v5094_v12, %v4171_v13  ;;  %v4137_v20 = vld [vmem:[%s7923_s3 + $0xe0] sm:$0xf]  ;;  %v4147_v12 = vld [vmem:[%s7923_s3 + $0xf8] sm:$0xf0]  ;;  %v5062_v13 = vld [vmem:[%s7923_s3 + $0x24] sm:$0xf] }
  0xae   : > { %1380 = vmatpush.bf16.msra.mxu0 %v3908_v26  ;;  %v5093_v26 = vld [vmem:[%s7923_s3 + $0x114] sm:$0xf0]  ;;  %1598 = vmatpush.bf16.msra.mxu3 %v4096_v22  ;;  %v5087_v22 = vld [vmem:[%s7923_s3 + $0xe4] sm:$0xf0] }
  0xaf   : > { %1394 = vmatpush.bf16.msra.mxu1 %v3972_v27  ;;  %v4162_v27 = vor.u32 %v5093_v26, %v4161_v25 }
  0xb2   : > { %1381 = vmatpush.bf16.msra.mxu0 %v3900_v33  ;;  %v4064_v33 = vor.u32 %v5069_v29, %v4063_v28  ;;  %v4039_v28 = vld [vmem:[%s7923_s3 + $0x20] sm:$0xf]  ;;  %v5063_v29 = vld [vmem:[%s7923_s3 + $0x24] sm:$0xf0] }
  0xb3   : > { %1395 = vmatpush.bf16.msra.mxu1 %v3964_v34  ;;  %v4097_v34 = vld [vmem:[%s7923_s3 + $0x98] sm:$0xf0] }
  0xb4   : > { %v6385_v35 = vpop.f32.mrf.mxu0  ;;  %1581 = vmatpush.bf16.msra.mxu2 %v4064_v33 }
  0xb5   : > { %1382 = vmatmul.bf16.vlgmr.msra.gmra.mxu0 %v5933_v48 }
  0xb6   : > { %1396 = vmatmul.bf16.vlgmr.msra.gmra.mxu1 %v6121_v24  ;;  %1622 = vmatpush.bf16.msrb.mxu0 %v4116_v6  ;;  %v5089_v6 = vld [vmem:[%s7923_s3 + $0xf4] sm:$0xf0] }
  0xb7   : > { %v6387_v37 = vpop.f32.mrf.mxu1  ;;  %1791 = vmatpush.bf16.msrb.mxu1 %v4178_v1  ;;  %v4146_v7 = vor.u32 %v5089_v6, %v4145_v40  ;;  %v4209_v40 = vld [vmem:[%s7923_s3 + $0x170] sm:$0xf]  ;;  %v5105_v6 = vld [vmem:[%s7923_s3 + $0x174] sm:$0xf0] }
  0xba   : > { %1623 = vmatpush.bf16.msrb.mxu0 %v4108_v19  ;;  %v4065_v19 = vld [vmem:[%s7923_s3 + $0x58] sm:$0xf0] }
  0xbb   : > { %1792 = vmatpush.bf16.msrb.mxu1 %v4170_v10  ;;  %v4068_v26 = vor.u32 %v5068_v15, %v4065_v19  ;;  %v5127_v19 = vld [vmem:[%s7923_s3 + $0x224] sm:$0xf0] }
  0xbc   : > { %v6389_v38 = vpop.f32.mrf.mxu2  ;;  %v1161_v42 = vpop.f32.mrf.mxu0 }
  0xbd   : > { %v1162_v48 = vadd.f32 %v1161_v42, %v380_v43  ;;  %v4087_v42 = vld [vmem:[%s7923_s3 + $0x80] sm:$0xf] }
  0xbe   : > { %v6396_v41 = vpop.f32.mrf.mxu3 }
  0xbf   : > { %v1175_v45 = vpop.f32.mrf.mxu1  ;;  %1793 = vmatpush.bf16.msrb.mxu1 %v4162_v27  ;;  %v4138_v27 = vor.u32 %v5087_v22, %v4137_v20  ;;  %v4201_v22 = vld [vmem:[%s7923_s3 + $0x160] sm:$0xf] }
  0xc0   : > { %v1176_v46 = vadd.f32 %v1175_v45, %v1162_v48  ;;  %v5075_v45 = vld [vmem:[%s7923_s3 + $0x84] sm:$0xf0] }
  0xc4   : > { %v1189_v24 = vpop.f32.mrf.mxu2 }
  0xc5   : > { %v1190_v51 = vadd.f32 %v1189_v24, %v1176_v46  ;;  %v381_v24 = vperm.slane %v6394_v39, 1  ;;  %v4291_v39 = vld [vmem:[%s7923_s3 + $0x210] sm:$0xf] }
  0xc6   : > { %v1203_v47 = vpop.f32.mrf.mxu3 }
  0xc7   : > { %v1204_v52 = vadd.f32 %v1203_v47, %v1190_v51  ;;  %v4100_v47 = vor.u32 %v5076_v31, %v4097_v34  ;;  %v4088_v51 = vor.u32 %v5075_v45, %v4087_v42  ;;  %v5092_v31 = vld [vmem:[%s7923_s3 + $0x114] sm:$0xf]  ;;  %v4040_v34 = vor.u32 %v5063_v29, %v4039_v28  ;;  %v4163_v42 = vld [vmem:[%s7923_s3 + $0x118] sm:$0xf0]  ;;  %v5066_v45 = vld [vmem:[%s7923_s3 + $0x44] sm:$0xf] }
  0xc9   : > { %1624 = vmatpush.bf16.msrb.mxu0 %v4100_v47  ;;  %1599 = vmatpush.bf16.msra.mxu3 %v4088_v51  ;;  %v4166_v47 = vor.u32 %v5092_v31, %v4163_v42  ;;  %v4129_v51 = vld [vmem:[%s7923_s3 + $0xd0] sm:$0xf]  ;;  %v4139_v31 = vld [vmem:[%s7923_s3 + $0xe8] sm:$0xf0]  ;;  %v4033_v42 = vld [vmem:[%s7923_s3 + $0x18] sm:$0xf0] }
  0xcd   : > { %1625 = vmatpush.bf16.msrb.mxu0 %v4092_v2 }
  0xd1   : > { %1817 = vmatpush.bf16.msra.mxu0 %v4182_v36  ;;  %v4024_v36 = vor.u32 %v5059_v30, %v4023_v3 }
  0xd2   : > { %v6401_v49 = vpop.f32.mrf.mxu0 }
  0xd3   : > { %v6403_v50 = vpop.f32.mrf.mxu1 }
  0xd5   : > { %1818 = vmatpush.bf16.msra.mxu0 %v4174_v18  ;;  %v4299_v18 = vld [vmem:[%s7923_s3 + $0x220] sm:$0xf] }
  0xd6   : > { %v4300_v20 = vor.u32 %v5127_v19, %v4299_v18 }
  0xd9   : > { %1819 = vmatpush.bf16.msra.mxu0 %v4166_v47  ;;  %v5101_v47 = vld [vmem:[%s7923_s3 + $0x154] sm:$0xf0] }
  0xda   : > { %v6405_v23 = vpop.f32.mrf.mxu2  ;;  %v1217_v53 = vpop.f32.mrf.mxu0 }
  0xdb   : > { %v1218_v54 = vadd.f32 %v1217_v53, %v1204_v52  ;;  %v6407_v21 = vpop.f32.mrf.mxu3  ;;  %v1231_v55 = vpop.f32.mrf.mxu1  ;;  %v5072_v52 = vld [vmem:[%s7923_s3 + $0x74] sm:$0xf]  ;;  %v4081_v53 = vld [vmem:[%s7923_s3 + $0x78] sm:$0xf0] }
  0xdd   : > { %v1232_v56 = vadd.f32 %v1231_v55, %v1218_v54  ;;  %v4084_v55 = vor.u32 %v5072_v52, %v4081_v53  ;;  %v5085_v52 = vld [vmem:[%s7923_s3 + $0xd4] sm:$0xf0]  ;;  %v4031_v53 = vld [vmem:[%s7923_s3 + $0x10] sm:$0xf] }
  0xdf   : > { %1605 = vmatpush.bf16.msrb.mxu3 %v4084_v55 }
  0xe2   : > { %v1245_v16 = vpop.f32.mrf.mxu2 }
  0xe3   : > { %v1246_v57 = vadd.f32 %v1245_v16, %v1232_v56  ;;  %v1259_v58 = vpop.f32.mrf.mxu3  ;;  %v4153_v56 = vld [vmem:[%s7923_s3 + $0x100] sm:$0xf]  ;;  %v5091_v16 = vld [vmem:[%s7923_s3 + $0x104] sm:$0xf0]  ;;  %1606 = vmatpush.bf16.msrb.mxu3 %v4076_v44  ;;  %v5129_v44 = vld [vmem:[%s7923_s3 + $0x234] sm:$0xf0] }
  0xe4   : > { %v4308_v9 = vor.u32 %v5129_v44, %v4307_v4  ;;  %v5082_v4 = vld [vmem:[%s7923_s3 + $0xc4] sm:$0xf] }
  0xe5   : > { %v1260_v59 = vadd.f32 %v1259_v58, %v1246_v57  ;;  %v4154_v57 = vor.u32 %v5091_v16, %v4153_v56  ;;  %v4055_v58 = vld [vmem:[%s7923_s3 + $0x40] sm:$0xf]  ;;  %v4130_v56 = vor.u32 %v5085_v52, %v4129_v51  ;;  %v5061_v16 = vld [vmem:[%s7923_s3 + $0x14] sm:$0xf0]  ;;  %v5084_v51 = vld [vmem:[%s7923_s3 + $0xd4] sm:$0xf] }
  0xe7   : > { %1794 = vmatpush.bf16.msrb.mxu1 %v4154_v57  ;;  %1607 = vmatpush.bf16.msrb.mxu3 %v4068_v26  ;;  %v5090_v57 = vld [vmem:[%s7923_s3 + $0x104] sm:$0xf] }
  0xe8   : > { %v5086_v26 = vld [vmem:[%s7923_s3 + $0xe4] sm:$0xf] }
  0xeb   : > { %1795 = vmatpush.bf16.msrb.mxu1 %v4146_v7  ;;  %v1160_v7 = vadd.f32 %v6385_v35, %v380_v43  ;;  %v4041_v43 = vld [vmem:[%s7923_s3 + $0x28] sm:$0xf0] }
  0xef   : > { %1796 = vmatpush.bf16.msrb.mxu1 %v4138_v27  ;;  %v1174_v27 = vadd.f32 %v6387_v37, %v1160_v7 }
  0xf1   : > { %v1188_v52 = vadd.f32 %v6389_v38, %v1174_v27  ;;  %v5145_v27 = vld [vmem:[%s7923_s3 + $0x2b4] sm:$0xf0] }
  0xf2   : > { %v6439_v5 = vpop.f32.mrf.mxu0 }
  0xf3   : > { %v6456_v14 = vpop.f32.mrf.mxu1  ;;  %1797 = vmatpush.bf16.msrb.mxu1 %v4130_v56 }
  0xf4   : > { %v1286_v28 = vadd.f32 %v6456_v14, %v381_v24  ;;  %v5125_v14 = vld [vmem:[%s7923_s3 + $0x214] sm:$0xf0] }
  0xfa   : > { %v6482_v32 = vpop.f32.mrf.mxu2  ;;  %v1273_v48 = vpop.f32.mrf.mxu0 }
  0xfb   : > { %v6494_v46 = vpop.f32.mrf.mxu3  ;;  %v6502_v54 = vadd.f32 %v1273_v48, %v1260_v59  ;;  %v5067_v59 = vld [vmem:[%s7923_s3 + $0x44] sm:$0xf0]  ;;  %v1287_v61 = vpop.f32.mrf.mxu1  ;;  %v4057_v48 = vld [vmem:[%s7923_s3 + $0x48] sm:$0xf0] }
  0xfc   : > { %v4056_v62 = vor.u32 %v5067_v59, %v4055_v58  ;;  %v1288_v1 = vadd.f32 %v1287_v61, %v381_v24  ;;  %v4060_v55 = vor.u32 %v5066_v45, %v4057_v48  ;;  %v4155_v58 = vld [vmem:[%s7923_s3 + $0x108] sm:$0xf0]  ;;  %v4032_v59 = vor.u32 %v5061_v16, %v4031_v53  ;;  %v5064_v61 = vld [vmem:[%s7923_s3 + $0x34] sm:$0xf]  ;;  %v4193_v48 = vld [vmem:[%s7923_s3 + $0x150] sm:$0xf] }
  0xfd   : > { %v4158_v60 = vor.u32 %v5090_v57, %v4155_v58  ;;  %v4142_v45 = vor.u32 %v5086_v26, %v4139_v31  ;;  %v4292_v24 = vor.u32 %v5125_v14, %v4291_v39  ;;  %v1300_v53 = vadd.f32 %v6482_v32, %v1286_v28  ;;  %v4131_v16 = vld [vmem:[%s7923_s3 + $0xd8] sm:$0xf0]  ;;  %v5058_v57 = vld [vmem:[%s7923_s3 + $0x4] sm:$0xf]  ;;  %v4025_v58 = vld [vmem:[%s7923_s3 + $0x8] sm:$0xf0] }
  0xfe   : > { %1582 = vmatpush.bf16.msra.mxu2 %v4056_v62  ;;  %1608 = vmatpush.bf16.msrb.mxu3 %v4060_v55  ;;  %v4049_v62 = vld [vmem:[%s7923_s3 + $0x38] sm:$0xf0]  ;;  %v4194_v56 = vor.u32 %v5101_v47, %v4193_v48  ;;  %v4028_v32 = vor.u32 %v5058_v57, %v4025_v58  ;;  %v5104_v28 = vld [vmem:[%s7923_s3 + $0x174] sm:$0xf]  ;;  %v1404_v14 = vmax.f32 %v6502_v54, 0.0 }
  0xff   : > { %v4052_v63 = vor.u32 %v5064_v61, %v4049_v62  ;;  %1820 = vmatpush.bf16.msra.mxu0 %v4158_v60  ;;  %v4134_v60 = vor.u32 %v5084_v51, %v4131_v16  ;;  %v4283_v61 = vld [vmem:[%s7923_s3 + $0x200] sm:$0xf]  ;;  %v5123_v62 = vld [vmem:[%s7923_s3 + $0x204] sm:$0xf0]  ;;  %v1314_v3 = vadd.f32 %v6494_v46, %v1300_v53  ;;  %v4309_v39 = vld [vmem:[%s7923_s3 + $0x238] sm:$0xf0] }
 0x100   : > { %v4365_v54 = vld [vmem:[%s7923_s3 + $0x2a0] sm:$0xf]  ;;  %v5143_v58 = vld [vmem:[%s7923_s3 + $0x2a4] sm:$0xf0] }
 0x102   : > { %v1301_v10 = vpop.f32.mrf.mxu2  ;;  %1583 = vmatpush.bf16.msra.mxu2 %v4048_v11  ;;  %1609 = vmatpush.bf16.msrb.mxu3 %v4052_v63  ;;  %v5088_v11 = vld [vmem:[%s7923_s3 + $0xf4] sm:$0xf] }
 0x103   : > { %v1302_v17 = vadd.f32 %v1301_v10, %v1288_v1  ;;  %v1315_v25 = vpop.f32.mrf.mxu3  ;;  %v5083_v1 = vld [vmem:[%s7923_s3 + $0xc4] sm:$0xf0]  ;;  %v4210_v10 = vor.u32 %v5105_v6, %v4209_v40  ;;  %v4150_v35 = vor.u32 %v5088_v11, %v4147_v12 }
 0x104   : > { %v4122_v2 = vor.u32 %v5083_v1, %v4121_v0  ;;  %v4284_v0 = vor.u32 %v5123_v62, %v4283_v61  ;;  %v5099_v1 = vld [vmem:[%s7923_s3 + $0x144] sm:$0xf0]  ;;  %v5126_v62 = vld [vmem:[%s7923_s3 + $0x224] sm:$0xf] }
 0x105   : > { %v6575_v33 = vadd.f32 %v1315_v25, %v1302_v17  ;;  %v4044_v17 = vor.u32 %v5062_v13, %v4041_v43  ;;  %1821 = vmatpush.bf16.msra.mxu0 %v4150_v35  ;;  %v5103_v25 = vld [vmem:[%s7923_s3 + $0x164] sm:$0xf0] }
 0x106   : > { %1584 = vmatpush.bf16.msra.mxu2 %v4040_v34  ;;  %1798 = vmatpush.bf16.msrb.mxu1 %v4122_v2  ;;  %v4202_v29 = vor.u32 %v5103_v25, %v4201_v22  ;;  %v5060_v34 = vld [vmem:[%s7923_s3 + $0x14] sm:$0xf]  ;;  %v1202_v2 = vadd.f32 %v6396_v41, %v1188_v52 }
 0x107   : > { %1610 = vmatpush.bf16.msrb.mxu3 %v4044_v17  ;;  %v4036_v37 = vor.u32 %v5060_v34, %v4033_v42 }
 0x108   : > { %v1216_v40 = vadd.f32 %v6401_v49, %v1202_v2 }
 0x109   : > { %1822 = vmatpush.bf16.msra.mxu0 %v4142_v45 }
 0x10a   : > { %1585 = vmatpush.bf16.msra.mxu2 %v4032_v59  ;;  %2016 = vmatpush.bf16.msra.mxu1 %v4308_v9  ;;  %v1230_v46 = vadd.f32 %v6403_v50, %v1216_v40  ;;  %v5141_v40 = vld [vmem:[%s7923_s3 + $0x294] sm:$0xf0] }
 0x10b   : > { %1611 = vmatpush.bf16.msrb.mxu3 %v4036_v37  ;;  %v5128_v37 = vld [vmem:[%s7923_s3 + $0x234] sm:$0xf] }
 0x10c   : > { %v4312_v57 = vor.u32 %v5128_v37, %v4309_v39  ;;  %v3314_v37 = vlaneseq }
 0x10d   : > { %1823 = vmatpush.bf16.msra.mxu0 %v4134_v60 }
 0x10e   : > { %1586 = vmatpush.bf16.msra.mxu2 %v4024_v36  ;;  %2017 = vmatpush.bf16.msra.mxu1 %v4300_v20  ;;  %v4123_v36 = vld [vmem:[%s7923_s3 + $0xc8] sm:$0xf0]  ;;  %vm6905_vm2 = vcmp.lt.s32.totalorder %v3314_v37, 192  ;;  %vm3325_vm3 = vcmp.ge.s32.totalorder %v3314_v37, 64  ;;  %vm3326_vm4 = vcmp.lt.s32.totalorder %v3314_v37, 256 }
 0x10f   : > { %1612 = vmatpush.bf16.msrb.mxu3 %v4028_v32  ;;  %v4126_v44 = vor.u32 %v5082_v4, %v4123_v36  ;;  %v4357_v4 = vld [vmem:[%s7923_s3 + $0x290] sm:$0xf]  ;;  %v4366_v36 = vor.u32 %v5143_v58, %v4365_v54  ;;  %v5118_v54 = vld [vmem:[%s7923_s3 + $0x1e4] sm:$0xf]  ;;  %v4367_v58 = vld [vmem:[%s7923_s3 + $0x2a8] sm:$0xf0] }
 0x110   : > { %vm3327_vm5 = vmand %vm3325_vm3, %vm3326_vm4 }
 0x111   : > { %1824 = vmatpush.bf16.msra.mxu0 %v4126_v44 }
 0x112   : > { %v6637_v8 = vpop.f32.mrf.mxu0  ;;  %1808 = vmatpush.bf16.msrb.mxu2 %v4210_v10  ;;  %2018 = vmatpush.bf16.msra.mxu1 %v4292_v24  ;;  %v1244_v10 = vadd.f32 %v6405_v23, %v1230_v46  ;;  %v4275_v23 = vld [vmem:[%s7923_s3 + $0x1f0] sm:$0xf] }
 0x113   : > { %v6648_v15 = vpop.f32.mrf.mxu1  ;;  %v1328_v41 = vadd.f32 %v6637_v8, %v1314_v3  ;;  %v4259_v3 = vld [vmem:[%s7923_s3 + $0x1d0] sm:$0xf] }
 0x114   : > { %v1258_v12 = vadd.f32 %v6407_v21, %v1244_v10  ;;  %v5121_v21 = vld [vmem:[%s7923_s3 + $0x1f4] sm:$0xf0] }
 0x115   : > { %v1342_v7 = vadd.f32 %v6648_v15, %v1328_v41  ;;  %v4276_v48 = vor.u32 %v5121_v21, %v4275_v23  ;;  %v5100_v41 = vld [vmem:[%s7923_s3 + $0x154] sm:$0xf]  ;;  %v4243_v21 = vld [vmem:[%s7923_s3 + $0x1b0] sm:$0xf] }
 0x116   : > { %1809 = vmatpush.bf16.msrb.mxu2 %v4202_v29  ;;  %2019 = vmatpush.bf16.msra.mxu1 %v4284_v0  ;;  %v1272_v17 = vadd.f32 %v6439_v5, %v1258_v12  ;;  %v4373_v5 = vld [vmem:[%s7923_s3 + $0x2b0] sm:$0xf]  ;;  %v4211_v29 = vld [vmem:[%s7923_s3 + $0x178] sm:$0xf0] }
 0x117   : > { %v4214_v53 = vor.u32 %v5104_v28, %v4211_v29  ;;  %v4374_v16 = vor.u32 %v5145_v27, %v4373_v5  ;;  %v5113_v5 = vld [vmem:[%s7923_s3 + $0x1b4] sm:$0xf0]  ;;  %v4277_v29 = vld [vmem:[%s7923_s3 + $0x1f8] sm:$0xf0] }
 0x118   : > { %v1402_v22 = vmax.f32 %v1272_v17, 0.0  ;;  %v4244_v39 = vor.u32 %v5113_v5, %v4243_v21  ;;  %v5112_v5 = vld [vmem:[%s7923_s3 + $0x1b4] sm:$0xf] }
 0x11a   : > { %v1329_v55 = vpop.f32.mrf.mxu0  ;;  %1810 = vmatpush.bf16.msrb.mxu2 %v4194_v56  ;;  %v1355_v6 = vpop.f32.mrf.mxu2  ;;  %v5119_v56 = vld [vmem:[%s7923_s3 + $0x1e4] sm:$0xf0]  ;;  %v1410_v0 = vrot.slane %v1402_v22, 1 }
 0x11b   : > { %v1330_v59 = vadd.f32 %v1329_v55, %v6575_v33  ;;  %v1343_v38 = vpop.f32.mrf.mxu1  ;;  %v4185_v33 = vld [vmem:[%s7923_s3 + $0x140] sm:$0xf]  ;;  %v1369_v9 = vpop.f32.mrf.mxu3  ;;  %v1356_v11 = vadd.f32 %v1355_v6, %v1342_v7  ;;  %v4195_v6 = vld [vmem:[%s7923_s3 + $0x158] sm:$0xf0]  ;;  %v5124_v7 = vld [vmem:[%s7923_s3 + $0x214] sm:$0xf] }
 0x11c   : > { %v4186_v30 = vor.u32 %v5099_v1, %v4185_v33  ;;  %v4267_v55 = vld [vmem:[%s7923_s3 + $0x1e0] sm:$0xf]  ;;  %v1414_v10 = vmax.f32 %v1402_v22, %v1410_v0  ;;  %v4198_v12 = vor.u32 %v5100_v41, %v4195_v6  ;;  %v5135_v0 = vld [vmem:[%s7923_s3 + $0x264] sm:$0xf0] }
 0x11d   : > { %v1344_v63 = vadd.f32 %v1343_v38, %v1330_v59  ;;  %v1370_v13 = vadd.f32 %v1369_v9, %v1356_v11  ;;  %v5102_v59 = vld [vmem:[%s7923_s3 + $0x164] sm:$0xf]  ;;  %v4203_v38 = vld [vmem:[%s7923_s3 + $0x168] sm:$0xf0]  ;;  %v4268_v33 = vor.u32 %v5119_v56, %v4267_v55  ;;  %v4293_v9 = vld [vmem:[%s7923_s3 + $0x218] sm:$0xf0] }
 0x11e   : > { %1811 = vmatpush.bf16.msrb.mxu2 %v4186_v30  ;;  %v4206_v2 = vor.u32 %v5102_v59, %v4203_v38  ;;  %v5117_v30 = vld [vmem:[%s7923_s3 + $0x1d4] sm:$0xf0]  ;;  %v4296_v17 = vor.u32 %v5124_v7, %v4293_v9  ;;  %v5111_v56 = vld [vmem:[%s7923_s3 + $0x1a4] sm:$0xf0]  ;;  %v4333_v38 = vld [vmem:[%s7923_s3 + $0x260] sm:$0xf] }
 0x11f   : > { %v4260_v11 = vor.u32 %v5117_v30, %v4259_v3  ;;  %v5109_v30 = vld [vmem:[%s7923_s3 + $0x194] sm:$0xf0]  ;;  %v4334_v41 = vor.u32 %v5135_v0, %v4333_v38  ;;  %v5108_v0 = vld [vmem:[%s7923_s3 + $0x194] sm:$0xf] }
 0x120   : > { %v5133_v7 = vld [vmem:[%s7923_s3 + $0x254] sm:$0xf0] }
 0x122   : > { %v1357_v35 = vpop.f32.mrf.mxu2 }
 0x123   : > { %v1358_v19 = vadd.f32 %v1357_v35, %v1344_v63  ;;  %v1371_v20 = vpop.f32.mrf.mxu3  ;;  %v4301_v63 = vld [vmem:[%s7923_s3 + $0x228] sm:$0xf0]  ;;  %v5115_v35 = vld [vmem:[%s7923_s3 + $0x1c4] sm:$0xf0] }
 0x124   : > { %v4304_v44 = vor.u32 %v5126_v62, %v4301_v63 }
 0x125   : > { %v1372_v25 = vadd.f32 %v1371_v20, %v1358_v19  ;;  %v4187_v19 = vld [vmem:[%s7923_s3 + $0x148] sm:$0xf0]  ;;  %v5139_v20 = vld [vmem:[%s7923_s3 + $0x284] sm:$0xf0] }
 0x132   : > { %v1383_v43 = vpop.f32.mrf.mxu0 }
 0x133   : > { %v1384_v18 = vadd.f32 %v1383_v43, %v1370_v13  ;;  %v1397_v49 = vpop.f32.mrf.mxu1  ;;  %v4251_v13 = vld [vmem:[%s7923_s3 + $0x1c0] sm:$0xf]  ;;  %v4358_v43 = vor.u32 %v5141_v40, %v4357_v4  ;;  %v5116_v4 = vld [vmem:[%s7923_s3 + $0x1d4] sm:$0xf]  ;;  %v4359_v40 = vld [vmem:[%s7923_s3 + $0x298] sm:$0xf0] }
 0x135   : > { %v1398_v8 = vadd.f32 %v1397_v49, %v1384_v18  ;;  %v4349_v18 = vld [vmem:[%s7923_s3 + $0x280] sm:$0xf]  ;;  %v5098_v49 = vld [vmem:[%s7923_s3 + $0x144] sm:$0xf] }
 0x136   : > { %v4190_v23 = vor.u32 %v5098_v49, %v4187_v19  ;;  %v4350_v27 = vor.u32 %v5139_v20, %v4349_v18  ;;  %v4405_v49 = vld [vmem:[%s7923_s3 + $0x2f0] sm:$0xf]  ;;  %v5153_v19 = vld [vmem:[%s7923_s3 + $0x2f4] sm:$0xf0]  ;;  %v4317_v20 = vld [vmem:[%s7923_s3 + $0x240] sm:$0xf] }
 0x137   : > { %v1403_v50 = vmax.f32 %v1398_v8, 0.0  ;;  %v4406_v21 = vor.u32 %v5153_v19, %v4405_v49  ;;  %v5152_v49 = vld [vmem:[%s7923_s3 + $0x2f4] sm:$0xf]  ;;  %v4407_v19 = vld [vmem:[%s7923_s3 + $0x2f8] sm:$0xf0] }
 0x139   : > { %v1406_v15 = vpack.c.bf16 %v1403_v50, %v1402_v22  ;;  %v1411_v31 = vrot.slane %v1403_v50, 1  ;;  %v5122_v22 = vld [vmem:[%s7923_s3 + $0x204] sm:$0xf] }
 0x13a   : > { %v1385_v26 = vpop.f32.mrf.mxu0 }
 0x13b   : > { %v1450_v34 = vunpack.c.l.b16 %v1406_v15  ;;  %v1451_v42 = vunpack.c.h.b16 %v1406_v15  ;;  %v1386_v45 = vadd.f32 %v1385_v26, %v1372_v25  ;;  %v1399_v24 = vpop.f32.mrf.mxu1  ;;  %v1415_v60 = vmax.f32 %v1403_v50, %v1411_v31  ;;  %v4285_v50 = vld [vmem:[%s7923_s3 + $0x208] sm:$0xf0]  ;;  %v5120_v26 = vld [vmem:[%s7923_s3 + $0x1f4] sm:$0xf] }
 0x13c   : > { %v1418_v25 = vrot.slane %v1414_v10, 3  ;;  %v4252_v15 = vor.u32 %v5115_v35, %v4251_v13  ;;  %v4288_v28 = vor.u32 %v5122_v22, %v4285_v50  ;;  %v5144_v31 = vld [vmem:[%s7923_s3 + $0x2b4] sm:$0xf]  ;;  %v5114_v13 = vld [vmem:[%s7923_s3 + $0x1c4] sm:$0xf] }
 0x13d   : > { %v6760_v47 = vpack.c.b16 %v1450_v34, %v1450_v34  ;;  %v6762_v51 = vpack.c.b16 %v1451_v42, %v1451_v42  ;;  %v1400_v52 = vadd.f32 %v1399_v24, %v1386_v45  ;;  %v1419_v46 = vrot.slane %v1415_v60, 3  ;;  %v4375_v34 = vld [vmem:[%s7923_s3 + $0x2b8] sm:$0xf0]  ;;  %v4341_v45 = vld [vmem:[%s7923_s3 + $0x270] sm:$0xf] }
 0x13e   : > { %v4235_v24 = vld [vmem:[%s7923_s3 + $0x1a0] sm:$0xf]  ;;  %v4378_v55 = vor.u32 %v5144_v31, %v4375_v34  ;;  %v4253_v35 = vld [vmem:[%s7923_s3 + $0x1c8] sm:$0xf0]  ;;  %v5131_v22 = vld [vmem:[%s7923_s3 + $0x244] sm:$0xf0] }
 0x13f   : > { %v1405_v32 = vmax.f32 %v1400_v52, 0.0  ;;  %1587 = vmatmul.bf16.vlgmr.msra.gmra.mxu2 %v6760_v47  ;;  %4117 = vmatmul.msk.bf16.vlgmr.msra.gmra.mxu3 %vm1575_vm0, %v6762_v51  ;;  %v6786_v61 = vshrl.u32 %v6760_v47, 16  ;;  %v1423_v8 = vmax.f32 %v1415_v60, %v1419_v46  ;;  %v6880_v52 = vshrl.u32 %v6762_v51, 16  ;;  %v4325_v46 = vld [vmem:[%s7923_s3 + $0x250] sm:$0xf] }
 0x140   : > { %4118 = vmatmul.msk.bf16.vlgmr.msrb.gmra.mxu0 %vm1575_vm0, %v6762_v51  ;;  %1999 = vmatpush.bf16.msra.mxu3 %v4276_v48  ;;  %v1422_v48 = vmax.f32 %v1414_v10, %v1418_v25  ;;  %v1874_v62 = vrot.slane %v6762_v51, 1  ;;  %v4236_v63 = vor.u32 %v5111_v56, %v4235_v24  ;;  %v4326_v18 = vor.u32 %v5133_v7, %v4325_v46  ;;  %v4397_v31 = vld [vmem:[%s7923_s3 + $0x2e0] sm:$0xf]  ;;  %v5151_v34 = vld [vmem:[%s7923_s3 + $0x2e4] sm:$0xf0] }
 0x141   : > { %v6796_v1 = vpack.c.bf16 %v1405_v32, %v1404_v14  ;;  %1799 = vmatmul.bf16.vlgmr.msrb.gmra.mxu1 %v6786_v61  ;;  %1834 = vmatpush.bf16.msra.mxu2 %v4214_v53  ;;  %v3311_v42 = vrot.slane %v1423_v8, 7  ;;  %v5137_v14 = vld [vmem:[%s7923_s3 + $0x274] sm:$0xf0]  ;;  %v4280_v53 = vor.u32 %v5120_v26, %v4277_v29  ;;  %v4256_v50 = vor.u32 %v5114_v13, %v4253_v35  ;;  %v4245_v26 = vld [vmem:[%s7923_s3 + $0x1b8] sm:$0xf0] }
 0x142   : > { %2207 = vmatpush.bf16.msrb.mxu1 %v4374_v16  ;;  %2042 = vmatpush.bf16.msrb.mxu0 %v4312_v57  ;;  %v4269_v16 = vld [vmem:[%s7923_s3 + $0x1e8] sm:$0xf0]  ;;  %v5142_v57 = vld [vmem:[%s7923_s3 + $0x2a4] sm:$0xf]  ;;  %v4342_v59 = vor.u32 %v5137_v14, %v4341_v45  ;;  %v4343_v29 = vld [vmem:[%s7923_s3 + $0x278] sm:$0xf0] }
 0x143   : > { %v3312_v60 = vsel %vm1634_vm1, %v1422_v48, %v3311_v42  ;;  %v4370_v3 = vor.u32 %v5142_v57, %v4367_v58  ;;  %v1873_v45 = vrot.slane %v6760_v47, 1  ;;  %v4495_v14 = vld [vmem:[%s7923_s3 + $0x3a0] sm:$0xf]  ;;  %v5175_v24 = vld [vmem:[%s7923_s3 + $0x3a4] sm:$0xf0] }
 0x144   : > { %2000 = vmatpush.bf16.msra.mxu3 %v4268_v33  ;;  %v4227_v33 = vld [vmem:[%s7923_s3 + $0x190] sm:$0xf]  ;;  %3318 = vst.msk [vmem:[%s6936_s12] sm:$0x3] %vm6905_vm2, %v3312_v60  ;;  %v4237_v56 = vld [vmem:[%s7923_s3 + $0x1a8] sm:$0xf0]  ;;  %v4496_v38 = vor.u32 %v5175_v24, %v4495_v14 }
 0x145   : > { %1835 = vmatpush.bf16.msra.mxu2 %v4206_v2  ;;  %v4272_v2 = vor.u32 %v5118_v54, %v4269_v16  ;;  %v4228_v6 = vor.u32 %v5109_v30, %v4227_v33  ;;  %v5134_v54 = vld [vmem:[%s7923_s3 + $0x264] sm:$0xf]  ;;  %v4335_v16 = vld [vmem:[%s7923_s3 + $0x268] sm:$0xf0]  ;;  %v4389_v57 = vld [vmem:[%s7923_s3 + $0x2d0] sm:$0xf] }
 0x146   : > { %2208 = vmatpush.bf16.msrb.mxu1 %v4366_v36  ;;  %2043 = vmatpush.bf16.msrb.mxu0 %v4304_v44  ;;  %v4261_v36 = vld [vmem:[%s7923_s3 + $0x1d8] sm:$0xf0]  ;;  %v5140_v44 = vld [vmem:[%s7923_s3 + $0x294] sm:$0xf]  ;;  %v5149_v58 = vld [vmem:[%s7923_s3 + $0x2d4] sm:$0xf0]  ;;  %v4338_v33 = vor.u32 %v5134_v54, %v4335_v16 }
 0x147   : > { %v4264_v9 = vor.u32 %v5116_v4, %v4261_v36  ;;  %v4362_v10 = vor.u32 %v5140_v44, %v4359_v40  ;;  %v4487_v32 = vld [vmem:[%s7923_s3 + $0x390] sm:$0xf]  ;;  %v4327_v30 = vld [vmem:[%s7923_s3 + $0x258] sm:$0xf0]  ;;  %v4381_v4 = vld [vmem:[%s7923_s3 + $0x2c0] sm:$0xf] }
 0x148   : > { %2001 = vmatpush.bf16.msra.mxu3 %v4260_v11  ;;  %v4219_v11 = vld [vmem:[%s7923_s3 + $0x180] sm:$0xf]  ;;  %v5147_v36 = vld [vmem:[%s7923_s3 + $0x2c4] sm:$0xf0]  ;;  %v4471_v44 = vld [vmem:[%s7923_s3 + $0x370] sm:$0xf] }
 0x149   : > { %1836 = vmatpush.bf16.msra.mxu2 %v4198_v12  ;;  %v5107_v12 = vld [vmem:[%s7923_s3 + $0x184] sm:$0xf0]  ;;  %v4382_v13 = vor.u32 %v5147_v36, %v4381_v4  ;;  %v4319_v35 = vld [vmem:[%s7923_s3 + $0x248] sm:$0xf0]  ;;  %v4455_v14 = vld [vmem:[%s7923_s3 + $0x350] sm:$0xf] }
 0x14a   : > { %2209 = vmatpush.bf16.msrb.mxu1 %v4358_v43  ;;  %2044 = vmatpush.bf16.msrb.mxu0 %v4296_v17  ;;  %v5138_v43 = vld [vmem:[%s7923_s3 + $0x284] sm:$0xf]  ;;  %v4351_v17 = vld [vmem:[%s7923_s3 + $0x288] sm:$0xf0]  ;;  %v4220_v8 = vor.u32 %v5107_v12, %v4219_v11  ;;  %v5171_v46 = vld [vmem:[%s7923_s3 + $0x384] sm:$0xf0] }
 0x14b   : > { %v4354_v25 = vor.u32 %v5138_v43, %v4351_v17  ;;  %v5130_v11 = vld [vmem:[%s7923_s3 + $0x244] sm:$0xf]  ;;  %v4569_v43 = vld [vmem:[%s7923_s3 + $0x430] sm:$0xf]  ;;  %v5193_v17 = vld [vmem:[%s7923_s3 + $0x434] sm:$0xf0] }
 0x14c   : > { %2002 = vmatpush.bf16.msra.mxu3 %v4252_v15  ;;  %v4503_v15 = vld [vmem:[%s7923_s3 + $0x3b0] sm:$0xf]  ;;  %v5165_v24 = vld [vmem:[%s7923_s3 + $0x354] sm:$0xf0]  ;;  %v4383_v36 = vld [vmem:[%s7923_s3 + $0x2c8] sm:$0xf0] }
 0x14d   : > { %1837 = vmatpush.bf16.msra.mxu2 %v4190_v23  ;;  %v5177_v23 = vld [vmem:[%s7923_s3 + $0x3b4] sm:$0xf0] }
 0x14e   : > { %2210 = vmatpush.bf16.msrb.mxu1 %v4350_v27  ;;  %2045 = vmatpush.bf16.msrb.mxu0 %v4288_v28  ;;  %v5136_v27 = vld [vmem:[%s7923_s3 + $0x274] sm:$0xf]  ;;  %v4318_v28 = vor.u32 %v5131_v22, %v4317_v20  ;;  %v4504_v42 = vor.u32 %v5177_v23, %v4503_v15  ;;  %v4505_v22 = vld [vmem:[%s7923_s3 + $0x3b8] sm:$0xf0]  ;;  %v4570_v23 = vor.u32 %v5193_v17, %v4569_v43  ;;  %v5189_v54 = vld [vmem:[%s7923_s3 + $0x414] sm:$0xf0] }
 0x14f   : > { %1613 = vmatmul.bf16.vlgmr.msrb.gmra.mxu3 %v6760_v47  ;;  %4215 = vmatmul.msk.bf16.vlgmr.msrb.gmra.mxu2 %vm1575_vm0, %v6880_v52  ;;  %v4346_v48 = vor.u32 %v5136_v27, %v4343_v29  ;;  %v5191_v27 = vld [vmem:[%s7923_s3 + $0x424] sm:$0xf0] }
 0x150   : > { %1825 = vmatmul.bf16.vlgmr.msra.gmra.mxu0 %v6786_v61  ;;  %2003 = vmatpush.bf16.msra.mxu3 %v4244_v39  ;;  %v4248_v39 = vor.u32 %v5112_v5, %v4245_v26  ;;  %v4410_v5 = vor.u32 %v5152_v49, %v4407_v19  ;;  %v4561_v26 = vld [vmem:[%s7923_s3 + $0x420] sm:$0xf] }
 0x151   : > { %2025 = vmatpush.bf16.msrb.mxu2 %v4280_v53  ;;  %4313 = vmatmul.msk.bf16.vlgmr.msra.gmra.mxu1 %vm1575_vm0, %v1874_v62  ;;  %v4398_v53 = vor.u32 %v5151_v34, %v4397_v31  ;;  %v5150_v31 = vld [vmem:[%s7923_s3 + $0x2e4] sm:$0xf]  ;;  %v4399_v34 = vld [vmem:[%s7923_s3 + $0x2e8] sm:$0xf0]  ;;  %v4431_v19 = vld [vmem:[%s7923_s3 + $0x320] sm:$0xf] }
 0x152   : > { %2233 = vmatpush.bf16.msra.mxu0 %v4378_v55  ;;  %2211 = vmatpush.bf16.msrb.mxu1 %v4342_v59  ;;  %v5110_v55 = vld [vmem:[%s7923_s3 + $0x1a4] sm:$0xf]  ;;  %v2081_v59 = vrot.slane %v6786_v61, 1 }
 0x153   : > { %v4240_v60 = vor.u32 %v5110_v55, %v4237_v56  ;;  %v4402_v55 = vor.u32 %v5150_v31, %v4399_v34  ;;  %v4553_v56 = vld [vmem:[%s7923_s3 + $0x410] sm:$0xf]  ;;  %v5164_v31 = vld [vmem:[%s7923_s3 + $0x354] sm:$0xf]  ;;  %v4457_v34 = vld [vmem:[%s7923_s3 + $0x358] sm:$0xf0] }
 0x154   : > { %2004 = vmatpush.bf16.msra.mxu3 %v4236_v63  ;;  %v5173_v63 = vld [vmem:[%s7923_s3 + $0x394] sm:$0xf0] }
 0x155   : > { %2026 = vmatpush.bf16.msrb.mxu2 %v4272_v2  ;;  %v4390_v2 = vor.u32 %v5149_v58, %v4389_v57  ;;  %v4488_v40 = vor.u32 %v5173_v63, %v4487_v32  ;;  %v4456_v57 = vor.u32 %v5165_v24, %v4455_v14  ;;  %v5148_v58 = vld [vmem:[%s7923_s3 + $0x2d4] sm:$0xf]  ;;  %v4489_v32 = vld [vmem:[%s7923_s3 + $0x398] sm:$0xf0]  ;;  %v4447_v63 = vld [vmem:[%s7923_s3 + $0x340] sm:$0xf] }
 0x156   : > { %2234 = vmatpush.bf16.msra.mxu0 %v4370_v3  ;;  %2212 = vmatpush.bf16.msrb.mxu1 %v4334_v41  ;;  %v5132_v3 = vld [vmem:[%s7923_s3 + $0x254] sm:$0xf]  ;;  %v5169_v41 = vld [vmem:[%s7923_s3 + $0x374] sm:$0xf0] }
 0x157   : > { %v4330_v12 = vor.u32 %v5132_v3, %v4327_v30  ;;  %v5187_v3 = vld [vmem:[%s7923_s3 + $0x404] sm:$0xf0]  ;;  %v5146_v30 = vld [vmem:[%s7923_s3 + $0x2c4] sm:$0xf] }
 0x158   : > { %2005 = vmatpush.bf16.msra.mxu3 %v4228_v6  ;;  %v4479_v6 = vld [vmem:[%s7923_s3 + $0x380] sm:$0xf] }
 0x159   : > { %2027 = vmatpush.bf16.msrb.mxu2 %v4264_v9  ;;  %v5106_v9 = vld [vmem:[%s7923_s3 + $0x184] sm:$0xf]  ;;  %v4480_v20 = vor.u32 %v5171_v46, %v4479_v6  ;;  %v5161_v6 = vld [vmem:[%s7923_s3 + $0x334] sm:$0xf0]  ;;  %v5168_v46 = vld [vmem:[%s7923_s3 + $0x374] sm:$0xf] }
 0x15a   : > { %2235 = vmatpush.bf16.msra.mxu0 %v4362_v10  ;;  %2213 = vmatpush.bf16.msrb.mxu1 %v4326_v18  ;;  %v4221_v10 = vld [vmem:[%s7923_s3 + $0x188] sm:$0xf0]  ;;  %v4472_v18 = vor.u32 %v5169_v41, %v4471_v44  ;;  %v5170_v44 = vld [vmem:[%s7923_s3 + $0x384] sm:$0xf]  ;;  %v4439_v41 = vld [vmem:[%s7923_s3 + $0x330] sm:$0xf] }
 0x15b   : > { %v4224_v15 = vor.u32 %v5106_v9, %v4221_v10  ;;  %v4473_v9 = vld [vmem:[%s7923_s3 + $0x378] sm:$0xf0]  ;;  %v5192_v10 = vld [vmem:[%s7923_s3 + $0x434] sm:$0xf]  ;;  %v4440_v17 = vor.u32 %v5161_v6, %v4439_v41 }
 0x15c   : > { %2006 = vmatpush.bf16.msra.mxu3 %v4220_v8  ;;  %v5176_v8 = vld [vmem:[%s7923_s3 + $0x3b4] sm:$0xf]  ;;  %v4539_v41 = vld [vmem:[%s7923_s3 + $0x3f8] sm:$0xf0] }
 0x15d   : > { %2028 = vmatpush.bf16.msrb.mxu2 %v4256_v50  ;;  %v4463_v50 = vld [vmem:[%s7923_s3 + $0x360] sm:$0xf] }
 0x15e   : > { %2236 = vmatpush.bf16.msra.mxu0 %v4354_v25  ;;  %2214 = vmatpush.bf16.msrb.mxu1 %v4318_v28  ;;  %v5167_v25 = vld [vmem:[%s7923_s3 + $0x364] sm:$0xf0]  ;;  %v4508_v28 = vor.u32 %v5176_v8, %v4505_v22 }
 0x15f   : > { %4216 = vmatmul.msk.bf16.vlgmr.msra.gmra.mxu2 %vm1575_vm0, %v6880_v52  ;;  %2007 = vmatmul.bf16.vlgmr.msra.gmra.mxu3 %v1873_v45  ;;  %v4464_v29 = vor.u32 %v5167_v25, %v4463_v50  ;;  %v5159_v8 = vld [vmem:[%s7923_s3 + $0x324] sm:$0xf0]  ;;  %v4465_v50 = vld [vmem:[%s7923_s3 + $0x368] sm:$0xf0]  ;;  %v5190_v25 = vld [vmem:[%s7923_s3 + $0x424] sm:$0xf] }
 0x160   : > { %2224 = vmatpush.bf16.msrb.mxu3 %v4406_v21  ;;  %4314 = vmatmul.msk.bf16.vlgmr.msrb.gmra.mxu0 %vm1575_vm0, %v1874_v62  ;;  %v4229_v62 = vld [vmem:[%s7923_s3 + $0x198] sm:$0xf0]  ;;  %v4322_v21 = vor.u32 %v5130_v11, %v4319_v35  ;;  %v5185_v35 = vld [vmem:[%s7923_s3 + $0x3f4] sm:$0xf0] }
 0x161   : > { %2029 = vmatpush.bf16.msrb.mxu2 %v4248_v39  ;;  %2215 = vmatmul.bf16.vlgmr.msrb.gmra.mxu1 %v2081_v59  ;;  %v4232_v7 = vor.u32 %v5108_v0, %v4229_v62  ;;  %v4497_v39 = vld [vmem:[%s7923_s3 + $0x3a8] sm:$0xf0]  ;;  %v5163_v0 = vld [vmem:[%s7923_s3 + $0x344] sm:$0xf0]  ;;  %v4545_v62 = vld [vmem:[%s7923_s3 + $0x400] sm:$0xf] }
 0x162   : > { %2432 = vmatpush.bf16.msra.mxu1 %v4504_v42  ;;  %2237 = vmatpush.bf16.msra.mxu0 %v4346_v48  ;;  %v5174_v42 = vld [vmem:[%s7923_s3 + $0x3a4] sm:$0xf]  ;;  %v4562_v48 = vor.u32 %v5191_v27, %v4561_v26  ;;  %v4448_v4 = vor.u32 %v5163_v0, %v4447_v63  ;;  %v4571_v11 = vld [vmem:[%s7923_s3 + $0x438] sm:$0xf0]  ;;  %v5201_v0 = vld [vmem:[%s7923_s3 + $0x474] sm:$0xf0] }
 0x163   : > { %v4500_v16 = vor.u32 %v5174_v42, %v4497_v39  ;;  %v4574_v49 = vor.u32 %v5192_v10, %v4571_v11  ;;  %v5188_v42 = vld [vmem:[%s7923_s3 + $0x414] sm:$0xf]  ;;  %v4555_v39 = vld [vmem:[%s7923_s3 + $0x418] sm:$0xf0] }
 0x164   : > { %2225 = vmatpush.bf16.msrb.mxu3 %v4398_v53  ;;  %v2082_v53 = vrot.slane %v6880_v52, 1 }
 0x165   : > { %2030 = vmatpush.bf16.msrb.mxu2 %v4240_v60  ;;  %v5172_v60 = vld [vmem:[%s7923_s3 + $0x394] sm:$0xf] }
 0x166   : > { %2433 = vmatpush.bf16.msra.mxu1 %v4496_v38  ;;  %2238 = vmatpush.bf16.msra.mxu0 %v4338_v33  ;;  %v4391_v38 = vld [vmem:[%s7923_s3 + $0x2d8] sm:$0xf0]  ;;  %v4554_v33 = vor.u32 %v5189_v54, %v4553_v56  ;;  %v4460_v56 = vor.u32 %v5164_v31, %v4457_v34  ;;  %v4558_v54 = vor.u32 %v5188_v42, %v4555_v39  ;;  %v4577_v31 = vld [vmem:[%s7923_s3 + $0x440] sm:$0xf]  ;;  %v5195_v34 = vld [vmem:[%s7923_s3 + $0x444] sm:$0xf0] }
 0x167   : > { %v4667_v42 = vld [vmem:[%s7923_s3 + $0x4f0] sm:$0xf] }
 0x168   : > { %2226 = vmatpush.bf16.msrb.mxu3 %v4390_v2  ;;  %v4394_v2 = vor.u32 %v5148_v58, %v4391_v38  ;;  %v5162_v58 = vld [vmem:[%s7923_s3 + $0x344] sm:$0xf]  ;;  %v4449_v38 = vld [vmem:[%s7923_s3 + $0x348] sm:$0xf0] }
 0x169   : > { %2031 = vmatpush.bf16.msrb.mxu2 %v4232_v7  ;;  %v4546_v7 = vor.u32 %v5187_v3, %v4545_v62  ;;  %v4452_v62 = vor.u32 %v5162_v58, %v4449_v38  ;;  %v4578_v58 = vor.u32 %v5195_v34, %v4577_v31  ;;  %v4515_v38 = vld [vmem:[%s7923_s3 + $0x3c8] sm:$0xf0]  ;;  %v5218_v34 = vld [vmem:[%s7923_s3 + $0x504] sm:$0xf] }
 0x16a   : > { %2434 = vmatpush.bf16.msra.mxu1 %v4488_v40  ;;  %2239 = vmatpush.bf16.msra.mxu0 %v4330_v12  ;;  %v4481_v40 = vld [vmem:[%s7923_s3 + $0x388] sm:$0xf0]  ;;  %v4386_v12 = vor.u32 %v5146_v30, %v4383_v36  ;;  %v4699_v30 = vld [vmem:[%s7923_s3 + $0x530] sm:$0xf] }
 0x16b   : > { %v4484_v43 = vor.u32 %v5170_v44, %v4481_v40  ;;  %v4441_v44 = vld [vmem:[%s7923_s3 + $0x338] sm:$0xf0]  ;;  %v5184_v40 = vld [vmem:[%s7923_s3 + $0x3f4] sm:$0xf]  ;;  %v4579_v31 = vld [vmem:[%s7923_s3 + $0x448] sm:$0xf0] }
 0x16c   : > { %2227 = vmatpush.bf16.msrb.mxu3 %v4382_v13  ;;  %v4537_v13 = vld [vmem:[%s7923_s3 + $0x3f0] sm:$0xf] }
 0x16d   : > { %2032 = vmatpush.bf16.msrb.mxu2 %v4224_v15  ;;  %v4538_v22 = vor.u32 %v5185_v35, %v4537_v13  ;;  %v4563_v15 = vld [vmem:[%s7923_s3 + $0x428] sm:$0xf0]  ;;  %v4691_v13 = vld [vmem:[%s7923_s3 + $0x520] sm:$0xf]  ;;  %v5223_v35 = vld [vmem:[%s7923_s3 + $0x524] sm:$0xf0] }
 0x16e   : > { %2435 = vmatpush.bf16.msra.mxu1 %v4480_v20  ;;  %2240 = vmatpush.bf16.msra.mxu0 %v4322_v21  ;;  %v5166_v20 = vld [vmem:[%s7923_s3 + $0x364] sm:$0xf]  ;;  %v4529_v21 = vld [vmem:[%s7923_s3 + $0x3e0] sm:$0xf]  ;;  %v4566_v27 = vor.u32 %v5190_v25, %v4563_v15 }
 0x16f   : > { %4411 = vmatmul.msk.bf16.vlgmr.msrb.gmra.mxu3 %vm1575_vm0, %v2082_v53  ;;  %v4468_v26 = vor.u32 %v5166_v20, %v4465_v50  ;;  %v5197_v20 = vld [vmem:[%s7923_s3 + $0x454] sm:$0xf0]  ;;  %v4692_v50 = vor.u32 %v5223_v35, %v4691_v13  ;;  %v2498_v35 = vrot.slane %v6880_v52, 2 }
 0x170   : > { %2415 = vmatpush.bf16.msra.mxu3 %v4472_v18  ;;  %2033 = vmatmul.bf16.vlgmr.msrb.gmra.mxu2 %v1873_v45  ;;  %v2290_v45 = vrot.slane %v6762_v51, 2  ;;  %v4476_v18 = vor.u32 %v5168_v46, %v4473_v9  ;;  %v4593_v46 = vld [vmem:[%s7923_s3 + $0x460] sm:$0xf]  ;;  %v2289_v9 = vrot.slane %v6760_v47, 2  ;;  %v5213_v13 = vld [vmem:[%s7923_s3 + $0x4d4] sm:$0xf0] }
 0x171   : > { %2250 = vmatpush.bf16.msra.mxu2 %v4410_v5  ;;  %2241 = vmatmul.bf16.vlgmr.msra.gmra.mxu0 %v2081_v59  ;;  %v4492_v59 = vor.u32 %v5172_v60, %v4489_v32  ;;  %v5183_v5 = vld [vmem:[%s7923_s3 + $0x3e4] sm:$0xf0]  ;;  %v5186_v60 = vld [vmem:[%s7923_s3 + $0x404] sm:$0xf]  ;;  %v4547_v32 = vld [vmem:[%s7923_s3 + $0x408] sm:$0xf0] }
 0x172   : > { %2623 = vmatpush.bf16.msrb.mxu1 %v4570_v23  ;;  %2458 = vmatpush.bf16.msrb.mxu0 %v4508_v28  ;;  %v4432_v23 = vor.u32 %v5159_v8, %v4431_v19  ;;  %v4423_v28 = vld [vmem:[%s7923_s3 + $0x310] sm:$0xf]  ;;  %v4530_v14 = vor.u32 %v5183_v5, %v4529_v21  ;;  %v4550_v3 = vor.u32 %v5186_v60, %v4547_v32  ;;  %v4531_v19 = vld [vmem:[%s7923_s3 + $0x3e8] sm:$0xf0]  ;;  %v5221_v21 = vld [vmem:[%s7923_s3 + $0x514] sm:$0xf0] }
 0x173   : > { %4509 = vmatmul.msk.bf16.vlgmr.msra.gmra.mxu1 %vm1575_vm0, %v2290_v45  ;;  %v4585_v8 = vld [vmem:[%s7923_s3 + $0x450] sm:$0xf]  ;;  %v5156_v5 = vld [vmem:[%s7923_s3 + $0x314] sm:$0xf]  ;;  %v5241_v32 = vld [vmem:[%s7923_s3 + $0x5b4] sm:$0xf0] }
 0x174   : > { %2416 = vmatpush.bf16.msra.mxu3 %v4464_v29  ;;  %v5157_v29 = vld [vmem:[%s7923_s3 + $0x314] sm:$0xf0]  ;;  %v4765_v60 = vld [vmem:[%s7923_s3 + $0x5b0] sm:$0xf] }
 0x175   : > { %2251 = vmatpush.bf16.msra.mxu2 %v4402_v55  ;;  %v4424_v24 = vor.u32 %v5157_v29, %v4423_v28  ;;  %v5181_v55 = vld [vmem:[%s7923_s3 + $0x3d4] sm:$0xf0]  ;;  %v5180_v28 = vld [vmem:[%s7923_s3 + $0x3d4] sm:$0xf]  ;;  %v4523_v29 = vld [vmem:[%s7923_s3 + $0x3d8] sm:$0xf0] }
 0x176   : > { %2624 = vmatpush.bf16.msrb.mxu1 %v4562_v48  ;;  %2459 = vmatpush.bf16.msrb.mxu0 %v4500_v16  ;;  %v4521_v48 = vld [vmem:[%s7923_s3 + $0x3d0] sm:$0xf]  ;;  %v4415_v16 = vld [vmem:[%s7923_s3 + $0x300] sm:$0xf] }
 0x177   : > { %v4522_v63 = vor.u32 %v5181_v55, %v4521_v48  ;;  %v5219_v48 = vld [vmem:[%s7923_s3 + $0x504] sm:$0xf0] }
 0x178   : > { %2417 = vmatpush.bf16.msra.mxu3 %v4456_v57  ;;  %v5155_v57 = vld [vmem:[%s7923_s3 + $0x304] sm:$0xf0] }
 0x179   : > { %2252 = vmatpush.bf16.msra.mxu2 %v4394_v2  ;;  %v5179_v2 = vld [vmem:[%s7923_s3 + $0x3c4] sm:$0xf0] }
 0x17a   : > { %2625 = vmatpush.bf16.msrb.mxu1 %v4554_v33  ;;  %2460 = vmatpush.bf16.msrb.mxu0 %v4492_v59  ;;  %v4513_v33 = vld [vmem:[%s7923_s3 + $0x3c0] sm:$0xf]  ;;  %v5225_v59 = vld [vmem:[%s7923_s3 + $0x534] sm:$0xf0] }
 0x17b   : > { %v4514_v6 = vor.u32 %v5179_v2, %v4513_v33  ;;  %v4700_v10 = vor.u32 %v5225_v59, %v4699_v30  ;;  %v4701_v2 = vld [vmem:[%s7923_s3 + $0x538] sm:$0xf0] }
 0x17c   : > { %2418 = vmatpush.bf16.msra.mxu3 %v4448_v4  ;;  %v5160_v4 = vld [vmem:[%s7923_s3 + $0x334] sm:$0xf] }
 0x17d   : > { %2253 = vmatpush.bf16.msra.mxu2 %v4386_v12  ;;  %v4444_v11 = vor.u32 %v5160_v4, %v4441_v44  ;;  %v4542_v12 = vor.u32 %v5184_v40, %v4539_v41  ;;  %v4766_v4 = vor.u32 %v5241_v32, %v4765_v60  ;;  %v4757_v44 = vld [vmem:[%s7923_s3 + $0x5a0] sm:$0xf]  ;;  %v4733_v60 = vld [vmem:[%s7923_s3 + $0x570] sm:$0xf]  ;;  %v5233_v32 = vld [vmem:[%s7923_s3 + $0x574] sm:$0xf0] }
 0x17e   : > { %2626 = vmatpush.bf16.msrb.mxu1 %v4546_v7  ;;  %2461 = vmatpush.bf16.msrb.mxu0 %v4484_v43  ;;  %v5199_v7 = vld [vmem:[%s7923_s3 + $0x464] sm:$0xf0]  ;;  %v5158_v43 = vld [vmem:[%s7923_s3 + $0x324] sm:$0xf] }
 0x180   : > { %2419 = vmatpush.bf16.msra.mxu3 %v4440_v17  ;;  %4412 = vmatmul.msk.bf16.vlgmr.msra.gmra.mxu2 %vm1575_vm0, %v2082_v53  ;;  %v4601_v53 = vld [vmem:[%s7923_s3 + $0x470] sm:$0xf]  ;;  %v4594_v17 = vor.u32 %v5199_v7, %v4593_v46  ;;  %v5198_v46 = vld [vmem:[%s7923_s3 + $0x464] sm:$0xf]  ;;  %v4595_v7 = vld [vmem:[%s7923_s3 + $0x468] sm:$0xf0] }
 0x181   : > { %2441 = vmatpush.bf16.msrb.mxu2 %v4476_v18  ;;  %4510 = vmatmul.msk.bf16.vlgmr.msrb.gmra.mxu0 %vm1575_vm0, %v2290_v45  ;;  %v4416_v45 = vor.u32 %v5155_v57, %v4415_v16  ;;  %v4602_v36 = vor.u32 %v5201_v0, %v4601_v53  ;;  %v4433_v18 = vld [vmem:[%s7923_s3 + $0x328] sm:$0xf0]  ;;  %v5178_v57 = vld [vmem:[%s7923_s3 + $0x3c4] sm:$0xf]  ;;  %v5200_v53 = vld [vmem:[%s7923_s3 + $0x474] sm:$0xf] }
 0x182   : > { %2649 = vmatpush.bf16.msra.mxu0 %v4574_v49  ;;  %2627 = vmatpush.bf16.msrb.mxu1 %v4538_v22  ;;  %v5182_v49 = vld [vmem:[%s7923_s3 + $0x3e4] sm:$0xf]  ;;  %v2497_v22 = vrot.slane %v6786_v61, 2  ;;  %v4436_v25 = vor.u32 %v5158_v43, %v4433_v18  ;;  %v4417_v16 = vld [vmem:[%s7923_s3 + $0x308] sm:$0xf0]  ;;  %v4518_v59 = vor.u32 %v5178_v57, %v4515_v38 }
 0x183   : > { %v4534_v15 = vor.u32 %v5182_v49, %v4531_v19  ;;  %v4603_v0 = vld [vmem:[%s7923_s3 + $0x478] sm:$0xf0]  ;;  %v4749_v18 = vld [vmem:[%s7923_s3 + $0x590] sm:$0xf]  ;;  %v5237_v19 = vld [vmem:[%s7923_s3 + $0x594] sm:$0xf0] }
 0x184   : > { %2420 = vmatpush.bf16.msra.mxu3 %v4432_v23  ;;  %v4683_v23 = vld [vmem:[%s7923_s3 + $0x510] sm:$0xf] }
 0x185   : > { %2442 = vmatpush.bf16.msrb.mxu2 %v4468_v26  ;;  %v4586_v26 = vor.u32 %v5197_v20, %v4585_v8  ;;  %v4684_v39 = vor.u32 %v5221_v21, %v4683_v23  ;;  %v5196_v8 = vld [vmem:[%s7923_s3 + $0x454] sm:$0xf]  ;;  %v4587_v20 = vld [vmem:[%s7923_s3 + $0x458] sm:$0xf0]  ;;  %v2706_v23 = vrot.slane %v6762_v51, 3 }
 0x186   : > { %2650 = vmatpush.bf16.msra.mxu0 %v4566_v27  ;;  %2628 = vmatpush.bf16.msrb.mxu1 %v4530_v14  ;;  %v4425_v27 = vld [vmem:[%s7923_s3 + $0x318] sm:$0xf0]  ;;  %v5217_v14 = vld [vmem:[%s7923_s3 + $0x4f4] sm:$0xf0]  ;;  %v5211_v21 = vld [vmem:[%s7923_s3 + $0x4c4] sm:$0xf0] }
 0x187   : > { %v4428_v55 = vor.u32 %v5156_v5, %v4425_v27  ;;  %v4750_v5 = vor.u32 %v5237_v19, %v4749_v18  ;;  %v4741_v27 = vld [vmem:[%s7923_s3 + $0x580] sm:$0xf]  ;;  %v4797_v51 = vld [vmem:[%s7923_s3 + $0x5f0] sm:$0xf] }
 0x188   : > { %2421 = vmatpush.bf16.msra.mxu3 %v4424_v24  ;;  %v4675_v24 = vld [vmem:[%s7923_s3 + $0x500] sm:$0xf] }
 0x189   : > { %2443 = vmatpush.bf16.msrb.mxu2 %v4460_v56  ;;  %v4526_v56 = vor.u32 %v5180_v28, %v4523_v29  ;;  %v4676_v33 = vor.u32 %v5219_v48, %v4675_v24  ;;  %v5194_v28 = vld [vmem:[%s7923_s3 + $0x444] sm:$0xf]  ;;  %v5216_v24 = vld [vmem:[%s7923_s3 + $0x4f4] sm:$0xf]  ;;  %v4669_v48 = vld [vmem:[%s7923_s3 + $0x4f8] sm:$0xf0] }
 0x18a   : > { %2651 = vmatpush.bf16.msra.mxu0 %v4558_v54  ;;  %2629 = vmatpush.bf16.msrb.mxu1 %v4522_v63  ;;  %v5154_v54 = vld [vmem:[%s7923_s3 + $0x304] sm:$0xf]  ;;  %v4668_v63 = vor.u32 %v5217_v14, %v4667_v42  ;;  %v4677_v42 = vld [vmem:[%s7923_s3 + $0x508] sm:$0xf0]  ;;  %v4635_v14 = vld [vmem:[%s7923_s3 + $0x4b0] sm:$0xf]  ;;  %v4582_v57 = vor.u32 %v5194_v28, %v4579_v31  ;;  %v4672_v38 = vor.u32 %v5216_v24, %v4669_v48 }
 0x18b   : > { %v4420_v30 = vor.u32 %v5154_v54, %v4417_v16  ;;  %v4767_v54 = vld [vmem:[%s7923_s3 + $0x5b8] sm:$0xf0]  ;;  %v4611_v19 = vld [vmem:[%s7923_s3 + $0x480] sm:$0xf]  ;;  %v5247_v48 = vld [vmem:[%s7923_s3 + $0x5e4] sm:$0xf0] }
 0x18c   : > { %2422 = vmatpush.bf16.msra.mxu3 %v4416_v45  ;;  %v5224_v45 = vld [vmem:[%s7923_s3 + $0x534] sm:$0xf]  ;;  %v4637_v28 = vld [vmem:[%s7923_s3 + $0x4b8] sm:$0xf0]  ;;  %v4789_v24 = vld [vmem:[%s7923_s3 + $0x5e0] sm:$0xf] }
 0x18d   : > { %2444 = vmatpush.bf16.msrb.mxu2 %v4452_v62  ;;  %v4659_v62 = vld [vmem:[%s7923_s3 + $0x4e0] sm:$0xf]  ;;  %v4704_v40 = vor.u32 %v5224_v45, %v4701_v2  ;;  %v5214_v45 = vld [vmem:[%s7923_s3 + $0x4e4] sm:$0xf]  ;;  %v5207_v2 = vld [vmem:[%s7923_s3 + $0x4a4] sm:$0xf0] }
 0x18e   : > { %2652 = vmatpush.bf16.msra.mxu0 %v4550_v3  ;;  %2630 = vmatpush.bf16.msrb.mxu1 %v4514_v6  ;;  %v5215_v3 = vld [vmem:[%s7923_s3 + $0x4e4] sm:$0xf0] }
 0x18f   : > { %2423 = vmatmul.bf16.vlgmr.msra.gmra.mxu3 %v2289_v9  ;;  %v4660_v41 = vor.u32 %v5215_v3, %v4659_v62  ;;  %v5239_v6 = vld [vmem:[%s7923_s3 + $0x5a4] sm:$0xf0]  ;;  %v5238_v62 = vld [vmem:[%s7923_s3 + $0x5a4] sm:$0xf]  ;;  %v4759_v3 = vld [vmem:[%s7923_s3 + $0x5a8] sm:$0xf0] }
 0x190   : > { %2640 = vmatpush.bf16.msrb.mxu3 %v4602_v36  ;;  %v4606_v36 = vor.u32 %v5200_v53, %v4603_v0  ;;  %v4758_v43 = vor.u32 %v5239_v6, %v4757_v44  ;;  %v4627_v0 = vld [vmem:[%s7923_s3 + $0x4a0] sm:$0xf]  ;;  %v5212_v6 = vld [vmem:[%s7923_s3 + $0x4d4] sm:$0xf] }
 0x191   : > { %2445 = vmatpush.bf16.msrb.mxu2 %v4444_v11  ;;  %2631 = vmatmul.bf16.vlgmr.msrb.gmra.mxu1 %v2497_v22  ;;  %v4693_v11 = vld [vmem:[%s7923_s3 + $0x528] sm:$0xf0]  ;;  %v4628_v44 = vor.u32 %v5207_v2, %v4627_v0  ;;  %v4781_v0 = vld [vmem:[%s7923_s3 + $0x5d0] sm:$0xf] }
 0x192   : > { %2848 = vmatpush.bf16.msra.mxu1 %v4700_v10  ;;  %2653 = vmatpush.bf16.msra.mxu0 %v4542_v12  ;;  %v5222_v10 = vld [vmem:[%s7923_s3 + $0x524] sm:$0xf]  ;;  %v4651_v12 = vld [vmem:[%s7923_s3 + $0x4d0] sm:$0xf] }
 0x193   : > { %v4696_v49 = vor.u32 %v5222_v10, %v4693_v11  ;;  %v5236_v10 = vld [vmem:[%s7923_s3 + $0x594] sm:$0xf]  ;;  %v4751_v11 = vld [vmem:[%s7923_s3 + $0x598] sm:$0xf0] }
 0x194   : > { %2641 = vmatpush.bf16.msrb.mxu3 %v4594_v17  ;;  %v4598_v17 = vor.u32 %v5198_v46, %v4595_v7  ;;  %v4653_v46 = vld [vmem:[%s7923_s3 + $0x4d8] sm:$0xf0]  ;;  %v5205_v7 = vld [vmem:[%s7923_s3 + $0x494] sm:$0xf0] }
 0x195   : > { %2446 = vmatpush.bf16.msrb.mxu2 %v4436_v25  ;;  %v5220_v25 = vld [vmem:[%s7923_s3 + $0x514] sm:$0xf] }
 0x196   : > { %2849 = vmatpush.bf16.msra.mxu1 %v4692_v50  ;;  %2654 = vmatpush.bf16.msra.mxu0 %v4534_v15  ;;  %v4652_v50 = vor.u32 %v5213_v13, %v4651_v12  ;;  %v4685_v15 = vld [vmem:[%s7923_s3 + $0x518] sm:$0xf0]  ;;  %v4656_v13 = vor.u32 %v5212_v6, %v4653_v46  ;;  %v4773_v6 = vld [vmem:[%s7923_s3 + $0x5c0] sm:$0xf]  ;;  %v5243_v46 = vld [vmem:[%s7923_s3 + $0x5c4] sm:$0xf0] }
 0x197   : > { %v4688_v29 = vor.u32 %v5220_v25, %v4685_v15  ;;  %v5234_v25 = vld [vmem:[%s7923_s3 + $0x584] sm:$0xf]  ;;  %v4743_v15 = vld [vmem:[%s7923_s3 + $0x588] sm:$0xf0] }
 0x198   : > { %2642 = vmatpush.bf16.msrb.mxu3 %v4586_v26  ;;  %v4590_v26 = vor.u32 %v5196_v8, %v4587_v20  ;;  %v5210_v8 = vld [vmem:[%s7923_s3 + $0x4c4] sm:$0xf]  ;;  %v4645_v20 = vld [vmem:[%s7923_s3 + $0x4c8] sm:$0xf0] }
 0x199   : > { %2447 = vmatpush.bf16.msrb.mxu2 %v4428_v55  ;;  %v5209_v55 = vld [vmem:[%s7923_s3 + $0x4b4] sm:$0xf0] }
 0x19a   : > { %2850 = vmatpush.bf16.msra.mxu1 %v4684_v39  ;;  %2655 = vmatpush.bf16.msra.mxu0 %v4526_v56  ;;  %v5240_v56 = vld [vmem:[%s7923_s3 + $0x5b4] sm:$0xf] }
 0x19b   : > { %v4770_v53 = vor.u32 %v5240_v56, %v4767_v54 }
 0x19c   : > { %2643 = vmatpush.bf16.msrb.mxu3 %v4578_v58  ;;  %v4680_v58 = vor.u32 %v5218_v34, %v4677_v42  ;;  %v4735_v34 = vld [vmem:[%s7923_s3 + $0x578] sm:$0xf0]  ;;  %v4895_v42 = vld [vmem:[%s7923_s3 + $0x6b0] sm:$0xf] }
 0x19d   : > { %2448 = vmatpush.bf16.msrb.mxu2 %v4420_v30  ;;  %v4734_v30 = vor.u32 %v5233_v32, %v4733_v60  ;;  %v4790_v60 = vor.u32 %v5247_v48, %v4789_v24  ;;  %v4727_v32 = vld [vmem:[%s7923_s3 + $0x568] sm:$0xf0]  ;;  %v3123_v24 = vunpack.c.h.b16 %v6796_v1 }
 0x19e   : > { %2851 = vmatpush.bf16.msra.mxu1 %v4676_v33  ;;  %2656 = vmatpush.bf16.msra.mxu0 %v4518_v59  ;;  %v4661_v33 = vld [vmem:[%s7923_s3 + $0x4e8] sm:$0xf0] }
 0x19f   : > { %4607 = vmatmul.msk.bf16.vlgmr.msrb.gmra.mxu3 %vm1575_vm0, %v2498_v35  ;;  %v4664_v59 = vor.u32 %v5214_v45, %v4661_v33  ;;  %v5245_v45 = vld [vmem:[%s7923_s3 + $0x5d4] sm:$0xf0]  ;;  %v2913_v33 = vrot.slane %v6786_v61, 3  ;;  %v5242_v61 = vld [vmem:[%s7923_s3 + $0x5c4] sm:$0xf] }
 0x1a0   : > { %2831 = vmatpush.bf16.msra.mxu3 %v4668_v63  ;;  %2449 = vmatmul.bf16.vlgmr.msrb.gmra.mxu2 %v2289_v9  ;;  %v4643_v9 = vld [vmem:[%s7923_s3 + $0x4c0] sm:$0xf]  ;;  %v4636_v63 = vor.u32 %v5209_v55, %v4635_v14  ;;  %v2705_v55 = vrot.slane %v6760_v47, 3 }
 0x1a1   : > { %2666 = vmatpush.bf16.msra.mxu2 %v4606_v36  ;;  %2657 = vmatmul.bf16.vlgmr.msra.gmra.mxu0 %v2497_v22  ;;  %v5235_v22 = vld [vmem:[%s7923_s3 + $0x584] sm:$0xf0]  ;;  %v4644_v39 = vor.u32 %v5211_v21, %v4643_v9  ;;  %v4709_v21 = vld [vmem:[%s7923_s3 + $0x540] sm:$0xf] }
 0x1a2   : > { %3039 = vmatpush.bf16.msrb.mxu1 %v4766_v4  ;;  %2874 = vmatpush.bf16.msrb.mxu0 %v4704_v40  ;;  %v4742_v16 = vor.u32 %v5235_v22, %v4741_v27  ;;  %v4725_v4 = vld [vmem:[%s7923_s3 + $0x560] sm:$0xf]  ;;  %v5231_v36 = vld [vmem:[%s7923_s3 + $0x564] sm:$0xf0]  ;;  %v4762_v40 = vor.u32 %v5238_v62, %v4759_v3  ;;  %v4746_v27 = vor.u32 %v5234_v25, %v4743_v15  ;;  %v5208_v22 = vld [vmem:[%s7923_s3 + $0x4b4] sm:$0xf] }
 0x1a3   : > { %4705 = vmatmul.msk.bf16.vlgmr.msra.gmra.mxu1 %vm1575_vm0, %v2706_v23  ;;  %v4726_v12 = vor.u32 %v5231_v36, %v4725_v4  ;;  %v4640_v56 = vor.u32 %v5208_v22, %v4637_v28  ;;  %v5228_v4 = vld [vmem:[%s7923_s3 + $0x554] sm:$0xf]  ;;  %v4782_v36 = vor.u32 %v5245_v45, %v4781_v0 }
 0x1a4   : > { %2832 = vmatpush.bf16.msra.mxu3 %v4660_v41  ;;  %v4619_v41 = vld [vmem:[%s7923_s3 + $0x490] sm:$0xf]  ;;  %v5268_v45 = vld [vmem:[%s7923_s3 + $0x694] sm:$0xf] }
 0x1a5   : > { %2667 = vmatpush.bf16.msra.mxu2 %v4598_v17  ;;  %v5229_v17 = vld [vmem:[%s7923_s3 + $0x554] sm:$0xf0]  ;;  %v4620_v18 = vor.u32 %v5205_v7, %v4619_v41 }
 0x1a6   : > { %3040 = vmatpush.bf16.msrb.mxu1 %v4758_v43  ;;  %2875 = vmatpush.bf16.msrb.mxu0 %v4696_v49  ;;  %v4717_v43 = vld [vmem:[%s7923_s3 + $0x550] sm:$0xf]  ;;  %v4754_v49 = vor.u32 %v5236_v10, %v4751_v11  ;;  %v5269_v41 = vld [vmem:[%s7923_s3 + $0x694] sm:$0xf0] }
 0x1a7   : > { %v4718_v9 = vor.u32 %v5229_v17, %v4717_v43  ;;  %v4863_v10 = vld [vmem:[%s7923_s3 + $0x670] sm:$0xf]  ;;  %v5265_v11 = vld [vmem:[%s7923_s3 + $0x674] sm:$0xf0]  ;;  %v4613_v17 = vld [vmem:[%s7923_s3 + $0x488] sm:$0xf0] }
 0x1a8   : > { %2833 = vmatpush.bf16.msra.mxu3 %v4652_v50  ;;  %v5203_v50 = vld [vmem:[%s7923_s3 + $0x484] sm:$0xf0]  ;;  %v4864_v15 = vor.u32 %v5265_v11, %v4863_v10  ;;  %v5257_v10 = vld [vmem:[%s7923_s3 + $0x634] sm:$0xf0] }
 0x1a9   : > { %2668 = vmatpush.bf16.msra.mxu2 %v4590_v26  ;;  %v4612_v26 = vor.u32 %v5203_v50, %v4611_v19  ;;  %v4774_v19 = vor.u32 %v5243_v46, %v4773_v6  ;;  %v4871_v50 = vld [vmem:[%s7923_s3 + $0x680] sm:$0xf] }
 0x1aa   : > { %3041 = vmatpush.bf16.msrb.mxu1 %v4750_v5  ;;  %2876 = vmatpush.bf16.msrb.mxu0 %v4688_v29  ;;  %v5227_v5 = vld [vmem:[%s7923_s3 + $0x544] sm:$0xf0]  ;;  %v5232_v29 = vld [vmem:[%s7923_s3 + $0x574] sm:$0xf] }
 0x1ab   : > { %v4710_v14 = vor.u32 %v5227_v5, %v4709_v21  ;;  %v4738_v54 = vor.u32 %v5232_v29, %v4735_v34  ;;  %v4855_v5 = vld [vmem:[%s7923_s3 + $0x660] sm:$0xf]  ;;  %v4791_v34 = vld [vmem:[%s7923_s3 + $0x5e8] sm:$0xf0] }
 0x1ac   : > { %2834 = vmatpush.bf16.msra.mxu3 %v4644_v39  ;;  %v5273_v39 = vld [vmem:[%s7923_s3 + $0x6b4] sm:$0xf0] }
 0x1ad   : > { %2669 = vmatpush.bf16.msra.mxu2 %v4582_v57  ;;  %v5206_v57 = vld [vmem:[%s7923_s3 + $0x4a4] sm:$0xf] }
 0x1ae   : > { %3042 = vmatpush.bf16.msrb.mxu1 %v4742_v16  ;;  %2877 = vmatpush.bf16.msrb.mxu0 %v4680_v58  ;;  %v4896_v16 = vor.u32 %v5273_v39, %v4895_v42  ;;  %v4629_v58 = vld [vmem:[%s7923_s3 + $0x4a8] sm:$0xf0]  ;;  %v5270_v39 = vld [vmem:[%s7923_s3 + $0x6a4] sm:$0xf] }
 0x1af   : > { %v4632_v2 = vor.u32 %v5206_v57, %v4629_v58 }
 0x1b0   : > { %2835 = vmatpush.bf16.msra.mxu3 %v4636_v63  ;;  %4608 = vmatmul.msk.bf16.vlgmr.msra.gmra.mxu2 %vm1575_vm0, %v2498_v35  ;;  %v5249_v35 = vld [vmem:[%s7923_s3 + $0x5f4] sm:$0xf0]  ;;  %v4887_v63 = vld [vmem:[%s7923_s3 + $0x6a0] sm:$0xf] }
 0x1b1   : > { %2857 = vmatpush.bf16.msrb.mxu2 %v4672_v38  ;;  %4706 = vmatmul.msk.bf16.vlgmr.msrb.gmra.mxu0 %vm1575_vm0, %v2706_v23  ;;  %v4648_v23 = vor.u32 %v5210_v8, %v4645_v20  ;;  %v4798_v31 = vor.u32 %v5249_v35, %v4797_v51  ;;  %v5230_v38 = vld [vmem:[%s7923_s3 + $0x564] sm:$0xf]  ;;  %v5248_v8 = vld [vmem:[%s7923_s3 + $0x5f4] sm:$0xf]  ;;  %v4799_v20 = vld [vmem:[%s7923_s3 + $0x5f8] sm:$0xf0] }
 0x1b2   : > { %3065 = vmatpush.bf16.msra.mxu0 %v4770_v53  ;;  %3043 = vmatpush.bf16.msrb.mxu1 %v4734_v30  ;;  %v5271_v53 = vld [vmem:[%s7923_s3 + $0x6a4] sm:$0xf0]  ;;  %v4730_v62 = vor.u32 %v5230_v38, %v4727_v32  ;;  %v5204_v30 = vld [vmem:[%s7923_s3 + $0x494] sm:$0xf]  ;;  %v4897_v35 = vld [vmem:[%s7923_s3 + $0x6b8] sm:$0xf0]  ;;  %v4802_v22 = vor.u32 %v5248_v8, %v4799_v20 }
 0x1b3   : > { %v4888_v3 = vor.u32 %v5271_v53, %v4887_v63  ;;  %v5272_v51 = vld [vmem:[%s7923_s3 + $0x6b4] sm:$0xf]  ;;  %v2914_v38 = vrot.slane %v6880_v52, 3  ;;  %v4783_v63 = vld [vmem:[%s7923_s3 + $0x5d8] sm:$0xf0] }
 0x1b4   : > { %2836 = vmatpush.bf16.msra.mxu3 %v4628_v44  ;;  %v4719_v44 = vld [vmem:[%s7923_s3 + $0x558] sm:$0xf0]  ;;  %v4900_v29 = vor.u32 %v5272_v51, %v4897_v35  ;;  %v5244_v32 = vld [vmem:[%s7923_s3 + $0x5d4] sm:$0xf]  ;;  %v5255_v8 = vld [vmem:[%s7923_s3 + $0x624] sm:$0xf0] }
 0x1b5   : > { %2858 = vmatpush.bf16.msrb.mxu2 %v4664_v59  ;;  %v4621_v59 = vld [vmem:[%s7923_s3 + $0x498] sm:$0xf0]  ;;  %v5251_v52 = vld [vmem:[%s7923_s3 + $0x604] sm:$0xf0] }
 0x1b6   : > { %3066 = vmatpush.bf16.msra.mxu0 %v4762_v40  ;;  %3044 = vmatpush.bf16.msrb.mxu1 %v4726_v12  ;;  %v4879_v40 = vld [vmem:[%s7923_s3 + $0x690] sm:$0xf]  ;;  %v4624_v7 = vor.u32 %v5204_v30, %v4621_v59  ;;  %v5202_v12 = vld [vmem:[%s7923_s3 + $0x484] sm:$0xf]  ;;  %v4786_v30 = vor.u32 %v5244_v32, %v4783_v63  ;;  %v4849_v51 = vld [vmem:[%s7923_s3 + $0x658] sm:$0xf0] }
 0x1b7   : > { %v4880_v43 = vor.u32 %v5269_v41, %v4879_v40  ;;  %v4616_v21 = vor.u32 %v5202_v12, %v4613_v17  ;;  %v5266_v40 = vld [vmem:[%s7923_s3 + $0x684] sm:$0xf]  ;;  %v4873_v41 = vld [vmem:[%s7923_s3 + $0x688] sm:$0xf0] }
 0x1b8   : > { %2837 = vmatpush.bf16.msra.mxu3 %v4620_v18  ;;  %v5226_v18 = vld [vmem:[%s7923_s3 + $0x544] sm:$0xf]  ;;  %v4825_v32 = vld [vmem:[%s7923_s3 + $0x628] sm:$0xf0] }
 0x1b9   : > { %2859 = vmatpush.bf16.msrb.mxu2 %v4656_v13  ;;  %v4722_v13 = vor.u32 %v5228_v4, %v4719_v44  ;;  %v5264_v4 = vld [vmem:[%s7923_s3 + $0x674] sm:$0xf]  ;;  %v4865_v44 = vld [vmem:[%s7923_s3 + $0x678] sm:$0xf0] }
 0x1ba   : > { %3067 = vmatpush.bf16.msra.mxu0 %v4754_v49  ;;  %3045 = vmatpush.bf16.msrb.mxu1 %v4718_v9  ;;  %v4711_v49 = vld [vmem:[%s7923_s3 + $0x548] sm:$0xf0]  ;;  %v5267_v9 = vld [vmem:[%s7923_s3 + $0x684] sm:$0xf0]  ;;  %v4868_v12 = vor.u32 %v5264_v4, %v4865_v44 }
 0x1bb   : > { %v4872_v28 = vor.u32 %v5267_v9, %v4871_v50  ;;  %v5260_v9 = vld [vmem:[%s7923_s3 + $0x654] sm:$0xf]  ;;  %v4809_v4 = vld [vmem:[%s7923_s3 + $0x608] sm:$0xf0] }
 0x1bc   : > { %2838 = vmatpush.bf16.msra.mxu3 %v4612_v26  ;;  %v5263_v26 = vld [vmem:[%s7923_s3 + $0x664] sm:$0xf0] }
 0x1bd   : > { %2860 = vmatpush.bf16.msrb.mxu2 %v4648_v23  ;;  %v7711_v25 = vpop.f32.mrf.mxu0  ;;  %v4856_v42 = vor.u32 %v5263_v26, %v4855_v5  ;;  %v4815_v5 = vld [vmem:[%s7923_s3 + $0x610] sm:$0xf]  ;;  %v5253_v26 = vld [vmem:[%s7923_s3 + $0x614] sm:$0xf0] }
 0x1be   : > { %3068 = vmatpush.bf16.msra.mxu0 %v4746_v27  ;;  %3046 = vmatpush.bf16.msrb.mxu1 %v4710_v14  ;;  %v7722_v23 = vpop.f32.mrf.mxu1  ;;  %v4714_v27 = vor.u32 %v5226_v18, %v4711_v49  ;;  %v4889_v14 = vld [vmem:[%s7923_s3 + $0x6a8] sm:$0xf0]  ;;  %v5262_v18 = vld [vmem:[%s7923_s3 + $0x664] sm:$0xf] }
 0x1bf   : > { %2839 = vmatmul.bf16.vlgmr.msra.gmra.mxu3 %v2705_v55  ;;  %v4857_v49 = vld [vmem:[%s7923_s3 + $0x668] sm:$0xf0] }
 0x1c0   : > { %3056 = vmatpush.bf16.msrb.mxu3 %v4798_v31  ;;  %v5246_v31 = vld [vmem:[%s7923_s3 + $0x5e4] sm:$0xf]  ;;  %v4860_v50 = vor.u32 %v5262_v18, %v4857_v49 }
 0x1c1   : > { %2861 = vmatpush.bf16.msrb.mxu2 %v4640_v56  ;;  %3047 = vmatmul.bf16.vlgmr.msrb.gmra.mxu1 %v2913_v33  ;;  %v4794_v58 = vor.u32 %v5246_v31, %v4791_v34  ;;  %v4816_v34 = vor.u32 %v5253_v26, %v4815_v5 }
 0x1c2   : > { %3069 = vmatpush.bf16.msra.mxu0 %v4738_v54  ;;  %3267 = vmatpush.bf16.msra.mxu1 %v4896_v16  ;;  %v1588_v48 = vpop.f32.mrf.mxu2  ;;  %v1601_v56 = vpop.f32.mrf.mxu3  ;;  %v4847_v54 = vld [vmem:[%s7923_s3 + $0x650] sm:$0xf]  ;;  %v5261_v16 = vld [vmem:[%s7923_s3 + $0x654] sm:$0xf0] }
 0x1c3   : > { %v7749_v57 = vadd.f32 %v1601_v56, %v1588_v48  ;;  %v4848_v0 = vor.u32 %v5261_v16, %v4847_v54  ;;  %v5256_v56 = vld [vmem:[%s7923_s3 + $0x634] sm:$0xf]  ;;  %v4833_v54 = vld [vmem:[%s7923_s3 + $0x638] sm:$0xf0]  ;;  %v3122_v16 = vunpack.c.l.b16 %v6796_v1 }
 0x1c4   : > { %3057 = vmatpush.bf16.msrb.mxu3 %v4790_v60  ;;  %v4892_v60 = vor.u32 %v5270_v39, %v4889_v14  ;;  %v5252_v1 = vld [vmem:[%s7923_s3 + $0x614] sm:$0xf] }
 0x1c5   : > { %2862 = vmatpush.bf16.msrb.mxu2 %v4632_v2  ;;  %v1629_v53 = vpop.f32.mrf.mxu0  ;;  %v4881_v2 = vld [vmem:[%s7923_s3 + $0x698] sm:$0xf0]  ;;  %v3124_v63 = vpack.c.b16 %v3122_v16, %v3122_v16 }
 0x1c6   : > { %3070 = vmatpush.bf16.msra.mxu0 %v4730_v62  ;;  %3268 = vmatpush.bf16.msra.mxu1 %v4888_v3  ;;  %v3125_v62 = vpack.c.b16 %v3123_v24, %v3123_v24  ;;  %v1802_v47 = vpop.f32.mrf.mxu1  ;;  %v5259_v3 = vld [vmem:[%s7923_s3 + $0x644] sm:$0xf0]  ;;  %v4884_v59 = vor.u32 %v5268_v45, %v4881_v2  ;;  %v4817_v2 = vld [vmem:[%s7923_s3 + $0x618] sm:$0xf0] }
 0x1c7   : > { %v1424_v47 = vld [vmem:[%s7924_s4] sm:$0x3] }
 0x1c8   : > { %3058 = vmatpush.bf16.msrb.mxu3 %v4782_v36 }
 0x1c9   : > { %2863 = vmatpush.bf16.msrb.mxu2 %v4624_v7  ;;  %v4831_v7 = vld [vmem:[%s7923_s3 + $0x630] sm:$0xf] }
 0x1ca   : > { %3071 = vmatpush.bf16.msra.mxu0 %v4722_v13  ;;  %3269 = vmatpush.bf16.msra.mxu1 %v4880_v43  ;;  %v1590_v6 = vpop.f32.mrf.mxu2  ;;  %v1603_v46 = vpop.f32.mrf.mxu3  ;;  %v4876_v13 = vor.u32 %v5266_v40, %v4873_v41  ;;  %v4832_v17 = vor.u32 %v5257_v10, %v4831_v7 }
 0x1cc   : > { %3059 = vmatpush.bf16.msrb.mxu3 %v4774_v19  ;;  %v4823_v19 = vld [vmem:[%s7923_s3 + $0x620] sm:$0xf] }
 0x1cd   : > { %2864 = vmatpush.bf16.msrb.mxu2 %v4616_v21  ;;  %v1826_v43 = vpop.f32.mrf.mxu0 }
 0x1ce   : > { %3072 = vmatpush.bf16.msra.mxu0 %v4714_v27  ;;  %3270 = vmatpush.bf16.msra.mxu1 %v4872_v28  ;;  %v2021_v20 = vpop.f32.mrf.mxu1  ;;  %v4852_v28 = vor.u32 %v5260_v9, %v4849_v51 }
 0x1cf   : > { %4803 = vmatmul.msk.bf16.vlgmr.msrb.gmra.mxu3 %vm1575_vm0, %v2914_v38 }
 0x1d0   : > { %3250 = vmatpush.bf16.msra.mxu3 %v4864_v15  ;;  %2865 = vmatmul.bf16.vlgmr.msrb.gmra.mxu2 %v2705_v55  ;;  %v4839_v55 = vld [vmem:[%s7923_s3 + $0x640] sm:$0xf]  ;;  %v4824_v15 = vor.u32 %v5255_v8, %v4823_v19 }
 0x1d1   : > { %3082 = vmatpush.bf16.msra.mxu2 %v4802_v22  ;;  %3073 = vmatmul.bf16.vlgmr.msra.gmra.mxu0 %v2913_v33  ;;  %v4775_v33 = vld [vmem:[%s7923_s3 + $0x5c8] sm:$0xf0]  ;;  %v4840_v36 = vor.u32 %v5259_v3, %v4839_v55 }
 0x1d2   : > { %3293 = vmatpush.bf16.msrb.mxu0 %v4900_v29  ;;  %4901 = vmatmul.msk.bf16.vlgmr.msra.gmra.mxu1 %vm1575_vm0, %v3125_v62  ;;  %v4778_v11 = vor.u32 %v5242_v61, %v4775_v33  ;;  %v1614_v35 = vpop.f32.mrf.mxu3  ;;  %v1813_v21 = vpop.f32.mrf.mxu2  ;;  %v5250_v33 = vld [vmem:[%s7923_s3 + $0x604] sm:$0xf] }
 0x1d3   : > { %v1628_v27 = vadd.f32 %v7711_v25, %v1614_v35  ;;  %v1814_v22 = vadd.f32 %v1813_v21, %v7722_v23  ;;  %v4841_v25 = vld [vmem:[%s7923_s3 + $0x648] sm:$0xf0]  ;;  %v4807_v23 = vld [vmem:[%s7923_s3 + $0x600] sm:$0xf]  ;;  %v4812_v46 = vor.u32 %v5250_v33, %v4809_v4 }
 0x1d4   : > { %3251 = vmatpush.bf16.msra.mxu3 %v4856_v42  ;;  %v5258_v42 = vld [vmem:[%s7923_s3 + $0x644] sm:$0xf]  ;;  %v4808_v48 = vor.u32 %v5251_v52, %v4807_v23 }
 0x1d5   : > { %3083 = vmatpush.bf16.msra.mxu2 %v4794_v58  ;;  %v1633_v29 = vrot.slane %v1628_v27, 7  ;;  %v1828_v31 = vpop.f32.mrf.mxu0  ;;  %v4844_v24 = vor.u32 %v5258_v42, %v4841_v25 }
 0x1d6   : > { %3294 = vmatpush.bf16.msrb.mxu0 %v4892_v60  ;;  %v2023_v14 = vpop.f32.mrf.mxu1  ;;  %v4836_v60 = vor.u32 %v5256_v56, %v4833_v54 }
 0x1d7   : > { %v1635_v39 = vsel %vm1634_vm1, %v7749_v57, %v1633_v29  ;;  %v5254_v57 = vld [vmem:[%s7923_s3 + $0x624] sm:$0xf] }
 0x1d8   : > { %3252 = vmatpush.bf16.msra.mxu3 %v4848_v0  ;;  %v4828_v45 = vor.u32 %v5254_v57, %v4825_v32 }
 0x1d9   : > { %3084 = vmatpush.bf16.msra.mxu2 %v4786_v30 }
 0x1da   : > { %3295 = vmatpush.bf16.msrb.mxu0 %v4884_v59  ;;  %v1616_v58 = vpop.f32.mrf.mxu3  ;;  %v4820_v59 = vor.u32 %v5252_v1, %v4817_v2 }
 0x1dc   : > { %3253 = vmatpush.bf16.msra.mxu3 %v4840_v36  ;;  %v1637_v36 = vadd.f32 %v1635_v39, %v1424_v47 }
 0x1dd   : > { %3085 = vmatpush.bf16.msra.mxu2 %v4778_v11  ;;  %v2047_v53 = vpop.f32.mrf.mxu0 }
 0x1de   : > { %3296 = vmatpush.bf16.msrb.mxu0 %v4876_v13  ;;  %v2216_v0 = vpop.f32.mrf.mxu1 }
 0x1e0   : > { %3254 = vmatpush.bf16.msra.mxu3 %v4832_v17  ;;  %4804 = vmatmul.msk.bf16.vlgmr.msra.gmra.mxu2 %vm1575_vm0, %v2914_v38  ;;  %v1815_v38 = vpop.f32.mrf.mxu2 }
 0x1e1   : > { %3276 = vmatpush.bf16.msrb.mxu2 %v4868_v12  ;;  %4902 = vmatmul.msk.bf16.vlgmr.msrb.gmra.mxu0 %vm1575_vm0, %v3125_v62 }
 0x1e2   : > { %v2008_v3 = vpop.f32.mrf.mxu3 }
 0x1e3   : > { %v2022_v30 = vadd.f32 %v2021_v20, %v2008_v3 }
 0x1e4   : > { %3255 = vmatpush.bf16.msra.mxu3 %v4824_v15 }
 0x1e5   : > { %3277 = vmatpush.bf16.msrb.mxu2 %v4860_v50  ;;  %v2049_v44 = vpop.f32.mrf.mxu0 }
 0x1e6   : > { %v2218_v6 = vpop.f32.mrf.mxu1 }
 0x1e8   : > { %3256 = vmatpush.bf16.msra.mxu3 %v4816_v34  ;;  %v1839_v62 = vpop.f32.mrf.mxu2 }
 0x1e9   : > { %3278 = vmatpush.bf16.msrb.mxu2 %v4852_v28  ;;  %v1840_v55 = vadd.f32 %v1839_v62, %v1826_v43 }
 0x1ea   : > { %v2010_v10 = vpop.f32.mrf.mxu3 }
 0x1eb   : > { %v1845_v61 = vrot.slane %v1840_v55, 7 }
 0x1ec   : > { %3257 = vmatpush.bf16.msra.mxu3 %v4808_v48 }
 0x1ed   : > { %3279 = vmatpush.bf16.msrb.mxu2 %v4844_v24  ;;  %v1846_v40 = vsel %vm1634_vm1, %v1814_v22, %v1845_v61 }
 0x1ee   : > { %v1848_v41 = vadd.f32 %v1846_v40, %v1637_v36  ;;  %v2242_v11 = vpop.f32.mrf.mxu0 }
 0x1ef   : > { %3258 = vmatmul.bf16.vlgmr.msra.gmra.mxu3 %v3124_v63 }
 0x1f0   : > { %v1841_v7 = vpop.f32.mrf.mxu2  ;;  %v2437_v12 = vpop.f32.mrf.mxu1 }
 0x1f1   : > { %3280 = vmatpush.bf16.msrb.mxu2 %v4836_v60 }
 0x1f2   : > { %v2229_v43 = vpop.f32.mrf.mxu3 }
 0x1f3   : > { %v2230_v18 = vadd.f32 %v2229_v43, %v2216_v0 }
 0x1f5   : > { %3281 = vmatpush.bf16.msrb.mxu2 %v4828_v45 }
 0x1f6   : > { %v2244_v19 = vpop.f32.mrf.mxu0 }
 0x1f8   : > { %v2034_v13 = vpop.f32.mrf.mxu2  ;;  %v2439_v50 = vpop.f32.mrf.mxu1 }
 0x1f9   : > { %3282 = vmatpush.bf16.msrb.mxu2 %v4820_v59  ;;  %v2048_v17 = vadd.f32 %v2047_v53, %v2034_v13 }
 0x1fa   : > { %v2231_v9 = vpop.f32.mrf.mxu3 }
 0x1fb   : > { %v2053_v49 = vrot.slane %v2048_v17, 7 }
 0x1fd   : > { %3283 = vmatpush.bf16.msrb.mxu2 %v4812_v46  ;;  %v2054_v8 = vsel %vm1634_vm1, %v2022_v30, %v2053_v49 }
 0x1fe   : > { %v2056_v20 = vadd.f32 %v2054_v8, %v1848_v41  ;;  %v2463_v51 = vpop.f32.mrf.mxu0 }
 0x200   : > { %3284 = vmatmul.bf16.vlgmr.msrb.gmra.mxu2 %v3124_v63  ;;  %v2036_v15 = vpop.f32.mrf.mxu2 }
 0x206   : > { %v2465_v5 = vpop.f32.mrf.mxu0 }
 0x208   : > { %v2255_v35 = vpop.f32.mrf.mxu2 }
 0x209   : > { %v2256_v21 = vadd.f32 %v2255_v35, %v2242_v11 }
 0x20b   : > { %v2261_v26 = vrot.slane %v2256_v21, 7 }
 0x20d   : > { %v2262_v27 = vsel %vm1634_vm1, %v2230_v18, %v2261_v26 }
 0x20e   : > { %v2264_v22 = vadd.f32 %v2262_v27, %v2056_v20  ;;  %v2632_v28 = vpop.f32.mrf.mxu1 }
 0x210   : > { %v2257_v29 = vpop.f32.mrf.mxu2 }
 0x212   : > { %v2424_v31 = vpop.f32.mrf.mxu3 }
 0x213   : > { %v2438_v34 = vadd.f32 %v2437_v12, %v2424_v31 }
 0x216   : > { %v2634_v42 = vpop.f32.mrf.mxu1 }
 0x21a   : > { %v2426_v25 = vpop.f32.mrf.mxu3 }
 0x21e   : > { %v2658_v23 = vpop.f32.mrf.mxu0 }
 0x220   : > { %v2853_v52 = vpop.f32.mrf.mxu1 }
 0x222   : > { %v2645_v14 = vpop.f32.mrf.mxu3 }
 0x223   : > { %v2450_v39 = vpop.f32.mrf.mxu2  ;;  %v2646_v48 = vadd.f32 %v2645_v14, %v2632_v28 }
 0x224   : > { %v2464_v24 = vadd.f32 %v2463_v51, %v2450_v39 }
 0x226   : > { %v2469_v56 = vrot.slane %v2464_v24, 7  ;;  %v2660_v54 = vpop.f32.mrf.mxu0 }
 0x228   : > { %v2470_v16 = vsel %vm1634_vm1, %v2438_v34, %v2469_v56  ;;  %v2855_v58 = vpop.f32.mrf.mxu1 }
 0x229   : > { %v2472_v38 = vadd.f32 %v2470_v16, %v2264_v22 }
 0x22a   : > { %v2647_v57 = vpop.f32.mrf.mxu3 }
 0x22b   : > { %v2452_v60 = vpop.f32.mrf.mxu2 }
 0x22e   : > { %v2879_v32 = vpop.f32.mrf.mxu0 }
 0x233   : > { %v2671_v63 = vpop.f32.mrf.mxu2 }
 0x234   : > { %v2672_v53 = vadd.f32 %v2671_v63, %v2658_v23 }
 0x236   : > { %v2881_v0 = vpop.f32.mrf.mxu0  ;;  %v2677_v45 = vrot.slane %v2672_v53, 7 }
 0x238   : > { %v2678_v1 = vsel %vm1634_vm1, %v2646_v48, %v2677_v45 }
 0x239   : > { %v2680_v2 = vadd.f32 %v2678_v1, %v2472_v38 }
 0x23b   : > { %v2673_v47 = vpop.f32.mrf.mxu2 }
 0x23e   : > { %v3048_v62 = vpop.f32.mrf.mxu1 }
 0x242   : > { %v2840_v55 = vpop.f32.mrf.mxu3 }
 0x243   : > { %v2854_v44 = vadd.f32 %v2853_v52, %v2840_v55 }
 0x246   : > { %v3050_v3 = vpop.f32.mrf.mxu1 }
 0x24a   : > { %v2842_v30 = vpop.f32.mrf.mxu3 }
 0x24e   : > { %v3074_v59 = vpop.f32.mrf.mxu0 }
 0x24f   : > { %v3272_v61 = vpop.f32.mrf.mxu1 }
 0x252   : > { %v3061_v36 = vpop.f32.mrf.mxu3 }
 0x253   : > { %v2866_v33 = vpop.f32.mrf.mxu2  ;;  %v3062_v20 = vadd.f32 %v3061_v36, %v3048_v62 }
 0x254   : > { %v2880_v4 = vadd.f32 %v2879_v32, %v2866_v33 }
 0x256   : > { %v2885_v40 = vrot.slane %v2880_v4, 7  ;;  %v3076_v41 = vpop.f32.mrf.mxu0 }
 0x257   : > { %v3274_v46 = vpop.f32.mrf.mxu1 }
 0x258   : > { %v2886_v6 = vsel %vm1634_vm1, %v2854_v44, %v2885_v40 }
 0x259   : > { %v2888_v7 = vadd.f32 %v2886_v6, %v2680_v2 }
 0x25a   : > { %v3063_v11 = vpop.f32.mrf.mxu3 }
 0x25b   : > { %v2868_v10 = vpop.f32.mrf.mxu2 }
 0x25e   : > { %v3298_v12 = vpop.f32.mrf.mxu0 }
 0x263   : > { %v3087_v13 = vpop.f32.mrf.mxu2 }
 0x264   : > { %v3088_v49 = vadd.f32 %v3087_v13, %v3074_v59 }
 0x266   : > { %v3300_v43 = vpop.f32.mrf.mxu0  ;;  %v3093_v8 = vrot.slane %v3088_v49, 7 }
 0x268   : > { %v3094_v9 = vsel %vm1634_vm1, %v3062_v20, %v3093_v8 }
 0x269   : > { %v3096_v21 = vadd.f32 %v3094_v9, %v2888_v7 }
 0x26b   : > { %v3089_v17 = vpop.f32.mrf.mxu2 }
 0x272   : > { %v3259_v18 = vpop.f32.mrf.mxu3 }
 0x273   : > { %v3273_v51 = vadd.f32 %v3272_v61, %v3259_v18 }
 0x27a   : > { %v3261_v19 = vpop.f32.mrf.mxu3 }
 0x283   : > { %v3285_v50 = vpop.f32.mrf.mxu2 }
 0x284   : > { %v3299_v15 = vadd.f32 %v3298_v12, %v3285_v50 }
 0x286   : > { %v3304_v35 = vrot.slane %v3299_v15, 7 }
 0x288   : > { %v3305_v5 = vsel %vm1634_vm1, %v3273_v51, %v3304_v35 }
 0x289   : > { %v3307_v26 = vadd.f32 %v3305_v5, %v3096_v21 }
 0x28b   : > { %v3287_v27 = vpop.f32.mrf.mxu2  ;;  %v3308_v22 = vmax.f32 %v3307_v26, 0.0 }
 0x28d   : > { %3320 = vrot.lane.b32.xlu0 %v3308_v22, %s5381_s15 }
 0x2ff   : > { %v3321_v28 = vpop.permute.xlu0 %3320 }
 0x300   : > { %v3322_v29 = vrot.slane %v3321_v28, 7 }
 0x302   : > { %v3323_v31 = vsel %vm1575_vm0, %v3322_v29, %v3321_v28 }
 0x303   : > { %3328 = vst.msk [vmem:[%s6936_s12 + $0x1] sm:$0x3] %vm3327_vm5, %v3323_v31 }
 0x304   : > { %5344 = shalt.err (!%p5341_p3)
}
 0x305   : > { %5277 = dma.vmem_to_hbm [thread:$0]  (%p5450_p5), %s3343_s7, 48, %s3345_s11, %s3330_s22  }
 0x306 PF: > { %p5283_p4 = scmp.ge.s32.totalorder %s5379_s21, 2  ;;  %s3356_s10 = sand.u32 1, %s5367_s18  }
 0x307   : > { %s3357_s12 = scalar_lea.sflag [#allocation3], %s3356_s10 }
 0x308   : > { %p5280_p7 = pnand %p5283_p4, %p5454_p6 }
 0x30a   : > { %p5281_p8 = pneg %p5280_p7 }
 0x30c   : > { %5362 = dma.done.wait (%p5281_p8), %s3357_s12, 48  }
 0x30d   : > { %5364 = vsyncadd (%p5281_p8), %s3357_s12, 4294967248  ;;  %p15_p9 = scmp.ge.s32.totalorder %s5437_s24, 4   ;;  %s7930_s18 = smov %s5371_s19 }
 0x30e   : > { %s7931_s19 = smov %s5375_s20  ;;  %s7932_s20 = smov %s5448_s27 }
 0x30f   : > { %s7933_s21 = smov %s5437_s24  ;;  %17 = sbr.rel (!%p15_p9) target bundleno = 3 (0x3), region = 75 }
 0x314   :  { %3363 = vsyncpa [#allocation3], 1 }
 0x315   :  { %3365 = vsyncpa [#allocation3 + $0x1], 1 }

</bundles_post_ra>
